<compile_context>
chip_gen: v5e
topology: v5e:2x2
jax: 0.10.0
libtpu: 0.0.40
codegen_flags: <defaults>
</compile_context>

<pallas_src>
import jax
import jax.numpy as jnp
import numpy as np
from jax.experimental import pallas as pl
from jax.experimental.pallas import tpu as pltpu

H, W = 14, 10            # conv input spatial (pooled map is 7x5, flatten is 32*7*5 = 1120)
PH, PW = H // 2, W // 2  # 7, 5
C_OUT = 32
FEAT = C_OUT * PH * PW   # 1120
HID = 128
LANES = 128              # padded logit width (lane-dense store); real classes = 2
NUM_CLASSES = 2


def fused_cnn_kernel(x_ref, m_ref, bc_ref, w1_ref, b1_ref, w2_ref, b2_ref, out_ref):
    # x_ref : (TN, 140)        f32  raw pixels, one row per image
    # m_ref : (4, 140, 1120)   bf16 folded conv+pad+im2col+pool matrices (one per pool offset)
    # bc_ref: (1, 1120)        f32  conv bias tiled over (ph, pw)
    # w1_ref: (1120, 128)      bf16 fc1 weights, rows in (ph, pw, c) order
    # b1_ref: (1, 128)         f32
    # w2_ref: (128, 128)       bf16 fc2 weights padded to 128 output lanes
    # b2_ref: (1, 128)         f32
    # out_ref: (TN, 128)       f32  logits live in columns [0, 2)
    x = x_ref[...].astype(jnp.bfloat16)

    # conv(+implicit zero pad) + 2x2 maxpool: max over the four pool offsets, one matmul each.
    pooled = jnp.dot(x, m_ref[0], preferred_element_type=jnp.float32)
    for q in range(1, 4):
        pooled = jnp.maximum(
            pooled, jnp.dot(x, m_ref[q], preferred_element_type=jnp.float32))

    # bias + ReLU after the max (mathematically identical to relu-then-pool).
    act = jnp.maximum(pooled + bc_ref[...], 0.0)                 # (TN, 1120) f32, (ph,pw,c) order

    h = jnp.dot(act.astype(jnp.bfloat16), w1_ref[...],
                preferred_element_type=jnp.float32) + b1_ref[...]
    h = jnp.maximum(h, 0.0)                                      # (TN, 128) f32

    out_ref[...] = jnp.dot(h.astype(jnp.bfloat16), w2_ref[...],
                           preferred_element_type=jnp.float32) + b2_ref[...]


def _pool_im2col_selector():
    """Constant 0/1 tensor S[p, q, ph, pw, dy, dx]: input pixel p feeds tap (dy,dx) of the conv
    output at pooled position (ph,pw) with pool offset q=(i,j).  Out-of-bounds taps (the pad=1
    border) are simply absent -> zero padding is folded in for free."""
    S = np.zeros((H * W, 4, PH, PW, 3, 3), dtype=np.float32)
    for q in range(4):
        pi, pj = q // 2, q % 2
        for ph in range(PH):
            for pw in range(PW):
                for dy in range(3):
                    for dx in range(3):
                        hh = 2 * ph + pi + dy - 1
                        ww = 2 * pw + pj + dx - 1
                        if 0 <= hh < H and 0 <= ww < W:
                            S[hh * W + ww, q, ph, pw, dy, dx] = 1.0
    return S


def fold_params(params):
    """One-time weight folding (the analogue of exporting/quantizing a model for inference)."""
    conv_w = params["conv_w"].astype(jnp.float32)   # (32, 1, 3, 3)
    conv_b = params["conv_b"].astype(jnp.float32)   # (32,)
    fc1_w = params["fc1_w"].astype(jnp.float32)     # (128, 1120), cols in (c, ph, pw) order
    fc1_b = params["fc1_b"].astype(jnp.float32)     # (128,)
    fc2_w = params["fc2_w"].astype(jnp.float32)     # (2, 128)
    fc2_b = params["fc2_b"].astype(jnp.float32)     # (2,)

    # Fold conv weights + zero pad + im2col + pool expansion into 4 dense matrices.
    S = jnp.asarray(_pool_im2col_selector())                       # (140, 4, 7, 5, 3, 3) constant
    m = jnp.einsum("pqhwde,cde->qphwc", S, conv_w[:, 0])           # (4, 140, 7, 5, 32)
    m = m.reshape(4, H * W, FEAT).astype(jnp.bfloat16)             # cols in (ph, pw, c) order

    bc = jnp.tile(conv_b, PH * PW).reshape(1, FEAT)                # bias per (ph, pw, c) column

    # Permute fc1 columns from torch's (c, ph, pw) flatten order to (ph, pw, c).
    w1 = fc1_w.reshape(HID, C_OUT, PH, PW).transpose(2, 3, 1, 0).reshape(FEAT, HID)
    w1 = w1.astype(jnp.bfloat16)
    b1 = fc1_b.reshape(1, HID)

    # Pad fc2 to 128 output lanes so the kernel's final store is lane-dense.
    w2 = jnp.pad(fc2_w.T, ((0, 0), (0, LANES - NUM_CLASSES))).astype(jnp.bfloat16)  # (128, 128)
    b2 = jnp.pad(fc2_b, (0, LANES - NUM_CLASSES)).reshape(1, LANES)

    return {"m": m, "bc": bc, "w1": w1, "b1": b1, "w2": w2, "b2": b2}


def _round_up(a, b):
    return (a + b - 1) // b * b


def simple_cnn_forward(x, folded, *, max_rows=256):
    """x: (N, 1, 14, 10) float32, NCHW (same as the PyTorch module). Returns (N, 2) logits."""
    N, C, HH, WW = x.shape
    assert C == 1 and HH == H and WW == W, "SimpleCNN expects (N, 1, 14, 10) inputs"

    x2d = x.reshape(N, H * W).astype(jnp.float32)                  # no im2col glue, just a reshape
    tn = min(max_rows, _round_up(N, 8))                            # batch tile (rows per grid step)
    npad = _round_up(N, tn)
    if npad != N:
        x2d = jnp.pad(x2d, ((0, npad - N), (0, 0)))

    out = pl.pallas_call(
        fused_cnn_kernel,
        out_shape=jax.ShapeDtypeStruct((npad, LANES), jnp.float32),
        grid=(npad // tn,),
        in_specs=[
            pl.BlockSpec((tn, H * W), lambda i: (i, 0)),           # image rows (tiled over batch)
            pl.BlockSpec((4, H * W, FEAT), lambda i: (0, 0, 0)),   # folded conv matrices (resident)
            pl.BlockSpec((1, FEAT), lambda i: (0, 0)),             # conv bias
            pl.BlockSpec((FEAT, HID), lambda i: (0, 0)),           # fc1
            pl.BlockSpec((1, HID), lambda i: (0, 0)),              # fc1 bias
            pl.BlockSpec((HID, LANES), lambda i: (0, 0)),          # fc2 (padded)
            pl.BlockSpec((1, LANES), lambda i: (0, 0)),            # fc2 bias (padded)
        ],
        out_specs=pl.BlockSpec((tn, LANES), lambda i: (i, 0)),
        compiler_params=pltpu.CompilerParams(
            dimension_semantics=("parallel",)),
    )(x2d, folded["m"], folded["bc"], folded["w1"], folded["b1"],
      folded["w2"], folded["b2"])

    return out[:N, :NUM_CLASSES]


def init_params(key):
    """Deterministic PyTorch-default-style init (uniform +/- 1/sqrt(fan_in))."""
    ks = jax.random.split(key, 6)

    def u(k, shape, fan_in):
        bound = 1.0 / jnp.sqrt(jnp.float32(fan_in))
        return jax.random.uniform(k, shape, jnp.float32, -bound, bound)

    return {
        "conv_w": u(ks[0], (32, 1, 3, 3), 9),
        "conv_b": u(ks[1], (32,), 9),
        "fc1_w": u(ks[2], (128, FEAT), FEAT),
        "fc1_b": u(ks[3], (128,), FEAT),
        "fc2_w": u(ks[4], (2, 128), 128),
        "fc2_b": u(ks[5], (2,), 128),
    }


def reference_forward(x, p):
    """Pure-JAX reference mirroring the PyTorch forward."""
    y = jax.lax.conv_general_dilated(
        x, p["conv_w"], window_strides=(1, 1), padding=((1, 1), (1, 1)),
        dimension_numbers=("NCHW", "OIHW", "NCHW"))
    y = y + p["conv_b"][None, :, None, None]
    y = jnp.maximum(y, 0.0)
    N, C, HH, WW = y.shape
    y = y.reshape(N, C, HH // 2, 2, WW // 2, 2).max(axis=(3, 5))
    flat = y.reshape(N, C * (HH // 2) * (WW // 2))
    h = jnp.maximum(flat @ p["fc1_w"].T + p["fc1_b"], 0.0)
    return h @ p["fc2_w"].T + p["fc2_b"]


if __name__ == "__main__":
    key = jax.random.PRNGKey(0)
    kx, kp = jax.random.split(key)
    x = jax.random.normal(kx, (2, 1, 14, 10), dtype=jnp.float32)   # NCHW
    params = init_params(kp)

    folded = fold_params(params)                                   # one-time weight folding
    forward = jax.jit(simple_cnn_forward)

    out = jax.block_until_ready(forward(x, folded))
    ref = jax.block_until_ready(reference_forward(x, params))

    assert out.shape == (2, 2), out.shape
    # bf16 matmul operands with f32 accumulation -> small approximation vs. the f32 reference.
    assert jnp.allclose(out, ref, rtol=2e-2, atol=2e-2), (out, ref)

    print("KERNEL_OK")
</pallas_src>

<mosaic_0001>
module attributes {stable_mosaic.version = 11 : i64} {
  func.func @fused_cnn_kernel(%arg0: i32, %arg1: memref<8x140xf32, #tpu.memory_space<vmem>>, %arg2: memref<4x140x1120xbf16, #tpu.memory_space<vmem>>, %arg3: memref<1x1120xf32, #tpu.memory_space<vmem>>, %arg4: memref<1120x128xbf16, #tpu.memory_space<vmem>>, %arg5: memref<1x128xf32, #tpu.memory_space<vmem>>, %arg6: memref<128x128xbf16, #tpu.memory_space<vmem>>, %arg7: memref<1x128xf32, #tpu.memory_space<vmem>>, %arg8: memref<8x128xf32, #tpu.memory_space<vmem>>) attributes {dimension_semantics = [#tpu.dimension_semantics<parallel>], iteration_bounds = array<i64: 1>, scalar_prefetch = 0 : i64, scratch_operands = 0 : i64, tpu.core_type = #tpu.core_type<tc>, window_params = [{transform_indices = @transform_0, window_bounds = array<i64: 8, 140>}, {pipeline_mode = #tpu.pipeline_mode<synchronous>, transform_indices = @transform_1, window_bounds = array<i64: 4, 140, 1120>}, {pipeline_mode = #tpu.pipeline_mode<synchronous>, transform_indices = @transform_2, window_bounds = array<i64: 1, 1120>}, {pipeline_mode = #tpu.pipeline_mode<synchronous>, transform_indices = @transform_3, window_bounds = array<i64: 1120, 128>}, {pipeline_mode = #tpu.pipeline_mode<synchronous>, transform_indices = @transform_4, window_bounds = array<i64: 1, 128>}, {pipeline_mode = #tpu.pipeline_mode<synchronous>, transform_indices = @transform_5, window_bounds = array<i64: 128, 128>}, {pipeline_mode = #tpu.pipeline_mode<synchronous>, transform_indices = @transform_6, window_bounds = array<i64: 1, 128>}, {transform_indices = @transform_7, window_bounds = array<i64: 8, 128>}]} {
    %c0 = arith.constant 0 : index
    %c0_0 = arith.constant 0 : index
    %0 = vector.load %arg1[%c0, %c0_0] : memref<8x140xf32, #tpu.memory_space<vmem>>, vector<8x140xf32>
    %1 = arith.truncf %0 : vector<8x140xf32> to vector<8x140xbf16>
    %c0_1 = arith.constant 0 : index
    %c0_2 = arith.constant 0 : index
    %c0_3 = arith.constant 0 : index
    %2 = vector.load %arg2[%c0_1, %c0_2, %c0_3] : memref<4x140x1120xbf16, #tpu.memory_space<vmem>>, vector<1x140x1120xbf16>
    %3 = vector.shape_cast %2 : vector<1x140x1120xbf16> to vector<140x1120xbf16>
    %cst = arith.constant dense<0.000000e+00> : vector<8x1120xf32>
    %4 = tpu.matmul %1, %3, %cst {dimension_numbers = #tpu.dot_dimension_numbers<[1], [0], [0], [1], [0, 0, 1, 1], [], []>} : vector<8x140xbf16>, vector<140x1120xbf16>, vector<8x1120xf32> -> vector<8x1120xf32>
    %c1 = arith.constant 1 : index
    %c0_4 = arith.constant 0 : index
    %c0_5 = arith.constant 0 : index
    %5 = vector.load %arg2[%c1, %c0_4, %c0_5] : memref<4x140x1120xbf16, #tpu.memory_space<vmem>>, vector<1x140x1120xbf16>
    %6 = vector.shape_cast %5 : vector<1x140x1120xbf16> to vector<140x1120xbf16>
    %cst_6 = arith.constant dense<0.000000e+00> : vector<8x1120xf32>
    %7 = tpu.matmul %1, %6, %cst_6 {dimension_numbers = #tpu.dot_dimension_numbers<[1], [0], [0], [1], [0, 0, 1, 1], [], []>} : vector<8x140xbf16>, vector<140x1120xbf16>, vector<8x1120xf32> -> vector<8x1120xf32>
    %8 = arith.maximumf %4, %7 : vector<8x1120xf32>
    %c2 = arith.constant 2 : index
    %c0_7 = arith.constant 0 : index
    %c0_8 = arith.constant 0 : index
    %9 = vector.load %arg2[%c2, %c0_7, %c0_8] : memref<4x140x1120xbf16, #tpu.memory_space<vmem>>, vector<1x140x1120xbf16>
    %10 = vector.shape_cast %9 : vector<1x140x1120xbf16> to vector<140x1120xbf16>
    %cst_9 = arith.constant dense<0.000000e+00> : vector<8x1120xf32>
    %11 = tpu.matmul %1, %10, %cst_9 {dimension_numbers = #tpu.dot_dimension_numbers<[1], [0], [0], [1], [0, 0, 1, 1], [], []>} : vector<8x140xbf16>, vector<140x1120xbf16>, vector<8x1120xf32> -> vector<8x1120xf32>
    %12 = arith.maximumf %8, %11 : vector<8x1120xf32>
    %c3 = arith.constant 3 : index
    %c0_10 = arith.constant 0 : index
    %c0_11 = arith.constant 0 : index
    %13 = vector.load %arg2[%c3, %c0_10, %c0_11] : memref<4x140x1120xbf16, #tpu.memory_space<vmem>>, vector<1x140x1120xbf16>
    %14 = vector.shape_cast %13 : vector<1x140x1120xbf16> to vector<140x1120xbf16>
    %cst_12 = arith.constant dense<0.000000e+00> : vector<8x1120xf32>
    %15 = tpu.matmul %1, %14, %cst_12 {dimension_numbers = #tpu.dot_dimension_numbers<[1], [0], [0], [1], [0, 0, 1, 1], [], []>} : vector<8x140xbf16>, vector<140x1120xbf16>, vector<8x1120xf32> -> vector<8x1120xf32>
    %16 = arith.maximumf %12, %15 : vector<8x1120xf32>
    %c0_13 = arith.constant 0 : index
    %c0_14 = arith.constant 0 : index
    %17 = vector.load %arg3[%c0_13, %c0_14] : memref<1x1120xf32, #tpu.memory_space<vmem>>, vector<1x1120xf32>
    %18 = vector.broadcast %17 : vector<1x1120xf32> to vector<8x1120xf32>
    %19 = arith.addf %16, %18 : vector<8x1120xf32>
    %cst_15 = arith.constant 0.000000e+00 : f32
    %20 = vector.broadcast %cst_15 : f32 to vector<8x1120xf32>
    %21 = arith.maximumf %19, %20 : vector<8x1120xf32>
    %22 = arith.truncf %21 : vector<8x1120xf32> to vector<8x1120xbf16>
    %c0_16 = arith.constant 0 : index
    %c0_17 = arith.constant 0 : index
    %23 = vector.load %arg4[%c0_16, %c0_17] : memref<1120x128xbf16, #tpu.memory_space<vmem>>, vector<1120x128xbf16>
    %cst_18 = arith.constant dense<0.000000e+00> : vector<8x128xf32>
    %24 = tpu.matmul %22, %23, %cst_18 {dimension_numbers = #tpu.dot_dimension_numbers<[1], [0], [0], [1], [0, 0, 1, 1], [], []>} : vector<8x1120xbf16>, vector<1120x128xbf16>, vector<8x128xf32> -> vector<8x128xf32>
    %c0_19 = arith.constant 0 : index
    %c0_20 = arith.constant 0 : index
    %25 = vector.load %arg5[%c0_19, %c0_20] : memref<1x128xf32, #tpu.memory_space<vmem>>, vector<1x128xf32>
    %26 = vector.broadcast %25 : vector<1x128xf32> to vector<8x128xf32>
    %27 = arith.addf %24, %26 : vector<8x128xf32>
    %cst_21 = arith.constant 0.000000e+00 : f32
    %28 = vector.broadcast %cst_21 : f32 to vector<8x128xf32>
    %29 = arith.maximumf %27, %28 : vector<8x128xf32>
    %30 = arith.truncf %29 : vector<8x128xf32> to vector<8x128xbf16>
    %c0_22 = arith.constant 0 : index
    %c0_23 = arith.constant 0 : index
    %31 = vector.load %arg6[%c0_22, %c0_23] : memref<128x128xbf16, #tpu.memory_space<vmem>>, vector<128x128xbf16>
    %cst_24 = arith.constant dense<0.000000e+00> : vector<8x128xf32>
    %32 = tpu.matmul %30, %31, %cst_24 {dimension_numbers = #tpu.dot_dimension_numbers<[1], [0], [0], [1], [0, 0, 1, 1], [], []>} : vector<8x128xbf16>, vector<128x128xbf16>, vector<8x128xf32> -> vector<8x128xf32>
    %c0_25 = arith.constant 0 : index
    %c0_26 = arith.constant 0 : index
    %33 = vector.load %arg7[%c0_25, %c0_26] : memref<1x128xf32, #tpu.memory_space<vmem>>, vector<1x128xf32>
    %34 = vector.broadcast %33 : vector<1x128xf32> to vector<8x128xf32>
    %35 = arith.addf %32, %34 : vector<8x128xf32>
    %c0_27 = arith.constant 0 : index
    %c0_28 = arith.constant 0 : index
    %36 = vector.load %arg8[%c0_27, %c0_28] : memref<8x128xf32, #tpu.memory_space<vmem>>, vector<8x128xf32>
    tpu.vector_store %arg8[%c0_27, %c0_28], %35 {strides = array<i32>} : memref<8x128xf32, #tpu.memory_space<vmem>>, vector<8x128xf32>,
    return
  }
  func.func @transform_0(%arg0: i32) -> (i32, i32) {
    %c0_i32 = arith.constant 0 : i32
    %c0_i32_0 = arith.constant 0 : i32
    return %arg0, %c0_i32 : i32, i32
  }
  func.func @transform_1(%arg0: i32) -> (i32, i32, i32) {
    %c0_i32 = arith.constant 0 : i32
    %c0_i32_0 = arith.constant 0 : i32
    %c0_i32_1 = arith.constant 0 : i32
    %c0_i32_2 = arith.constant 0 : i32
    return %c0_i32, %c0_i32_0, %c0_i32_1 : i32, i32, i32
  }
  func.func @transform_2(%arg0: i32) -> (i32, i32) {
    %c0_i32 = arith.constant 0 : i32
    %c0_i32_0 = arith.constant 0 : i32
    %c0_i32_1 = arith.constant 0 : i32
    return %c0_i32, %c0_i32_0 : i32, i32
  }
  func.func @transform_3(%arg0: i32) -> (i32, i32) {
    %c0_i32 = arith.constant 0 : i32
    %c0_i32_0 = arith.constant 0 : i32
    %c0_i32_1 = arith.constant 0 : i32
    return %c0_i32, %c0_i32_0 : i32, i32
  }
  func.func @transform_4(%arg0: i32) -> (i32, i32) {
    %c0_i32 = arith.constant 0 : i32
    %c0_i32_0 = arith.constant 0 : i32
    %c0_i32_1 = arith.constant 0 : i32
    return %c0_i32, %c0_i32_0 : i32, i32
  }
  func.func @transform_5(%arg0: i32) -> (i32, i32) {
    %c0_i32 = arith.constant 0 : i32
    %c0_i32_0 = arith.constant 0 : i32
    %c0_i32_1 = arith.constant 0 : i32
    return %c0_i32, %c0_i32_0 : i32, i32
  }
  func.func @transform_6(%arg0: i32) -> (i32, i32) {
    %c0_i32 = arith.constant 0 : i32
    %c0_i32_0 = arith.constant 0 : i32
    %c0_i32_1 = arith.constant 0 : i32
    return %c0_i32, %c0_i32_0 : i32, i32
  }
  func.func @transform_7(%arg0: i32) -> (i32, i32) {
    %c0_i32 = arith.constant 0 : i32
    %c0_i32_0 = arith.constant 0 : i32
    return %arg0, %c0_i32 : i32, i32
  }
}

</mosaic_0001>

<bundles_post_ra>
// kernel: simple_cnn_forward.1
= control target key start
LH: loop header
LB: loop body
LE: loop exit
PB: predicated region body
PF: predicated region fallthrough
CT: control target
= control target key end

     0   :  { %vm530_vm0 = vcmask 1045504   ;;  %vm526_vm1 = vcmask 97280   ;;  %vm3703_vm2 = vcmask 785408   ;;  %s8749_s1 = inlined_call_operand.vmem [shape: bf16[4,140,1120], index: 1, kind: input, shape index: {}]   ;;  %s8750_s0 = inlined_call_operand.vmem [shape: f32[8,140], index: 0, kind: input, shape index: {}]   ;;  %s8751_s2 = inlined_call_operand.vmem [shape: f32[1,1120], index: 2, kind: input, shape index: {}]   ;;  %s8752_s3 = inlined_call_operand.vmem [shape: bf16[1120,128], index: 3, kind: input, shape index: {}]   ;;  %s8753_s4 = inlined_call_operand.vmem [shape: f32[1,128], index: 4, kind: input, shape index: {}]   ;;  %s8754_s6 = inlined_call_operand.vmem [shape: f32[1,128], index: 6, kind: input, shape index: {}]   ;;  %s8755_s5 = inlined_call_operand.vmem [shape: bf16[128,128], index: 5, kind: input, shape index: {}]   ;;  %s8756_s7 = inlined_call_operand.vmem [shape: f32[8,128], index: 7, kind: output, shape index: {}]  }
   0x1   :  { %v4166_v0 = vld [vmem:[%s8749_s1 + $0x1f8] sm:$0xf]  ;;  %v5894_v1 = vld [vmem:[%s8749_s1 + $0x218] sm:$0xf0]  ;;  %v4168_v4 = vld [vmem:[%s8749_s1 + $0x21c] sm:$0xf0] }
   0x2   :  { %v5890_v2 = vld [vmem:[%s8749_s1 + $0x1fc] sm:$0xf]  ;;  %v4167_v3 = vor.u32 %v5894_v1, %v4166_v0  ;;  %v4130_v5 = vld [vmem:[%s8749_s1 + $0x1b0] sm:$0xf]  ;;  %v5885_v6 = vld [vmem:[%s8749_s1 + $0x1d0] sm:$0xf0] }
   0x3   :  { %v4171_v7 = vor.u32 %v5890_v2, %v4168_v4  ;;  %v5881_v8 = vld [vmem:[%s8749_s1 + $0x1b4] sm:$0xf]  ;;  %v4132_v9 = vld [vmem:[%s8749_s1 + $0x1d4] sm:$0xf0]  ;;  %v4202_v10 = vld [vmem:[%s8749_s1 + $0x240] sm:$0xf]  ;;  %v4131_v11 = vor.u32 %v5885_v6, %v4130_v5 }
   0x4   :  { %558 = vmatpush.bf16.msra.mxu0 %v4167_v3  ;;  %v5903_v12 = vld [vmem:[%s8749_s1 + $0x260] sm:$0x30]  ;;  %v4135_v13 = vor.u32 %v5881_v8, %v4132_v9  ;;  %v4094_v15 = vld [vmem:[%s8749_s1 + $0x168] sm:$0xf]  ;;  %v5876_v16 = vld [vmem:[%s8749_s1 + $0x188] sm:$0xf0] }
   0x5   :  { %584 = vmatpush.bf16.msra.mxu2 %v4171_v7  ;;  %v4203_v14 = vor.u32 %v5903_v12, %v4202_v10  ;;  %v4174_v17 = vld [vmem:[%s8749_s1 + $0x200] sm:$0xf]  ;;  %v5872_v18 = vld [vmem:[%s8749_s1 + $0x16c] sm:$0xf]  ;;  %v4096_v19 = vld [vmem:[%s8749_s1 + $0x18c] sm:$0xf0]  ;;  %v4095_v24 = vor.u32 %v5876_v16, %v4094_v15 }
   0x6   :  { %v5895_v20 = vld [vmem:[%s8749_s1 + $0x220] sm:$0xf0]  ;;  %v28_v23 = vld [vmem:[%s8750_s0 + $0x8] sm:$0xff]  ;;  %v4138_v25 = vld [vmem:[%s8749_s1 + $0x1b8] sm:$0xf]  ;;  %v4099_v29 = vor.u32 %v5872_v18, %v4096_v19 }
   0x7   :  { %v532_v21 = vsel %vm530_vm0, %v4203_v14, 0  ;;  %v4175_v22 = vor.u32 %v5895_v20, %v4174_v17  ;;  %v5886_v26 = vld [vmem:[%s8749_s1 + $0x1d8] sm:$0xf0]  ;;  %v4210_v27 = vld [vmem:[%s8749_s1 + $0x248] sm:$0xf]  ;;  %v6333_v28 = vpack.c.bf16 %v28_v23, %v28_v23 }
   0x8   :  { %559 = vmatpush.bf16.msra.mxu0 %v4131_v11  ;;  %578 = vmatpush.bf16.msra.mxu1 %v532_v21  ;;  %v4058_v30 = vld [vmem:[%s8749_s1 + $0x120] sm:$0xf]  ;;  %v5867_v31 = vld [vmem:[%s8749_s1 + $0x140] sm:$0xf0]  ;;  %v4139_v32 = vor.u32 %v5886_v26, %v4138_v25  ;;  %v5904_v33 = vld [vmem:[%s8749_s1 + $0x268] sm:$0x30] }
   0x9   :  { %585 = vmatpush.bf16.msra.mxu2 %v4135_v13  ;;  %v5863_v34 = vld [vmem:[%s8749_s1 + $0x124] sm:$0xf]  ;;  %v4060_v35 = vld [vmem:[%s8749_s1 + $0x144] sm:$0xf0]  ;;  %v4211_v36 = vor.u32 %v5904_v33, %v4210_v27  ;;  %v4102_v37 = vld [vmem:[%s8749_s1 + $0x170] sm:$0xf]  ;;  %v4059_v41 = vor.u32 %v5867_v31, %v4058_v30 }
   0xa   :  { %v5877_v38 = vld [vmem:[%s8749_s1 + $0x190] sm:$0xf0]  ;;  %v5891_v39 = vld [vmem:[%s8749_s1 + $0x204] sm:$0xf]  ;;  %v4176_v40 = vld [vmem:[%s8749_s1 + $0x224] sm:$0xf0]  ;;  %v4063_v46 = vor.u32 %v5863_v34, %v4060_v35 }
   0xb   :  { %4236 = vmatmul.msk.bf16.vlgmr.msra.gmra.mxu1 %vm526_vm1, %v6333_v28  ;;  %v538_v42 = vsel %vm530_vm0, %v4211_v36, 0  ;;  %v4022_v43 = vld [vmem:[%s8749_s1 + $0xd8] sm:$0xf]  ;;  %v5858_v44 = vld [vmem:[%s8749_s1 + $0xf8] sm:$0xf0]  ;;  %v4179_v45 = vor.u32 %v5891_v39, %v4176_v40  ;;  %v4103_v49 = vor.u32 %v5877_v38, %v4102_v37  ;;  %v27_v34 = vld [vmem:[%s8750_s0] sm:$0xff] }
   0xc   :  { %610 = vmatpush.bf16.msrb.mxu1 %v4175_v22  ;;  %560 = vmatpush.bf16.msra.mxu0 %v4095_v24  ;;  %v5854_v47 = vld [vmem:[%s8749_s1 + $0xdc] sm:$0xf]  ;;  %v4024_v48 = vld [vmem:[%s8749_s1 + $0xfc] sm:$0xf0]  ;;  %v4066_v50 = vld [vmem:[%s8749_s1 + $0x128] sm:$0xf]  ;;  %v4023_v55 = vor.u32 %v5858_v44, %v4022_v43 }
   0xd   :  { %586 = vmatpush.bf16.msra.mxu2 %v4099_v29  ;;  %630 = vmatpush.bf16.msra.mxu3 %v538_v42  ;;  %v5868_v51 = vld [vmem:[%s8749_s1 + $0x148] sm:$0xf0]  ;;  %v5882_v52 = vld [vmem:[%s8749_s1 + $0x1bc] sm:$0xf]  ;;  %v4140_v53 = vld [vmem:[%s8749_s1 + $0x1dc] sm:$0xf0]  ;;  %v4027_v58 = vor.u32 %v5854_v47, %v4024_v48  ;;  %v6500_v47 = vpack.c.bf16 %v27_v34, %v27_v34 }
   0xe   :  { %v4143_v54 = vor.u32 %v5882_v52, %v4140_v53  ;;  %v3986_v56 = vld [vmem:[%s8749_s1 + $0x90] sm:$0xf]  ;;  %v5849_v57 = vld [vmem:[%s8749_s1 + $0xb0] sm:$0xf0]  ;;  %v4067_v60 = vor.u32 %v5868_v51, %v4066_v50  ;;  %v4104_v62 = vld [vmem:[%s8749_s1 + $0x194] sm:$0xf0] }
   0xf   :  { %v5845_v59 = vld [vmem:[%s8749_s1 + $0x94] sm:$0xf]  ;;  %v3988_v63 = vld [vmem:[%s8749_s1 + $0xb4] sm:$0xf0]  ;;  %v4030_v0 = vld [vmem:[%s8749_s1 + $0xe0] sm:$0xf]  ;;  %v3987_v3 = vor.u32 %v5849_v57, %v3986_v56 }
  0x10   :  { %611 = vmatpush.bf16.msrb.mxu1 %v4139_v32  ;;  %561 = vmatpush.bf16.msra.mxu0 %v4059_v41  ;;  %v5873_v61 = vld [vmem:[%s8749_s1 + $0x174] sm:$0xf]  ;;  %v5859_v1 = vld [vmem:[%s8749_s1 + $0x100] sm:$0xf0]  ;;  %v5864_v4 = vld [vmem:[%s8749_s1 + $0x12c] sm:$0xf]  ;;  %v3991_v6 = vor.u32 %v5845_v59, %v3988_v63 }
  0x11   :  { %636 = vmatpush.bf16.msrb.mxu3 %v4179_v45  ;;  %587 = vmatpush.bf16.msra.mxu2 %v4063_v46  ;;  %v4107_v2 = vor.u32 %v5873_v61, %v4104_v62  ;;  %v4068_v5 = vld [vmem:[%s8749_s1 + $0x14c] sm:$0xf0]  ;;  %v3950_v7 = vld [vmem:[%s8749_s1 + $0x48] sm:$0xf]  ;;  %v5840_v8 = vld [vmem:[%s8749_s1 + $0x68] sm:$0xf0]  ;;  %v4031_v10 = vor.u32 %v5859_v1, %v4030_v0 }
  0x12   :  { %4238 = vmatmul.msk.bf16.vlgmr.msra.gmra.mxu3 %vm526_vm1, %v6333_v28  ;;  %v5836_v9 = vld [vmem:[%s8749_s1 + $0x4c] sm:$0xf]  ;;  %v3952_v11 = vld [vmem:[%s8749_s1 + $0x6c] sm:$0xf0]  ;;  %v3994_v12 = vld [vmem:[%s8749_s1 + $0x98] sm:$0xf]  ;;  %v4071_v14 = vor.u32 %v5864_v4, %v4068_v5  ;;  %v3951_v17 = vor.u32 %v5840_v8, %v3950_v7 }
  0x13   :  { %v5850_v13 = vld [vmem:[%s8749_s1 + $0xb8] sm:$0xf0]  ;;  %v5899_v15 = vld [vmem:[%s8749_s1 + $0x244] sm:$0xf]  ;;  %v4204_v16 = vld [vmem:[%s8749_s1 + $0x264] sm:$0x30]  ;;  %v3955_v20 = vor.u32 %v5836_v9, %v3952_v11 }
  0x14   :  { %612 = vmatpush.bf16.msrb.mxu1 %v4103_v49  ;;  %562 = vmatpush.bf16.msra.mxu0 %v4023_v55  ;;  %v5855_v18 = vld [vmem:[%s8749_s1 + $0xe4] sm:$0xf]  ;;  %v4032_v19 = vld [vmem:[%s8749_s1 + $0x104] sm:$0xf0]  ;;  %v3914_v21 = vld [vmem:[%s8749_s1] sm:$0xf]  ;;  %v3995_v23 = vor.u32 %v5850_v13, %v3994_v12  ;;  %v4207_v27 = vor.u32 %v5899_v15, %v4204_v16 }
  0x15   :  { %637 = vmatpush.bf16.msrb.mxu3 %v4143_v54  ;;  %588 = vmatpush.bf16.msra.mxu2 %v4027_v58  ;;  %v5831_v22 = vld [vmem:[%s8749_s1 + $0x20] sm:$0xf0]  ;;  %v3916_v25 = vld [vmem:[%s8749_s1 + $0x24] sm:$0xf0]  ;;  %v5896_v29 = vld [vmem:[%s8749_s1 + $0x228] sm:$0xf0]  ;;  %v4035_v32 = vor.u32 %v5855_v18, %v4032_v19 }
  0x16   :  { %v5827_v24 = vld [vmem:[%s8749_s1 + $0x4] sm:$0xf]  ;;  %v4182_v26 = vld [vmem:[%s8749_s1 + $0x208] sm:$0xf]  ;;  %v3958_v30 = vld [vmem:[%s8749_s1 + $0x50] sm:$0xf]  ;;  %v3915_v33 = vor.u32 %v5831_v22, %v3914_v21 }
  0x17   :  { %v5841_v31 = vld [vmem:[%s8749_s1 + $0x70] sm:$0xf0]  ;;  %v5846_v35 = vld [vmem:[%s8749_s1 + $0x9c] sm:$0xf]  ;;  %v3996_v36 = vld [vmem:[%s8749_s1 + $0xbc] sm:$0xf0]  ;;  %v3919_v37 = vor.u32 %v5827_v24, %v3916_v25  ;;  %v4183_v41 = vor.u32 %v5896_v29, %v4182_v26 }
  0x18   :  { %613 = vmatpush.bf16.msrb.mxu1 %v4067_v60  ;;  %563 = vmatpush.bf16.msra.mxu0 %v3987_v3  ;;  %v4146_v38 = vld [vmem:[%s8749_s1 + $0x1c0] sm:$0xf]  ;;  %v5900_v39 = vld [vmem:[%s8749_s1 + $0x24c] sm:$0xf]  ;;  %v4212_v40 = vld [vmem:[%s8749_s1 + $0x26c] sm:$0x30]  ;;  %v3959_v43 = vor.u32 %v5841_v31, %v3958_v30  ;;  %v3999_v51 = vor.u32 %v5846_v35, %v3996_v36 }
  0x19   :  { %638 = vmatpush.bf16.msrb.mxu3 %v4107_v2  ;;  %589 = vmatpush.bf16.msra.mxu2 %v3991_v6  ;;  %v535_v42 = vsel %vm530_vm0, %v4207_v27, 0  ;;  %v4215_v44 = vor.u32 %v5900_v39, %v4212_v40  ;;  %v4218_v45 = vld [vmem:[%s8749_s1 + $0x250] sm:$0xf]  ;;  %v5905_v46 = vld [vmem:[%s8749_s1 + $0x270] sm:$0x30] }
  0x1a   :  { %v5887_v48 = vld [vmem:[%s8749_s1 + $0x1e0] sm:$0xf0]  ;;  %v3922_v49 = vld [vmem:[%s8749_s1 + $0x8] sm:$0xf]  ;;  %v5832_v50 = vld [vmem:[%s8749_s1 + $0x28] sm:$0xf0]  ;;  %v4219_v54 = vor.u32 %v5905_v46, %v4218_v45 }
  0x1b   :  { %v5837_v52 = vld [vmem:[%s8749_s1 + $0x54] sm:$0xf]  ;;  %v3960_v53 = vld [vmem:[%s8749_s1 + $0x74] sm:$0xf0]  ;;  %v541_v55 = vsel %vm530_vm0, %v4215_v44, 0  ;;  %v4147_v56 = vor.u32 %v5887_v48, %v4146_v38  ;;  %v3923_v57 = vor.u32 %v5832_v50, %v3922_v49 }
  0x1c   :  { %614 = vmatpush.bf16.msrb.mxu1 %v4031_v10  ;;  %564 = vmatpush.bf16.msra.mxu0 %v3951_v17  ;;  %v4110_v58 = vld [vmem:[%s8749_s1 + $0x178] sm:$0xf]  ;;  %v5878_v59 = vld [vmem:[%s8749_s1 + $0x198] sm:$0xf0]  ;;  %v3963_v60 = vor.u32 %v5837_v52, %v3960_v53  ;;  %v5901_v61 = vld [vmem:[%s8749_s1 + $0x254] sm:$0xf] }
  0x1d   :  { %639 = vmatpush.bf16.msrb.mxu3 %v4071_v14  ;;  %590 = vmatpush.bf16.msra.mxu2 %v3955_v20  ;;  %v4220_v62 = vld [vmem:[%s8749_s1 + $0x274] sm:$0x30]  ;;  %v5828_v63 = vld [vmem:[%s8749_s1 + $0xc] sm:$0xf]  ;;  %v3924_v0 = vld [vmem:[%s8749_s1 + $0x2c] sm:$0xf0]  ;;  %v4111_v5 = vor.u32 %v5878_v59, %v4110_v58 }
  0x1e   :  { %v544_v1 = vsel %vm530_vm0, %v4219_v54, 0  ;;  %v4223_v2 = vor.u32 %v5901_v61, %v4220_v62  ;;  %v4190_v3 = vld [vmem:[%s8749_s1 + $0x210] sm:$0xf]  ;;  %v5897_v4 = vld [vmem:[%s8749_s1 + $0x230] sm:$0xf0]  ;;  %v3927_v8 = vor.u32 %v5828_v63, %v3924_v0 }
  0x1f   :  { %v4074_v6 = vld [vmem:[%s8749_s1 + $0x130] sm:$0xf]  ;;  %v5869_v7 = vld [vmem:[%s8749_s1 + $0x150] sm:$0xf0]  ;;  %v4191_v10 = vor.u32 %v5897_v4, %v4190_v3  ;;  %v4154_v11 = vld [vmem:[%s8749_s1 + $0x1c8] sm:$0xf] }
  0x20   :  { %615 = vmatpush.bf16.msrb.mxu1 %v3995_v23  ;;  %565 = vmatpush.bf16.msra.mxu0 %v3915_v33  ;;  %v547_v9 = vsel %vm530_vm0, %v4223_v2, 0  ;;  %v5888_v12 = vld [vmem:[%s8749_s1 + $0x1e8] sm:$0xf0]  ;;  %v4075_v13 = vor.u32 %v5869_v7, %v4074_v6  ;;  %v4038_v14 = vld [vmem:[%s8749_s1 + $0xe8] sm:$0xf] }
  0x21   :  { %640 = vmatpush.bf16.msrb.mxu3 %v4035_v32  ;;  %591 = vmatpush.bf16.msra.mxu2 %v3919_v37  ;;  %v5860_v15 = vld [vmem:[%s8749_s1 + $0x108] sm:$0xf0]  ;;  %v4155_v17 = vor.u32 %v5888_v12, %v4154_v11  ;;  %v4184_v18 = vld [vmem:[%s8749_s1 + $0x22c] sm:$0xf0]  ;;  %v4118_v19 = vld [vmem:[%s8749_s1 + $0x180] sm:$0xf] }
  0x22   :  { %v5892_v16 = vld [vmem:[%s8749_s1 + $0x20c] sm:$0xf]  ;;  %v5879_v20 = vld [vmem:[%s8749_s1 + $0x1a0] sm:$0xf0]  ;;  %v4039_v21 = vor.u32 %v5860_v15, %v4038_v14  ;;  %v4002_v22 = vld [vmem:[%s8749_s1 + $0xa0] sm:$0xf] }
  0x23   :  { %566 = vmatmul.bf16.vlgmr.msra.gmra.mxu0 %v6500_v47  ;;  %v5851_v23 = vld [vmem:[%s8749_s1 + $0xc0] sm:$0xf0]  ;;  %v4187_v24 = vor.u32 %v5892_v16, %v4184_v18  ;;  %v4119_v26 = vor.u32 %v5879_v20, %v4118_v19  ;;  %v4148_v27 = vld [vmem:[%s8749_s1 + $0x1e4] sm:$0xf0]  ;;  %v4082_v29 = vld [vmem:[%s8749_s1 + $0x138] sm:$0xf] }
  0x24   :  { %604 = vmatpush.bf16.msrb.mxu0 %v535_v42  ;;  %616 = vmatpush.bf16.msrb.mxu1 %v3959_v43  ;;  %v5883_v25 = vld [vmem:[%s8749_s1 + $0x1c4] sm:$0xf]  ;;  %v5870_v30 = vld [vmem:[%s8749_s1 + $0x158] sm:$0xf0]  ;;  %v4003_v31 = vor.u32 %v5851_v23, %v4002_v22  ;;  %v3966_v32 = vld [vmem:[%s8749_s1 + $0x58] sm:$0xf] }
  0x25   :  { %662 = vmatpush.bf16.msrb.mxu2 %v4183_v41  ;;  %641 = vmatpush.bf16.msrb.mxu3 %v3999_v51  ;;  %v5842_v33 = vld [vmem:[%s8749_s1 + $0x78] sm:$0xf0]  ;;  %v5893_v34 = vld [vmem:[%s8749_s1 + $0x214] sm:$0xf]  ;;  %v4192_v35 = vld [vmem:[%s8749_s1 + $0x234] sm:$0xf0]  ;;  %v4151_v36 = vor.u32 %v5883_v25, %v4148_v27  ;;  %v4083_v39 = vor.u32 %v5870_v30, %v4082_v29 }
  0x26   :  { %592 = vmatmul.bf16.vlgmr.msra.gmra.mxu2 %v6500_v47  ;;  %v5874_v37 = vld [vmem:[%s8749_s1 + $0x17c] sm:$0xf]  ;;  %v4112_v38 = vld [vmem:[%s8749_s1 + $0x19c] sm:$0xf0]  ;;  %v4226_v40 = vld [vmem:[%s8749_s1 + $0x258] sm:$0xf]  ;;  %v3967_v44 = vor.u32 %v5842_v33, %v3966_v32  ;;  %v4195_v45 = vor.u32 %v5893_v34, %v4192_v35 }
  0x27   :  { %v5906_v41 = vld [vmem:[%s8749_s1 + $0x278] sm:$0x30]  ;;  %v4046_v42 = vld [vmem:[%s8749_s1 + $0xf0] sm:$0xf]  ;;  %v5861_v43 = vld [vmem:[%s8749_s1 + $0x110] sm:$0xf0]  ;;  %v4115_v51 = vor.u32 %v5874_v37, %v4112_v38 }
  0x28   :  { %656 = vmatpush.bf16.msra.mxu0 %v541_v55  ;;  %617 = vmatpush.bf16.msrb.mxu1 %v3923_v57  ;;  %v3930_v46 = vld [vmem:[%s8749_s1 + $0x10] sm:$0xf]  ;;  %v5833_v48 = vld [vmem:[%s8749_s1 + $0x30] sm:$0xf0]  ;;  %v5884_v49 = vld [vmem:[%s8749_s1 + $0x1cc] sm:$0xf]  ;;  %v4227_v53 = vor.u32 %v5906_v41, %v4226_v40  ;;  %v4047_v54 = vor.u32 %v5861_v43, %v4046_v42 }
  0x29   :  { %663 = vmatpush.bf16.msrb.mxu2 %v4147_v56  ;;  %642 = vmatpush.bf16.msrb.mxu3 %v3963_v60  ;;  %v4156_v50 = vld [vmem:[%s8749_s1 + $0x1ec] sm:$0xf0]  ;;  %v5865_v52 = vld [vmem:[%s8749_s1 + $0x134] sm:$0xf]  ;;  %v4076_v55 = vld [vmem:[%s8749_s1 + $0x154] sm:$0xf0]  ;;  %v3931_v58 = vor.u32 %v5833_v48, %v3930_v46 }
  0x2a   :  { %v4010_v56 = vld [vmem:[%s8749_s1 + $0xa8] sm:$0xf]  ;;  %v5852_v57 = vld [vmem:[%s8749_s1 + $0xc8] sm:$0xf0]  ;;  %v4159_v59 = vor.u32 %v5884_v49, %v4156_v50  ;;  %v4198_v60 = vld [vmem:[%s8749_s1 + $0x218] sm:$0xf]  ;;  %v4079_v0 = vor.u32 %v5865_v52, %v4076_v55 }
  0x2b   :  { %618 = vmatmul.bf16.vlgmr.msrb.gmra.mxu1 %v6500_v47  ;;  %v5898_v61 = vld [vmem:[%s8749_s1 + $0x238] sm:$0xf0]  ;;  %v5875_v62 = vld [vmem:[%s8749_s1 + $0x184] sm:$0xf]  ;;  %v4120_v63 = vld [vmem:[%s8749_s1 + $0x1a4] sm:$0xf0]  ;;  %v4011_v3 = vor.u32 %v5852_v57, %v4010_v56 }
  0x2c   :  { %682 = vmatpush.bf16.msra.mxu1 %v544_v1  ;;  %v550_v1 = vsel %vm530_vm0, %v4227_v53, 0  ;;  %v5856_v2 = vld [vmem:[%s8749_s1 + $0xec] sm:$0xf]  ;;  %v4040_v4 = vld [vmem:[%s8749_s1 + $0x10c] sm:$0xf0]  ;;  %v4199_v7 = vor.u32 %v5898_v61, %v4198_v60 }
  0x2d   :  { %664 = vmatpush.bf16.msrb.mxu2 %v4111_v5  ;;  %643 = vmatpush.bf16.msrb.mxu3 %v3927_v8  ;;  %v3974_v5 = vld [vmem:[%s8749_s1 + $0x60] sm:$0xf]  ;;  %v5843_v6 = vld [vmem:[%s8749_s1 + $0x80] sm:$0xf0]  ;;  %v4123_v8 = vor.u32 %v5875_v62, %v4120_v63  ;;  %v5866_v11 = vld [vmem:[%s8749_s1 + $0x13c] sm:$0xf]  ;;  %v4043_v15 = vor.u32 %v5856_v2, %v4040_v4 }
  0x2e   :  { %v4084_v12 = vld [vmem:[%s8749_s1 + $0x15c] sm:$0xf0]  ;;  %v5907_v14 = vld [vmem:[%s8749_s1 + $0x280] sm:$0x30]  ;;  %v4004_v18 = vld [vmem:[%s8749_s1 + $0xc4] sm:$0xf0] }
  0x2f   :  { %v5847_v16 = vld [vmem:[%s8749_s1 + $0xa4] sm:$0xf]  ;;  %v3938_v19 = vld [vmem:[%s8749_s1 + $0x18] sm:$0xf]  ;;  %v5834_v20 = vld [vmem:[%s8749_s1 + $0x38] sm:$0xf0]  ;;  %v4087_v22 = vor.u32 %v5866_v11, %v4084_v12 }
  0x30   :  { %708 = vmatpush.bf16.msrb.mxu1 %v547_v9  ;;  %644 = vmatmul.bf16.vlgmr.msrb.gmra.mxu3 %v6500_v47  ;;  %v4162_v9 = vld [vmem:[%s8749_s1 + $0x1d0] sm:$0xf]  ;;  %v4126_v23 = vld [vmem:[%s8749_s1 + $0x188] sm:$0xf]  ;;  %v5880_v25 = vld [vmem:[%s8749_s1 + $0x1a8] sm:$0xf0]  ;;  %v4007_v29 = vor.u32 %v5847_v16, %v4004_v18  ;;  %v3939_v32 = vor.u32 %v5834_v20, %v3938_v19 }
  0x31   :  { %714 = vmatpush.bf16.msra.mxu3 %v4191_v10  ;;  %665 = vmatpush.bf16.msrb.mxu2 %v4075_v13  ;;  %v5889_v10 = vld [vmem:[%s8749_s1 + $0x1f0] sm:$0xf0]  ;;  %v4234_v13 = vld [vmem:[%s8749_s1 + $0x260] sm:$0xf]  ;;  %v4048_v27 = vld [vmem:[%s8749_s1 + $0x114] sm:$0xf0] }
  0x32   :  { %v5838_v30 = vld [vmem:[%s8749_s1 + $0x5c] sm:$0xf]  ;;  %v4090_v33 = vld [vmem:[%s8749_s1 + $0x140] sm:$0xf]  ;;  %v5971_v34 = vld [vmem:[%s8749_s1 + $0x484] sm:$0xf] }
  0x33   :  { %4237 = vmatmul.msk.bf16.vlgmr.msrb.gmra.mxu0 %vm526_vm1, %v6333_v28  ;;  %v4591_v35 = vld [vmem:[%s8749_s1 + $0x4a4] sm:$0xf0]  ;;  %v5871_v38 = vld [vmem:[%s8749_s1 + $0x160] sm:$0xf0]  ;;  %v4012_v41 = vld [vmem:[%s8749_s1 + $0xcc] sm:$0xf0] }
  0x34   :  { %688 = vmatpush.bf16.msrb.mxu0 %v4187_v24  ;;  %v4235_v24 = vor.u32 %v5907_v14, %v4234_v13  ;;  %v5902_v42 = vld [vmem:[%s8749_s1 + $0x25c] sm:$0xf]  ;;  %v4228_v43 = vld [vmem:[%s8749_s1 + $0x27c] sm:$0x30]  ;;  %v4594_v46 = vor.u32 %v5971_v34, %v4591_v35  ;;  %v3932_v48 = vld [vmem:[%s8749_s1 + $0x34] sm:$0xf0] }
  0x35   :  { %715 = vmatpush.bf16.msra.mxu3 %v4155_v17  ;;  %666 = vmatpush.bf16.msrb.mxu2 %v4039_v21  ;;  %v3975_v17 = vor.u32 %v5843_v6, %v3974_v5  ;;  %v4163_v21 = vor.u32 %v5889_v10, %v4162_v9  ;;  %v5962_v49 = vld [vmem:[%s8749_s1 + $0x43c] sm:$0xf]  ;;  %v4555_v50 = vld [vmem:[%s8749_s1 + $0x45c] sm:$0xf0]  ;;  %v4054_v53 = vld [vmem:[%s8749_s1 + $0xf8] sm:$0xf] }
  0x36   :  { %v556_v40 = vsel %vm530_vm0, %v4235_v24, 0  ;;  %v5862_v55 = vld [vmem:[%s8749_s1 + $0x118] sm:$0xf0]  ;;  %v5839_v56 = vld [vmem:[%s8749_s1 + $0x64] sm:$0xf]  ;;  %v4558_v61 = vor.u32 %v5962_v49, %v4555_v50 }
  0x37   :  { %v3976_v57 = vld [vmem:[%s8749_s1 + $0x84] sm:$0xf0]  ;;  %v5975_v60 = vld [vmem:[%s8749_s1 + $0x4a0] sm:$0xf0]  ;;  %v5953_v62 = vld [vmem:[%s8749_s1 + $0x3f4] sm:$0xf]  ;;  %v4055_v2 = vor.u32 %v5862_v55, %v4054_v53 }
  0x38   :  { %689 = vmatpush.bf16.msrb.mxu0 %v4151_v36  ;;  %v4127_v36 = vor.u32 %v5880_v25, %v4126_v23  ;;  %v4519_v63 = vld [vmem:[%s8749_s1 + $0x414] sm:$0xf0]  ;;  %v3979_v4 = vor.u32 %v5839_v56, %v3976_v57  ;;  %v4018_v5 = vld [vmem:[%s8749_s1 + $0xb0] sm:$0xf]  ;;  %v5853_v6 = vld [vmem:[%s8749_s1 + $0xd0] sm:$0xf0] }
  0x39   :  { %716 = vmatpush.bf16.msra.mxu3 %v4119_v26  ;;  %667 = vmatpush.bf16.msrb.mxu2 %v4003_v31  ;;  %v5857_v26 = vld [vmem:[%s8749_s1 + $0xf4] sm:$0xf]  ;;  %v3968_v31 = vld [vmem:[%s8749_s1 + $0x7c] sm:$0xf0]  ;;  %v4553_v10 = vld [vmem:[%s8749_s1 + $0x438] sm:$0xf]  ;;  %v4522_v11 = vor.u32 %v5953_v62, %v4519_v63  ;;  %v4019_v16 = vor.u32 %v5853_v6, %v4018_v5 }
  0x3a   :  { %v4051_v37 = vor.u32 %v5857_v26, %v4048_v27  ;;  %v5966_v13 = vld [vmem:[%s8749_s1 + $0x458] sm:$0xf0]  ;;  %v5944_v14 = vld [vmem:[%s8749_s1 + $0x3ac] sm:$0xf]  ;;  %v3982_v18 = vld [vmem:[%s8749_s1 + $0x68] sm:$0xf] }
  0x3b   :  { %4240 = vmatmul.msk.bf16.vlgmr.msra.gmra.mxu1 %vm526_vm1, %v6333_v28  ;;  %v5844_v19 = vld [vmem:[%s8749_s1 + $0x88] sm:$0xf0]  ;;  %v4517_v20 = vld [vmem:[%s8749_s1 + $0x3f0] sm:$0xf]  ;;  %v4554_v23 = vor.u32 %v5966_v13, %v4553_v10  ;;  %v5957_v25 = vld [vmem:[%s8749_s1 + $0x410] sm:$0xf0] }
  0x3c   :  { %740 = vmatpush.bf16.msra.mxu1 %v4195_v45  ;;  %690 = vmatpush.bf16.msrb.mxu0 %v4115_v51  ;;  %v5829_v45 = vld [vmem:[%s8749_s1 + $0x14] sm:$0xf]  ;;  %v4091_v51 = vor.u32 %v5871_v38, %v4090_v33  ;;  %v5980_v27 = vld [vmem:[%s8749_s1 + $0x4cc] sm:$0xf]  ;;  %v3946_v34 = vld [vmem:[%s8749_s1 + $0x20] sm:$0xf]  ;;  %v4518_v38 = vor.u32 %v5957_v25, %v4517_v20 }
  0x3d   :  { %717 = vmatpush.bf16.msra.mxu3 %v4083_v39  ;;  %668 = vmatpush.bf16.msrb.mxu2 %v3967_v44  ;;  %v5848_v39 = vld [vmem:[%s8749_s1 + $0xac] sm:$0xf]  ;;  %v3971_v44 = vor.u32 %v5838_v30, %v3968_v31  ;;  %v5935_v30 = vld [vmem:[%s8749_s1 + $0x364] sm:$0xf]  ;;  %v4447_v31 = vld [vmem:[%s8749_s1 + $0x384] sm:$0xf0] }
  0x3e   :  { %v4015_v52 = vor.u32 %v5848_v39, %v4012_v41  ;;  %v5835_v35 = vld [vmem:[%s8749_s1 + $0x40] sm:$0xf0]  ;;  %v4481_v39 = vld [vmem:[%s8749_s1 + $0x3a8] sm:$0xf]  ;;  %v4450_v41 = vor.u32 %v5935_v30, %v4447_v31  ;;  %v4599_v49 = vld [vmem:[%s8749_s1 + $0x4ac] sm:$0xf0] }
  0x3f   :  { %v4525_v50 = vld [vmem:[%s8749_s1 + $0x3f8] sm:$0xf]  ;;  %v5939_v56 = vld [vmem:[%s8749_s1 + $0x380] sm:$0xf0]  ;;  %v5917_v57 = vld [vmem:[%s8749_s1 + $0x2d4] sm:$0xf] }
  0x40   :  { %741 = vmatpush.bf16.msra.mxu1 %v4159_v59  ;;  %691 = vmatpush.bf16.msrb.mxu0 %v4079_v0  ;;  %v4589_v59 = vld [vmem:[%s8749_s1 + $0x480] sm:$0xf]  ;;  %v4625_v0 = vld [vmem:[%s8749_s1 + $0x4c8] sm:$0xf]  ;;  %v4489_v63 = vld [vmem:[%s8749_s1 + $0x3b0] sm:$0xf] }
  0x41   :  { %718 = vmatpush.bf16.msra.mxu3 %v4047_v54  ;;  %669 = vmatpush.bf16.msrb.mxu2 %v3931_v58  ;;  %v4231_v54 = vor.u32 %v5902_v42, %v4228_v43  ;;  %v3935_v58 = vor.u32 %v5829_v45, %v3932_v48  ;;  %v4590_v9 = vor.u32 %v5975_v60, %v4589_v59  ;;  %v5948_v42 = vld [vmem:[%s8749_s1 + $0x3c8] sm:$0xf0]  ;;  %v5926_v43 = vld [vmem:[%s8749_s1 + $0x31c] sm:$0xf]  ;;  %v4563_v62 = vld [vmem:[%s8749_s1 + $0x464] sm:$0xf0] }
  0x42   :  { %v3947_v45 = vor.u32 %v5835_v35, %v3946_v34  ;;  %v5972_v48 = vld [vmem:[%s8749_s1 + $0x48c] sm:$0xf]  ;;  %v5930_v6 = vld [vmem:[%s8749_s1 + $0x338] sm:$0xf0]  ;;  %v4527_v13 = vld [vmem:[%s8749_s1 + $0x41c] sm:$0xf0] }
  0x43   :  { %4239 = vmatmul.msk.bf16.vlgmr.msra.gmra.mxu0 %vm526_vm1, %v6333_v28  ;;  %v4602_v59 = vor.u32 %v5972_v48, %v4599_v49  ;;  %v5945_v20 = vld [vmem:[%s8749_s1 + $0x3b4] sm:$0xf]  ;;  %v4491_v25 = vld [vmem:[%s8749_s1 + $0x3d4] sm:$0xf0]  ;;  %v4633_v30 = vld [vmem:[%s8749_s1 + $0x4d0] sm:$0xf] }
  0x44   :  { %670 = vmatmul.bf16.vlgmr.msrb.gmra.mxu2 %v6500_v47  ;;  %742 = vmatpush.bf16.msra.mxu1 %v4123_v8  ;;  %v3940_v8 = vld [vmem:[%s8749_s1 + $0x3c] sm:$0xf0]  ;;  %v5985_v31 = vld [vmem:[%s8749_s1 + $0x4f0] sm:$0x30]  ;;  %v5912_v35 = vld [vmem:[%s8749_s1 + $0x2a8] sm:$0xf0] }
  0x45   :  { %734 = vmatpush.bf16.msra.mxu2 %v550_v1  ;;  %719 = vmatpush.bf16.msra.mxu3 %v4011_v3  ;;  %v5984_v1 = vld [vmem:[%s8749_s1 + $0x4e8] sm:$0x30]  ;;  %v553_v3 = vsel %vm530_vm0, %v4231_v54, 0  ;;  %v4445_v54 = vld [vmem:[%s8749_s1 + $0x360] sm:$0xf] }
  0x46   :  { %692 = vmatpush.bf16.msrb.mxu0 %v4043_v15  ;;  %v4626_v12 = vor.u32 %v5984_v1, %v4625_v0  ;;  %v4483_v15 = vld [vmem:[%s8749_s1 + $0x3cc] sm:$0xf0]  ;;  %v5949_v0 = vld [vmem:[%s8749_s1 + $0x3d0] sm:$0xf0] }
  0x47   :  { %v4486_v26 = vor.u32 %v5944_v14, %v4483_v15  ;;  %v5981_v1 = vld [vmem:[%s8749_s1 + $0x4d4] sm:$0xf]  ;;  %v4490_v10 = vor.u32 %v5949_v0, %v4489_v63  ;;  %v4453_v14 = vld [vmem:[%s8749_s1 + $0x368] sm:$0xf]  ;;  %v5940_v15 = vld [vmem:[%s8749_s1 + $0x388] sm:$0xf0] }
  0x48   :  { %743 = vmatpush.bf16.msra.mxu1 %v4087_v22  ;;  %v5976_v22 = vld [vmem:[%s8749_s1 + $0x4a8] sm:$0xf0]  ;;  %v1289_v24 = vsel %vm530_vm0, %v4626_v12, 0  ;;  %v5977_v48 = vld [vmem:[%s8749_s1 + $0x4b0] sm:$0xf0] }
  0x49   :  { %766 = vmatpush.bf16.msrb.mxu2 %v4199_v7  ;;  %720 = vmatpush.bf16.msra.mxu3 %v3975_v17  ;;  %v5830_v7 = vld [vmem:[%s8749_s1 + $0x1c] sm:$0xf] }
  0x4a   :  { %693 = vmatpush.bf16.msrb.mxu0 %v4007_v29  ;;  %v3943_v17 = vor.u32 %v5830_v7, %v3940_v8  ;;  %v4627_v29 = vld [vmem:[%s8749_s1 + $0x4ec] sm:$0x30]  ;;  %v5908_v7 = vld [vmem:[%s8749_s1 + $0x28c] sm:$0xf] }
  0x4b   :  { %4241 = vmatmul.msk.bf16.vlgmr.msrb.gmra.mxu1 %vm526_vm1, %v6333_v28  ;;  %v4339_v8 = vld [vmem:[%s8749_s1 + $0x2ac] sm:$0xf0] }
  0x4c   :  { %744 = vmatpush.bf16.msra.mxu1 %v4051_v37  ;;  %v5967_v37 = vld [vmem:[%s8749_s1 + $0x460] sm:$0xf0] }
  0x4d   :  { %767 = vmatpush.bf16.msrb.mxu2 %v4163_v21  ;;  %721 = vmatpush.bf16.msra.mxu3 %v3939_v32  ;;  %v4597_v21 = vld [vmem:[%s8749_s1 + $0x488] sm:$0xf]  ;;  %v3983_v32 = vor.u32 %v5844_v19, %v3982_v18  ;;  %v5921_v18 = vld [vmem:[%s8749_s1 + $0x2f0] sm:$0xf0]  ;;  %v4342_v19 = vor.u32 %v5908_v7, %v4339_v8  ;;  %v4383_v7 = vld [vmem:[%s8749_s1 + $0x2fc] sm:$0xf0] }
  0x4e   :  { %694 = vmatpush.bf16.msrb.mxu0 %v3971_v44  ;;  %v4598_v33 = vor.u32 %v5976_v22, %v4597_v21  ;;  %v4411_v44 = vld [vmem:[%s8749_s1 + $0x33c] sm:$0xf0]  ;;  %v5973_v21 = vld [vmem:[%s8749_s1 + $0x494] sm:$0xf]  ;;  %v4607_v22 = vld [vmem:[%s8749_s1 + $0x4b4] sm:$0xf0] }
  0x4f   :  { %v4414_v55 = vor.u32 %v5926_v43, %v4411_v44  ;;  %v4610_v34 = vor.u32 %v5973_v21, %v4607_v22  ;;  %v4381_v43 = vld [vmem:[%s8749_s1 + $0x2d8] sm:$0xf]  ;;  %v5922_v44 = vld [vmem:[%s8749_s1 + $0x2f8] sm:$0xf0]  ;;  %v4533_v8 = vld [vmem:[%s8749_s1 + $0x400] sm:$0xf] }
  0x50   :  { %722 = vmatmul.bf16.vlgmr.msra.gmra.mxu3 %v6500_v47  ;;  %745 = vmatpush.bf16.msra.mxu1 %v4015_v52  ;;  %v4482_v52 = vor.u32 %v5948_v42, %v4481_v39  ;;  %v4455_v42 = vld [vmem:[%s8749_s1 + $0x38c] sm:$0xf0]  ;;  %v5909_v21 = vld [vmem:[%s8749_s1 + $0x294] sm:$0xf]  ;;  %v4347_v22 = vld [vmem:[%s8749_s1 + $0x2b4] sm:$0xf0] }
  0x51   :  { %786 = vmatpush.bf16.msrb.mxu3 %v556_v40  ;;  %768 = vmatpush.bf16.msrb.mxu2 %v4127_v36  ;;  %v4561_v36 = vld [vmem:[%s8749_s1 + $0x440] sm:$0xf]  ;;  %v4630_v40 = vor.u32 %v5980_v27, %v4627_v29  ;;  %v5931_v29 = vld [vmem:[%s8749_s1 + $0x340] sm:$0xf0] }
  0x52   :  { %695 = vmatpush.bf16.msrb.mxu0 %v3935_v58  ;;  %v4375_v58 = vld [vmem:[%s8749_s1 + $0x2f4] sm:$0xf0] }
  0x53   :  { %v1292_v53 = vsel %vm530_vm0, %v4630_v40, 0  ;;  %v4378_v5 = vor.u32 %v5917_v57, %v4375_v58  ;;  %v5936_v40 = vld [vmem:[%s8749_s1 + $0x36c] sm:$0xf]  ;;  %v5927_v57 = vld [vmem:[%s8749_s1 + $0x324] sm:$0xf] }
  0x54   :  { %4242 = vmatmul.msk.bf16.vlgmr.msra.gmra.mxu2 %vm526_vm1, %v6333_v28  ;;  %746 = vmatpush.bf16.msra.mxu1 %v3979_v4  ;;  %v4409_v4 = vld [vmem:[%s8749_s1 + $0x318] sm:$0xf]  ;;  %v4419_v58 = vld [vmem:[%s8749_s1 + $0x344] sm:$0xf0] }
  0x55   :  { %1341 = vmatpush.bf16.msra.mxu3 %v4594_v46  ;;  %769 = vmatpush.bf16.msrb.mxu2 %v4091_v51  ;;  %v4562_v46 = vor.u32 %v5967_v37, %v4561_v36  ;;  %v5958_v51 = vld [vmem:[%s8749_s1 + $0x418] sm:$0xf0]  ;;  %v5964_v36 = vld [vmem:[%s8749_s1 + $0x44c] sm:$0xf]  ;;  %v4571_v37 = vld [vmem:[%s8749_s1 + $0x46c] sm:$0xf0] }
  0x56   :  { %760 = vmatpush.bf16.msra.mxu0 %v553_v3  ;;  %v4526_v60 = vor.u32 %v5958_v51, %v4525_v50  ;;  %v4446_v3 = vor.u32 %v5939_v56, %v4445_v54  ;;  %v4574_v49 = vor.u32 %v5964_v36, %v4571_v37  ;;  %v5955_v50 = vld [vmem:[%s8749_s1 + $0x404] sm:$0xf]  ;;  %v4535_v51 = vld [vmem:[%s8749_s1 + $0x424] sm:$0xf0]  ;;  %v4458_v54 = vor.u32 %v5936_v40, %v4455_v42  ;;  %v4615_v36 = vld [vmem:[%s8749_s1 + $0x4bc] sm:$0xf0] }
  0x57   :  { %696 = vmatmul.bf16.vlgmr.msrb.gmra.mxu0 %v6500_v47  ;;  %v4382_v56 = vor.u32 %v5922_v44, %v4381_v43  ;;  %v4538_v63 = vor.u32 %v5955_v50, %v4535_v51  ;;  %v4541_v37 = vld [vmem:[%s8749_s1 + $0x408] sm:$0xf]  ;;  %v5941_v43 = vld [vmem:[%s8749_s1 + $0x390] sm:$0xf0]  ;;  %v5919_v44 = vld [vmem:[%s8749_s1 + $0x2e4] sm:$0xf] }
  0x58   :  { %747 = vmatpush.bf16.msra.mxu1 %v3943_v17  ;;  %v4373_v17 = vld [vmem:[%s8749_s1 + $0x2d0] sm:$0xf]  ;;  %v4579_v50 = vld [vmem:[%s8749_s1 + $0x474] sm:$0xf0]  ;;  %v4505_v51 = vld [vmem:[%s8749_s1 + $0x3c0] sm:$0xf] }
  0x59   :  { %1342 = vmatpush.bf16.msra.mxu3 %v4558_v61  ;;  %770 = vmatpush.bf16.msrb.mxu2 %v4055_v2  ;;  %v5963_v61 = vld [vmem:[%s8749_s1 + $0x444] sm:$0xf]  ;;  %v4635_v2 = vld [vmem:[%s8749_s1 + $0x4f4] sm:$0x30] }
  0x5a   :  { %1315 = vmatpush.bf16.msrb.mxu0 %v4590_v9  ;;  %v4566_v9 = vor.u32 %v5963_v61, %v4563_v62  ;;  %v4638_v12 = vor.u32 %v5981_v1, %v4635_v2  ;;  %v4569_v62 = vld [vmem:[%s8749_s1 + $0x448] sm:$0xf]  ;;  %v5968_v1 = vld [vmem:[%s8749_s1 + $0x468] sm:$0xf0]  ;;  %v5946_v2 = vld [vmem:[%s8749_s1 + $0x3bc] sm:$0xf] }
  0x5b   :  { %748 = vmatmul.bf16.vlgmr.msra.gmra.mxu1 %v6500_v47 }
  0x5c   :  { %1335 = vmatpush.bf16.msrb.mxu1 %v1289_v24  ;;  %v4454_v24 = vor.u32 %v5940_v15, %v4453_v14  ;;  %v1298_v27 = vsel %vm530_vm0, %v4638_v12, 0  ;;  %v5982_v15 = vld [vmem:[%s8749_s1 + $0x4dc] sm:$0xf] }
  0x5d   :  { %1343 = vmatpush.bf16.msra.mxu3 %v4522_v11  ;;  %771 = vmatpush.bf16.msrb.mxu2 %v4019_v16  ;;  %v5954_v11 = vld [vmem:[%s8749_s1 + $0x3fc] sm:$0xf]  ;;  %v4410_v16 = vor.u32 %v5930_v6, %v4409_v4  ;;  %v4422_v4 = vor.u32 %v5927_v57, %v4419_v58  ;;  %v5932_v58 = vld [vmem:[%s8749_s1 + $0x348] sm:$0xf0] }
  0x5e   :  { %1316 = vmatpush.bf16.msrb.mxu0 %v4554_v23  ;;  %v4530_v23 = vor.u32 %v5954_v11, %v4527_v13  ;;  %v5918_v6 = vld [vmem:[%s8749_s1 + $0x2dc] sm:$0xf]  ;;  %v4570_v11 = vor.u32 %v5968_v1, %v4569_v62  ;;  %v5959_v13 = vld [vmem:[%s8749_s1 + $0x420] sm:$0xf0]  ;;  %v4543_v1 = vld [vmem:[%s8749_s1 + $0x42c] sm:$0xf0] }
  0x60   :  { %1367 = vmatpush.bf16.msra.mxu1 %v4598_v33  ;;  %4244 = vmatmul.msk.bf16.vlgmr.msrb.gmra.mxu3 %vm526_vm1, %v6333_v28  ;;  %v4337_v33 = vld [vmem:[%s8749_s1 + $0x288] sm:$0xf] }
  0x61   :  { %1344 = vmatpush.bf16.msra.mxu3 %v4486_v26  ;;  %772 = vmatpush.bf16.msrb.mxu2 %v3983_v32  ;;  %v4417_v26 = vld [vmem:[%s8749_s1 + $0x320] sm:$0xf]  ;;  %v4374_v32 = vor.u32 %v5921_v18, %v4373_v17  ;;  %v5937_v17 = vld [vmem:[%s8749_s1 + $0x374] sm:$0xf]  ;;  %v4463_v18 = vld [vmem:[%s8749_s1 + $0x394] sm:$0xf0] }
  0x62   :  { %1317 = vmatpush.bf16.msrb.mxu0 %v4518_v38  ;;  %v4494_v38 = vor.u32 %v5945_v20, %v4491_v25  ;;  %v4418_v39 = vor.u32 %v5931_v29, %v4417_v26  ;;  %v4534_v25 = vor.u32 %v5959_v13, %v4533_v8  ;;  %v4497_v26 = vld [vmem:[%s8749_s1 + $0x3b8] sm:$0xf]  ;;  %v4466_v29 = vor.u32 %v5937_v17, %v4463_v18  ;;  %v5947_v8 = vld [vmem:[%s8749_s1 + $0x3c4] sm:$0xf]  ;;  %v4507_v13 = vld [vmem:[%s8749_s1 + $0x3e4] sm:$0xf0] }
  0x63   :  { %v4649_v17 = vld [vmem:[%s8749_s1 + $0x4e0] sm:$0xf]  ;;  %v5987_v18 = vld [vmem:[%s8749_s1 + $0x500] sm:$0x30] }
  0x64   :  { %1368 = vmatpush.bf16.msra.mxu1 %v4562_v46  ;;  %v4605_v46 = vld [vmem:[%s8749_s1 + $0x490] sm:$0xf] }
  0x65   :  { %1345 = vmatpush.bf16.msra.mxu3 %v4450_v41  ;;  %773 = vmatpush.bf16.msrb.mxu2 %v3947_v45  ;;  %v4634_v41 = vor.u32 %v5985_v31, %v4633_v30  ;;  %v4338_v45 = vor.u32 %v5912_v35, %v4337_v33  ;;  %v4606_v61 = vor.u32 %v5977_v48, %v4605_v46  ;;  %v5950_v30 = vld [vmem:[%s8749_s1 + $0x3d8] sm:$0xf0]  ;;  %v5928_v31 = vld [vmem:[%s8749_s1 + $0x32c] sm:$0xf] }
  0x66   :  { %1318 = vmatpush.bf16.msrb.mxu0 %v4482_v52  ;;  %v4641_v52 = vld [vmem:[%s8749_s1 + $0x4d8] sm:$0xf]  ;;  %v4350_v33 = vor.u32 %v5909_v21, %v4347_v22  ;;  %v5974_v35 = vld [vmem:[%s8749_s1 + $0x49c] sm:$0xf] }
  0x67   :  { %4243 = vmatmul.msk.bf16.vlgmr.msra.gmra.mxu0 %vm526_vm1, %v6333_v28  ;;  %v4618_v46 = vor.u32 %v5974_v35, %v4615_v36  ;;  %v4621_v35 = vld [vmem:[%s8749_s1 + $0x4a0] sm:$0xf]  ;;  %v5979_v36 = vld [vmem:[%s8749_s1 + $0x4c0] sm:$0xf0] }
  0x68   :  { %774 = vmatmul.bf16.vlgmr.msrb.gmra.mxu2 %v6500_v47  ;;  %1369 = vmatpush.bf16.msra.mxu1 %v4526_v60  ;;  %v5913_v60 = vld [vmem:[%s8749_s1 + $0x2b0] sm:$0xf0] }
  0x69   :  { %1361 = vmatpush.bf16.msra.mxu2 %v1292_v53  ;;  %1346 = vmatpush.bf16.msra.mxu3 %v4414_v55  ;;  %v5986_v53 = vld [vmem:[%s8749_s1 + $0x4f8] sm:$0x30]  ;;  %v1295_v55 = vsel %vm530_vm0, %v4634_v41, 0  ;;  %v4461_v41 = vld [vmem:[%s8749_s1 + $0x370] sm:$0xf] }
  0x6a   :  { %1319 = vmatpush.bf16.msrb.mxu0 %v4446_v3  ;;  %v4642_v0 = vor.u32 %v5986_v53, %v4641_v52  ;;  %v4499_v3 = vld [vmem:[%s8749_s1 + $0x3dc] sm:$0xf0]  ;;  %v5951_v52 = vld [vmem:[%s8749_s1 + $0x3e0] sm:$0xf0] }
  0x6b   :  { %4659 = vmatmul.msk.bf16.vlgmr.msrb.gmra.mxu1 %vm526_vm1, %v6333_v28  ;;  %v4502_v14 = vor.u32 %v5946_v2, %v4499_v3  ;;  %v5983_v53 = vld [vmem:[%s8749_s1 + $0x4e4] sm:$0xf]  ;;  %v4506_v62 = vor.u32 %v5951_v52, %v4505_v51  ;;  %v4469_v2 = vld [vmem:[%s8749_s1 + $0x378] sm:$0xf]  ;;  %v5942_v3 = vld [vmem:[%s8749_s1 + $0x398] sm:$0xf0] }
  0x6c   :  { %1370 = vmatpush.bf16.msra.mxu1 %v4490_v10  ;;  %v5978_v10 = vld [vmem:[%s8749_s1 + $0x4b8] sm:$0xf0]  ;;  %v1301_v12 = vsel %vm530_vm0, %v4642_v0, 0  ;;  %v4585_v51 = vld [vmem:[%s8749_s1 + $0x458] sm:$0xf] }
  0x6d   :  { %1393 = vmatpush.bf16.msrb.mxu2 %v4602_v59  ;;  %1347 = vmatpush.bf16.msra.mxu3 %v4378_v5  ;;  %v4345_v59 = vld [vmem:[%s8749_s1 + $0x290] sm:$0xf] }
  0x6e   :  { %1320 = vmatpush.bf16.msrb.mxu0 %v4410_v16  ;;  %v4346_v5 = vor.u32 %v5913_v60, %v4345_v59  ;;  %v4643_v16 = vld [vmem:[%s8749_s1 + $0x4fc] sm:$0x30]  ;;  %v5910_v59 = vld [vmem:[%s8749_s1 + $0x29c] sm:$0xf] }
  0x6f   :  { %v4355_v60 = vld [vmem:[%s8749_s1 + $0x2bc] sm:$0xf0] }
  0x70   :  { %1371 = vmatpush.bf16.msra.mxu1 %v4454_v24  ;;  %v5969_v24 = vld [vmem:[%s8749_s1 + $0x470] sm:$0xf0] }
  0x71   :  { %1394 = vmatpush.bf16.msrb.mxu2 %v4566_v9  ;;  %1348 = vmatpush.bf16.msra.mxu3 %v4342_v19  ;;  %v4613_v9 = vld [vmem:[%s8749_s1 + $0x498] sm:$0xf]  ;;  %v4386_v19 = vor.u32 %v5918_v6, %v4383_v7  ;;  %v5923_v6 = vld [vmem:[%s8749_s1 + $0x300] sm:$0xf0]  ;;  %v4358_v7 = vor.u32 %v5910_v59, %v4355_v60  ;;  %v5920_v60 = vld [vmem:[%s8749_s1 + $0x2ec] sm:$0xf] }
  0x72   :  { %1321 = vmatpush.bf16.msrb.mxu0 %v4374_v32  ;;  %v4614_v20 = vor.u32 %v5978_v10, %v4613_v9  ;;  %v4427_v32 = vld [vmem:[%s8749_s1 + $0x34c] sm:$0xf0]  ;;  %v5012_v9 = vld [vmem:[%s8749_s1 + $0x708] sm:$0xf]  ;;  %v6056_v10 = vld [vmem:[%s8749_s1 + $0x728] sm:$0xf0] }
  0x73   :  { %v4430_v42 = vor.u32 %v5928_v31, %v4427_v32  ;;  %v5013_v21 = vor.u32 %v6056_v10, %v5012_v9  ;;  %v4471_v31 = vld [vmem:[%s8749_s1 + $0x39c] sm:$0xf0]  ;;  %v4397_v32 = vld [vmem:[%s8749_s1 + $0x2e8] sm:$0xf] }
  0x74   :  { %1349 = vmatmul.bf16.vlgmr.msra.gmra.mxu3 %v6500_v47  ;;  %1372 = vmatpush.bf16.msra.mxu1 %v4418_v39  ;;  %v4498_v39 = vor.u32 %v5950_v30, %v4497_v26  ;;  %v4510_v26 = vor.u32 %v5947_v8, %v4507_v13  ;;  %v4650_v30 = vor.u32 %v5987_v18, %v4649_v17  ;;  %v6020_v8 = vld [vmem:[%s8749_s1 + $0x608] sm:$0xf0]  ;;  %v4363_v13 = vld [vmem:[%s8749_s1 + $0x2c4] sm:$0xf0] }
  0x75   :  { %1413 = vmatpush.bf16.msrb.mxu3 %v1298_v27  ;;  %1395 = vmatpush.bf16.msrb.mxu2 %v4530_v23  ;;  %v4577_v23 = vld [vmem:[%s8749_s1 + $0x450] sm:$0xf]  ;;  %v4646_v27 = vor.u32 %v5982_v15, %v4643_v16  ;;  %v5933_v16 = vld [vmem:[%s8749_s1 + $0x350] sm:$0xf0]  ;;  %v4513_v17 = vld [vmem:[%s8749_s1 + $0x3c8] sm:$0xf] }
  0x76   :  { %1322 = vmatpush.bf16.msrb.mxu0 %v4338_v45  ;;  %v4391_v45 = vld [vmem:[%s8749_s1 + $0x304] sm:$0xf0] }
  0x77   :  { %v1304_v40 = vsel %vm530_vm0, %v4646_v27, 0  ;;  %v4394_v57 = vor.u32 %v5919_v44, %v4391_v45  ;;  %v5929_v45 = vld [vmem:[%s8749_s1 + $0x334] sm:$0xf] }
  0x78   :  { %4660 = vmatmul.msk.bf16.vlgmr.msra.gmra.mxu2 %vm526_vm1, %v6333_v28  ;;  %1373 = vmatpush.bf16.msra.mxu1 %v4382_v56  ;;  %v4425_v56 = vld [vmem:[%s8749_s1 + $0x328] sm:$0xf] }
  0x79   :  { %1445 = vmatpush.bf16.msra.mxu3 %v4610_v34  ;;  %1396 = vmatpush.bf16.msrb.mxu2 %v4494_v38  ;;  %v4578_v34 = vor.u32 %v5969_v24, %v4577_v23  ;;  %v5960_v38 = vld [vmem:[%s8749_s1 + $0x428] sm:$0xf0]  ;;  %v5914_v23 = vld [vmem:[%s8749_s1 + $0x2b8] sm:$0xf0]  ;;  %v4976_v24 = vld [vmem:[%s8749_s1 + $0x6c0] sm:$0xf] }
  0x7a   :  { %1387 = vmatpush.bf16.msra.mxu0 %v1295_v55  ;;  %v4542_v48 = vor.u32 %v5960_v38, %v4541_v37  ;;  %v4462_v55 = vor.u32 %v5941_v43, %v4461_v41  ;;  %v4940_v38 = vld [vmem:[%s8749_s1 + $0x678] sm:$0xf]  ;;  %v5988_v41 = vld [vmem:[%s8749_s1 + $0x508] sm:$0x30]  ;;  %v1307_v43 = vsel %vm530_vm0, %v4650_v30, 0 }
  0x7b   :  { %1323 = vmatmul.bf16.vlgmr.msrb.gmra.mxu0 %v6500_v47  ;;  %v4942_v30 = vld [vmem:[%s8749_s1 + $0x69c] sm:$0xf0] }
  0x7c   :  { %1374 = vmatpush.bf16.msra.mxu1 %v4346_v5  ;;  %v4389_v5 = vld [vmem:[%s8749_s1 + $0x2e0] sm:$0xf] }
  0x7d   :  { %1446 = vmatpush.bf16.msra.mxu3 %v4574_v49  ;;  %1397 = vmatpush.bf16.msrb.mxu2 %v4458_v54  ;;  %v5965_v49 = vld [vmem:[%s8749_s1 + $0x454] sm:$0xf]  ;;  %v4651_v54 = vld [vmem:[%s8749_s1 + $0x504] sm:$0x30] }
  0x7e   :  { %1419 = vmatpush.bf16.msrb.mxu0 %v4606_v61  ;;  %v4582_v61 = vor.u32 %v5965_v49, %v4579_v50  ;;  %v4654_v0 = vor.u32 %v5983_v53, %v4651_v54  ;;  %v5915_v49 = vld [vmem:[%s8749_s1 + $0x2c0] sm:$0xf0]  ;;  %v4622_v50 = vor.u32 %v5979_v36, %v4621_v35  ;;  %v4796_v36 = vld [vmem:[%s8749_s1 + $0x558] sm:$0xf] }
  0x7f   :  { %1375 = vmatmul.bf16.vlgmr.msra.gmra.mxu1 %v6500_v47  ;;  %v5943_v35 = vld [vmem:[%s8749_s1 + $0x3a0] sm:$0xf0] }
  0x80   :  { %1439 = vmatpush.bf16.msrb.mxu1 %v1301_v12  ;;  %v4470_v12 = vor.u32 %v5942_v3, %v4469_v2  ;;  %v1310_v15 = vsel %vm530_vm0, %v4654_v0, 0  ;;  %v5014_v0 = vld [vmem:[%s8749_s1 + $0x72c] sm:$0xf0]  ;;  %v5961_v3 = vld [vmem:[%s8749_s1 + $0x430] sm:$0xf0] }
  0x81   :  { %1447 = vmatpush.bf16.msra.mxu3 %v4538_v63  ;;  %1398 = vmatpush.bf16.msrb.mxu2 %v4422_v4  ;;  %v5956_v63 = vld [vmem:[%s8749_s1 + $0x40c] sm:$0xf]  ;;  %v4426_v4 = vor.u32 %v5932_v58, %v4425_v56  ;;  %v4904_v56 = vld [vmem:[%s8749_s1 + $0x630] sm:$0xf] }
  0x82   :  { %1420 = vmatpush.bf16.msrb.mxu0 %v4570_v11  ;;  %v4546_v11 = vor.u32 %v5956_v63, %v4543_v1  ;;  %v6052_v63 = vld [vmem:[%s8749_s1 + $0x70c] sm:$0xf] }
  0x84   :  { %1471 = vmatpush.bf16.msra.mxu1 %v4614_v20  ;;  %4662 = vmatmul.msk.bf16.vlgmr.msrb.gmra.mxu3 %vm526_vm1, %v6333_v28  ;;  %v4353_v20 = vld [vmem:[%s8749_s1 + $0x298] sm:$0xf] }
  0x85   :  { %1448 = vmatpush.bf16.msra.mxu3 %v4502_v14  ;;  %1399 = vmatpush.bf16.msrb.mxu2 %v4386_v19  ;;  %v4433_v14 = vld [vmem:[%s8749_s1 + $0x330] sm:$0xf]  ;;  %v4390_v19 = vor.u32 %v5923_v6, %v4389_v5  ;;  %v6065_v6 = vld [vmem:[%s8749_s1 + $0x770] sm:$0x30] }
  0x86   :  { %1421 = vmatpush.bf16.msrb.mxu0 %v4534_v25  ;;  %v6047_v25 = vld [vmem:[%s8749_s1 + $0x6e0] sm:$0xf0]  ;;  %v4434_v27 = vor.u32 %v5933_v16, %v4433_v14  ;;  %v5048_v5 = vld [vmem:[%s8749_s1 + $0x750] sm:$0xf] }
  0x87   :  { %v4977_v37 = vor.u32 %v6047_v25, %v4976_v24  ;;  %v6043_v14 = vld [vmem:[%s8749_s1 + $0x6c4] sm:$0xf]  ;;  %v5049_v18 = vor.u32 %v6065_v6, %v5048_v5 }
  0x88   :  { %1472 = vmatpush.bf16.msra.mxu1 %v4578_v34  ;;  %v7222_v22 = vpop.f32.mrf.mxu1  ;;  %v4354_v34 = vor.u32 %v5914_v23, %v4353_v20  ;;  %v5952_v20 = vld [vmem:[%s8749_s1 + $0x3e8] sm:$0xf0]  ;;  %v6011_v23 = vld [vmem:[%s8749_s1 + $0x5c0] sm:$0xf0] }
  0x89   :  { %1449 = vmatpush.bf16.msra.mxu3 %v4466_v29  ;;  %1400 = vmatpush.bf16.msrb.mxu2 %v4350_v33  ;;  %v5938_v29 = vld [vmem:[%s8749_s1 + $0x37c] sm:$0xf]  ;;  %v5924_v33 = vld [vmem:[%s8749_s1 + $0x308] sm:$0xf0] }
  0x8a   :  { %1422 = vmatpush.bf16.msrb.mxu0 %v4498_v39  ;;  %v6038_v39 = vld [vmem:[%s8749_s1 + $0x698] sm:$0xf0]  ;;  %v4398_v44 = vor.u32 %v5924_v33, %v4397_v32  ;;  %v2055_v32 = vsel %vm530_vm0, %v5049_v18, 0  ;;  %v4477_v33 = vld [vmem:[%s8749_s1 + $0x380] sm:$0xf] }
  0x8b   :  { %4661 = vmatmul.msk.bf16.vlgmr.msra.gmra.mxu0 %vm526_vm1, %v6333_v28  ;;  %v4941_v52 = vor.u32 %v6038_v39, %v4940_v38 }
  0x8c   :  { %1401 = vmatmul.bf16.vlgmr.msrb.gmra.mxu2 %v6500_v47  ;;  %1473 = vmatpush.bf16.msra.mxu1 %v4542_v48  ;;  %v4361_v48 = vld [vmem:[%s8749_s1 + $0x2a0] sm:$0xf] }
  0x8d   :  { %1465 = vmatpush.bf16.msra.mxu2 %v1304_v40  ;;  %1450 = vmatpush.bf16.msra.mxu3 %v4430_v42  ;;  %v4657_v40 = vld [vmem:[%s8749_s1 + $0x4e8] sm:$0xf]  ;;  %v4474_v42 = vor.u32 %v5938_v29, %v4471_v31  ;;  %v4362_v59 = vor.u32 %v5915_v49, %v4361_v48  ;;  %v6034_v29 = vld [vmem:[%s8749_s1 + $0x67c] sm:$0xf]  ;;  %v4514_v31 = vor.u32 %v5952_v20, %v4513_v17  ;;  %v5916_v20 = vld [vmem:[%s8749_s1 + $0x2c8] sm:$0xf0] }
  0x8e   :  { %1423 = vmatpush.bf16.msrb.mxu0 %v4462_v55  ;;  %v4658_v53 = vor.u32 %v5988_v41, %v4657_v40  ;;  %v5970_v55 = vld [vmem:[%s8749_s1 + $0x478] sm:$0xf0]  ;;  %v4945_v40 = vor.u32 %v6034_v29, %v4942_v30  ;;  %v4984_v41 = vld [vmem:[%s8749_s1 + $0x6c8] sm:$0xf]  ;;  %v4478_v49 = vor.u32 %v5943_v35, %v4477_v33  ;;  %v6021_v29 = vld [vmem:[%s8749_s1 + $0x610] sm:$0xf0] }
  0x8f   :  { %4663 = vmatmul.msk.bf16.vlgmr.msrb.gmra.mxu1 %vm526_vm1, %v6333_v28  ;;  %v4586_v1 = vor.u32 %v5970_v55, %v4585_v51  ;;  %v5993_v55 = vld [vmem:[%s8749_s1 + $0x530] sm:$0xf0]  ;;  %v5998_v30 = vld [vmem:[%s8749_s1 + $0x55c] sm:$0xf] }
  0x90   :  { %1474 = vmatpush.bf16.msra.mxu1 %v4506_v62  ;;  %v582_v54 = vpop.f32.mrf.mxu1  ;;  %v4549_v62 = vld [vmem:[%s8749_s1 + $0x410] sm:$0xf]  ;;  %v1313_v2 = vsel %vm530_vm0, %v4658_v53, 0  ;;  %v5934_v53 = vld [vmem:[%s8749_s1 + $0x358] sm:$0xf0] }
  0x91   :  { %1497 = vmatpush.bf16.msrb.mxu2 %v4618_v46  ;;  %1451 = vmatpush.bf16.msra.mxu3 %v4394_v57  ;;  %v4435_v46 = vld [vmem:[%s8749_s1 + $0x354] sm:$0xf0]  ;;  %v6029_v57 = vld [vmem:[%s8749_s1 + $0x650] sm:$0xf0]  ;;  %v4550_v16 = vor.u32 %v5961_v3, %v4549_v62  ;;  %v4760_v54 = vld [vmem:[%s8749_s1 + $0x510] sm:$0xf] }
  0x92   :  { %1424 = vmatpush.bf16.msrb.mxu0 %v4426_v4  ;;  %v4438_v58 = vor.u32 %v5929_v45, %v4435_v46  ;;  %v4905_v4 = vor.u32 %v6029_v57, %v4904_v56  ;;  %v5056_v45 = vld [vmem:[%s8749_s1 + $0x758] sm:$0xf]  ;;  %v6066_v46 = vld [vmem:[%s8749_s1 + $0x778] sm:$0x30]  ;;  %v6053_v33 = vld [vmem:[%s8749_s1 + $0x714] sm:$0xf] }
  0x93   :  { %v5028_v3 = vld [vmem:[%s8749_s1 + $0x718] sm:$0xf] }
  0x94   :  { %1475 = vmatpush.bf16.msra.mxu1 %v4470_v12  ;;  %v5911_v12 = vld [vmem:[%s8749_s1 + $0x2a4] sm:$0xf] }
  0x95   :  { %1498 = vmatpush.bf16.msrb.mxu2 %v4582_v61  ;;  %1452 = vmatpush.bf16.msra.mxu3 %v4358_v7  ;;  %v4399_v61 = vld [vmem:[%s8749_s1 + $0x30c] sm:$0xf0]  ;;  %v4868_v7 = vld [vmem:[%s8749_s1 + $0x5e8] sm:$0xf]  ;;  %v7325_v9 = vpop.f32.mrf.mxu3  ;;  %v4366_v24 = vor.u32 %v5911_v12, %v4363_v13 }
  0x96   :  { %1425 = vmatpush.bf16.msrb.mxu0 %v4390_v19  ;;  %v4402_v10 = vor.u32 %v5920_v60, %v4399_v61  ;;  %v4869_v19 = vor.u32 %v6020_v8, %v4868_v7  ;;  %v6016_v60 = vld [vmem:[%s8749_s1 + $0x5ec] sm:$0xf]  ;;  %v4870_v61 = vld [vmem:[%s8749_s1 + $0x60c] sm:$0xf0]  ;;  %v6030_v8 = vld [vmem:[%s8749_s1 + $0x658] sm:$0xf0] }
  0x97   :  { %v4873_v7 = vor.u32 %v6016_v60, %v4870_v61 }
  0x98   :  { %1453 = vmatmul.bf16.vlgmr.msra.gmra.mxu3 %v6500_v47  ;;  %1476 = vmatpush.bf16.msra.mxu1 %v4434_v27  ;;  %v6057_v27 = vld [vmem:[%s8749_s1 + $0x730] sm:$0xf0] }
  0x99   :  { %1517 = vmatpush.bf16.msrb.mxu3 %v1310_v15  ;;  %1499 = vmatpush.bf16.msrb.mxu2 %v4546_v11  ;;  %v5017_v11 = vor.u32 %v6052_v63, %v5014_v0  ;;  %v4978_v15 = vld [vmem:[%s8749_s1 + $0x6e4] sm:$0xf0]  ;;  %v4405_v63 = vld [vmem:[%s8749_s1 + $0x2f0] sm:$0xf]  ;;  %v5925_v0 = vld [vmem:[%s8749_s1 + $0x310] sm:$0xf0] }
  0x9a   :  { %1426 = vmatpush.bf16.msrb.mxu0 %v4354_v34  ;;  %v4981_v25 = vor.u32 %v6043_v14, %v4978_v15  ;;  %v4834_v14 = vld [vmem:[%s8749_s1 + $0x5c4] sm:$0xf0]  ;;  %v6061_v15 = vld [vmem:[%s8749_s1 + $0x754] sm:$0xf]  ;;  %v4406_v18 = vor.u32 %v5925_v0, %v4405_v63  ;;  %v6003_v63 = vld [vmem:[%s8749_s1 + $0x580] sm:$0xf0] }
  0x9b   :  { %v6035_v0 = vld [vmem:[%s8749_s1 + $0x684] sm:$0xf] }
  0x9c   :  { %4664 = vmatmul.msk.bf16.vlgmr.msra.gmra.mxu2 %vm526_vm1, %v6333_v28  ;;  %1477 = vmatpush.bf16.msra.mxu1 %v4398_v44  ;;  %v4906_v44 = vld [vmem:[%s8749_s1 + $0x654] sm:$0xf0] }
  0x9d   :  { %2081 = vmatpush.bf16.msra.mxu3 %v5013_v21  ;;  %1500 = vmatpush.bf16.msrb.mxu2 %v4510_v26  ;;  %v4832_v21 = vld [vmem:[%s8749_s1 + $0x5a0] sm:$0xf]  ;;  %v5020_v26 = vld [vmem:[%s8749_s1 + $0x710] sm:$0xf]  ;;  %v634_v38 = vpop.f32.mrf.mxu3 }
  0x9e   :  { %1491 = vmatpush.bf16.msra.mxu0 %v1307_v43  ;;  %v4833_v34 = vor.u32 %v6011_v23, %v4832_v21  ;;  %v5021_v39 = vor.u32 %v6057_v27, %v5020_v26  ;;  %v6025_v43 = vld [vmem:[%s8749_s1 + $0x634] sm:$0xf]  ;;  %v4992_v21 = vld [vmem:[%s8749_s1 + $0x6d0] sm:$0xf]  ;;  %v6062_v38 = vld [vmem:[%s8749_s1 + $0x75c] sm:$0xf] }
  0x9f   :  { %1427 = vmatmul.bf16.vlgmr.msrb.gmra.mxu0 %v6500_v47  ;;  %v4909_v57 = vor.u32 %v6025_v43, %v4906_v44  ;;  %v6049_v23 = vld [vmem:[%s8749_s1 + $0x6f0] sm:$0xf0]  ;;  %v4876_v26 = vld [vmem:[%s8749_s1 + $0x5f0] sm:$0xf]  ;;  %v4840_v44 = vld [vmem:[%s8749_s1 + $0x5a8] sm:$0xf] }
  0xa0   :  { %1478 = vmatpush.bf16.msra.mxu1 %v4362_v59  ;;  %v567_v48 = vpop.f32.mrf.mxu0  ;;  %v6039_v59 = vld [vmem:[%s8749_s1 + $0x6a0] sm:$0xf0]  ;;  %v4993_v35 = vor.u32 %v6049_v23, %v4992_v21  ;;  %v6026_v21 = vld [vmem:[%s8749_s1 + $0x63c] sm:$0xf] }
  0xa1   :  { %2082 = vmatpush.bf16.msra.mxu3 %v4977_v37  ;;  %1501 = vmatpush.bf16.msrb.mxu2 %v4474_v42  ;;  %v6002_v37 = vld [vmem:[%s8749_s1 + $0x578] sm:$0xf0]  ;;  %v6048_v42 = vld [vmem:[%s8749_s1 + $0x6e8] sm:$0xf0] }
  0xa2   :  { %1523 = vmatpush.bf16.msrb.mxu0 %v4622_v50  ;;  %v4441_v50 = vld [vmem:[%s8749_s1 + $0x338] sm:$0xf]  ;;  %v4797_v51 = vor.u32 %v6002_v37, %v4796_v36  ;;  %v4985_v56 = vor.u32 %v6048_v42, %v4984_v41  ;;  %v4956_v36 = vld [vmem:[%s8749_s1 + $0x688] sm:$0xf]  ;;  %v6040_v37 = vld [vmem:[%s8749_s1 + $0x6a8] sm:$0xf0]  ;;  %v4877_v41 = vor.u32 %v6021_v29, %v4876_v26 }
  0xa3   :  { %1479 = vmatmul.bf16.vlgmr.msra.gmra.mxu1 %v6500_v47  ;;  %v4442_v62 = vor.u32 %v5934_v53, %v4441_v50  ;;  %v6044_v53 = vld [vmem:[%s8749_s1 + $0x6cc] sm:$0xf]  ;;  %v4848_v26 = vld [vmem:[%s8749_s1 + $0x5b0] sm:$0xf] }
  0xa4   :  { %1543 = vmatpush.bf16.msrb.mxu1 %v1313_v2  ;;  %v4912_v2 = vld [vmem:[%s8749_s1 + $0x638] sm:$0xf] }
  0xa5   :  { %2083 = vmatpush.bf16.msra.mxu3 %v4941_v52  ;;  %1502 = vmatpush.bf16.msrb.mxu2 %v4438_v58  ;;  %v7401_v52 = vadd.f32 %v7222_v22, %v567_v48  ;;  %v4948_v22 = vld [vmem:[%s8749_s1 + $0x680] sm:$0xf]  ;;  %v5057_v58 = vor.u32 %v6066_v46, %v5056_v45  ;;  %v6012_v45 = vld [vmem:[%s8749_s1 + $0x5c8] sm:$0xf0]  ;;  %v5989_v46 = vld [vmem:[%s8749_s1 + $0x514] sm:$0xf] }
  0xa6   :  { %1524 = vmatpush.bf16.msrb.mxu0 %v4586_v1  ;;  %v4761_v1 = vor.u32 %v5993_v55, %v4760_v54  ;;  %v4949_v6 = vor.u32 %v6039_v59, %v4948_v22  ;;  %v4762_v48 = vld [vmem:[%s8749_s1 + $0x534] sm:$0xf0]  ;;  %v4957_v54 = vor.u32 %v6040_v37, %v4956_v36  ;;  %v4920_v22 = vld [vmem:[%s8749_s1 + $0x640] sm:$0xf]  ;;  %v4841_v60 = vor.u32 %v6012_v45, %v4840_v44 }
  0xa7   :  { %v4765_v61 = vor.u32 %v5989_v46, %v4762_v48  ;;  %v5000_v46 = vld [vmem:[%s8749_s1 + $0x6d8] sm:$0xf]  ;;  %v6050_v48 = vld [vmem:[%s8749_s1 + $0x6f8] sm:$0xf0] }
  0xa8   :  { %2107 = vmatpush.bf16.msra.mxu1 %v5017_v11  ;;  %4666 = vmatmul.msk.bf16.vlgmr.msrb.gmra.mxu3 %vm526_vm1, %v6333_v28  ;;  %v619_v5 = vpop.f32.mrf.mxu1  ;;  %v2061_v11 = vsel %vm530_vm0, %v5057_v58, 0  ;;  %v569_v17 = vpop.f32.mrf.mxu0  ;;  %v6031_v58 = vld [vmem:[%s8749_s1 + $0x660] sm:$0xf0] }
  0xa9   :  { %2084 = vmatpush.bf16.msra.mxu3 %v4905_v4  ;;  %1503 = vmatpush.bf16.msrb.mxu2 %v4402_v10  ;;  %v6058_v4 = vld [vmem:[%s8749_s1 + $0x738] sm:$0xf0]  ;;  %v6007_v10 = vld [vmem:[%s8749_s1 + $0x5a4] sm:$0xf]  ;;  %v593_v12 = vpop.f32.mrf.mxu2  ;;  %v7450_v13 = vadd.f32 %v7325_v9, %v619_v5  ;;  %v4369_v9 = vld [vmem:[%s8749_s1 + $0x2a8] sm:$0xf] }
  0xaa   :  { %1525 = vmatpush.bf16.msrb.mxu0 %v4550_v16  ;;  %v5050_v16 = vld [vmem:[%s8749_s1 + $0x774] sm:$0x30]  ;;  %v4950_v5 = vld [vmem:[%s8749_s1 + $0x6a4] sm:$0xf0]  ;;  %v5994_v17 = vld [vmem:[%s8749_s1 + $0x538] sm:$0xf0] }
  0xab   :  { %v5053_v27 = vor.u32 %v6061_v15, %v5050_v16  ;;  %v4768_v16 = vld [vmem:[%s8749_s1 + $0x518] sm:$0xf] }
  0xac   :  { %2108 = vmatpush.bf16.msra.mxu1 %v4981_v25  ;;  %v4837_v25 = vor.u32 %v6007_v10, %v4834_v14  ;;  %v4884_v10 = vld [vmem:[%s8749_s1 + $0x5f8] sm:$0xf] }
  0xad   :  { %2085 = vmatpush.bf16.msra.mxu3 %v4869_v19  ;;  %1504 = vmatpush.bf16.msrb.mxu2 %v4366_v24  ;;  %v5029_v19 = vor.u32 %v6058_v4, %v5028_v3  ;;  %v4913_v24 = vor.u32 %v6030_v8, %v4912_v2  ;;  %v2058_v42 = vsel %vm530_vm0, %v5053_v27, 0  ;;  %v5030_v2 = vld [vmem:[%s8749_s1 + $0x73c] sm:$0xf0]  ;;  %v6067_v8 = vld [vmem:[%s8749_s1 + $0x780] sm:$0x30] }
  0xae   :  { %1526 = vmatpush.bf16.msrb.mxu0 %v4514_v31  ;;  %v4798_v31 = vld [vmem:[%s8749_s1 + $0x57c] sm:$0xf0]  ;;  %v6013_v27 = vld [vmem:[%s8749_s1 + $0x5d0] sm:$0xf0] }
  0xaf   :  { %4665 = vmatmul.msk.bf16.vlgmr.msra.gmra.mxu0 %vm526_vm1, %v6333_v28  ;;  %v4801_v43 = vor.u32 %v5998_v30, %v4798_v31  ;;  %v4769_v30 = vor.u32 %v5994_v17, %v4768_v16  ;;  %v6060_v16 = vld [vmem:[%s8749_s1 + $0x748] sm:$0xf0] }
  0xb0   :  { %1505 = vmatmul.bf16.vlgmr.msrb.gmra.mxu2 %v6500_v47  ;;  %2109 = vmatpush.bf16.msra.mxu1 %v4945_v40  ;;  %v621_v40 = vpop.f32.mrf.mxu1  ;;  %v606_v50 = vpop.f32.mrf.mxu0 }
  0xb1   :  { %2101 = vmatpush.bf16.msra.mxu2 %v2055_v32  ;;  %2086 = vmatpush.bf16.msra.mxu3 %v4833_v34  ;;  %v4370_v32 = vor.u32 %v5916_v20, %v4369_v9  ;;  %v5022_v34 = vld [vmem:[%s8749_s1 + $0x734] sm:$0xf0]  ;;  %v4953_v20 = vor.u32 %v6035_v0, %v4950_v5 }
  0xb2   :  { %1527 = vmatpush.bf16.msrb.mxu0 %v4478_v49  ;;  %v595_v49 = vpop.f32.mrf.mxu2  ;;  %v4994_v9 = vld [vmem:[%s8749_s1 + $0x6f4] sm:$0xf0] }
  0xb3   :  { %4667 = vmatmul.msk.bf16.vlgmr.msrb.gmra.mxu1 %vm526_vm1, %v6333_v28  ;;  %v7535_v59 = vpop.f32.mrf.mxu3  ;;  %v4878_v40 = vld [vmem:[%s8749_s1 + $0x614] sm:$0xf0]  ;;  %v6027_v49 = vld [vmem:[%s8749_s1 + $0x644] sm:$0xf] }
  0xb4   :  { %2110 = vmatpush.bf16.msra.mxu1 %v4909_v57  ;;  %v4986_v57 = vld [vmem:[%s8749_s1 + $0x6ec] sm:$0xf0] }
  0xb5   :  { %2133 = vmatpush.bf16.msrb.mxu2 %v5021_v39  ;;  %2087 = vmatpush.bf16.msra.mxu3 %v4797_v51  ;;  %v5058_v39 = vld [vmem:[%s8749_s1 + $0x77c] sm:$0x30]  ;;  %v5025_v51 = vor.u32 %v6053_v33, %v5022_v34  ;;  %v4989_v3 = vor.u32 %v6044_v53, %v4986_v57  ;;  %v6059_v33 = vld [vmem:[%s8749_s1 + $0x740] sm:$0xf0]  ;;  %v6036_v34 = vld [vmem:[%s8749_s1 + $0x68c] sm:$0xf] }
  0xb6   :  { %1528 = vmatpush.bf16.msrb.mxu0 %v4442_v62  ;;  %v5061_v55 = vor.u32 %v6062_v38, %v5058_v39  ;;  %v4804_v62 = vld [vmem:[%s8749_s1 + $0x560] sm:$0xf]  ;;  %v6017_v38 = vld [vmem:[%s8749_s1 + $0x5f4] sm:$0xf]  ;;  %v4849_v39 = vor.u32 %v6013_v27, %v4848_v26  ;;  %v6068_v53 = vld [vmem:[%s8749_s1 + $0x788] sm:$0x30] }
  0xb7   :  { %v4805_v14 = vor.u32 %v6003_v63, %v4804_v62  ;;  %v6008_v57 = vld [vmem:[%s8749_s1 + $0x5ac] sm:$0xf]  ;;  %v5995_v62 = vld [vmem:[%s8749_s1 + $0x540] sm:$0xf0]  ;;  %v5001_v63 = vor.u32 %v6050_v48, %v5000_v46  ;;  %v5990_v27 = vld [vmem:[%s8749_s1 + $0x51c] sm:$0xf] }
  0xb8   :  { %2111 = vmatpush.bf16.msra.mxu1 %v4873_v7  ;;  %v2064_v4 = vsel %vm530_vm0, %v5061_v55, 0  ;;  %v5064_v7 = vld [vmem:[%s8749_s1 + $0x760] sm:$0xf]  ;;  %v4881_v55 = vor.u32 %v6017_v38, %v4878_v40  ;;  %v6000_v38 = vld [vmem:[%s8749_s1 + $0x56c] sm:$0xf] }
  0xb9   :  { %2134 = vmatpush.bf16.msrb.mxu2 %v4985_v56  ;;  %2088 = vmatpush.bf16.msra.mxu3 %v4761_v1  ;;  %v7522_v56 = vadd.f32 %v606_v50, %v593_v12  ;;  %v6054_v1 = vld [vmem:[%s8749_s1 + $0x71c] sm:$0xf]  ;;  %v7569_v12 = vpop.f32.mrf.mxu1  ;;  %v5065_v23 = vor.u32 %v6067_v8, %v5064_v7  ;;  %v4922_v50 = vld [vmem:[%s8749_s1 + $0x664] sm:$0xf0]  ;;  %v5999_v7 = vld [vmem:[%s8749_s1 + $0x564] sm:$0xf] }
  0xba   :  { %1529 = vmatpush.bf16.msrb.mxu0 %v4406_v18  ;;  %v5033_v15 = vor.u32 %v6054_v1, %v5030_v2  ;;  %v6045_v18 = vld [vmem:[%s8749_s1 + $0x6d4] sm:$0xf]  ;;  %v4925_v0 = vor.u32 %v6027_v49, %v4922_v50  ;;  %v4806_v8 = vld [vmem:[%s8749_s1 + $0x584] sm:$0xf0]  ;;  %v6042_v46 = vld [vmem:[%s8749_s1 + $0x6b8] sm:$0xf0] }
  0xbb   :  { %v647_v29 = vpop.f32.mrf.mxu3  ;;  %v4997_v31 = vor.u32 %v6045_v18, %v4994_v9  ;;  %v2067_v37 = vsel %vm530_vm0, %v5065_v23, 0  ;;  %v6041_v2 = vld [vmem:[%s8749_s1 + $0x6b0] sm:$0xf0]  ;;  %v6063_v23 = vld [vmem:[%s8749_s1 + $0x764] sm:$0xf]  ;;  %v4809_v26 = vor.u32 %v5999_v7, %v4806_v8 }
  0xbc   :  { %2089 = vmatmul.bf16.vlgmr.msra.gmra.mxu3 %v6500_v47  ;;  %2112 = vmatpush.bf16.msra.mxu1 %v4837_v25  ;;  %v4914_v25 = vld [vmem:[%s8749_s1 + $0x65c] sm:$0xf0]  ;;  %v6064_v48 = vld [vmem:[%s8749_s1 + $0x76c] sm:$0xf]  ;;  %v5074_v49 = vld [vmem:[%s8749_s1 + $0x78c] sm:$0x30] }
  0xbd   :  { %2153 = vmatpush.bf16.msrb.mxu3 %v2061_v11  ;;  %2135 = vmatpush.bf16.msrb.mxu2 %v4949_v6  ;;  %v4921_v6 = vor.u32 %v6031_v58, %v4920_v22  ;;  %v6022_v11 = vld [vmem:[%s8749_s1 + $0x618] sm:$0xf0]  ;;  %v4917_v36 = vor.u32 %v6026_v21, %v4914_v25  ;;  %v4850_v21 = vld [vmem:[%s8749_s1 + $0x5d4] sm:$0xf0]  ;;  %v4820_v8 = vld [vmem:[%s8749_s1 + $0x570] sm:$0xf] }
  0xbe   :  { %1530 = vmatpush.bf16.msrb.mxu0 %v4370_v32  ;;  %v5036_v32 = vld [vmem:[%s8749_s1 + $0x720] sm:$0xf] }
  0xbf   :  { %v5037_v44 = vor.u32 %v6059_v33, %v5036_v32  ;;  %v6051_v32 = vld [vmem:[%s8749_s1 + $0x700] sm:$0xf0] }
  0xc0   :  { %5082 = vmatmul.msk.bf16.vlgmr.msra.gmra.mxu2 %vm526_vm1, %v6333_v28  ;;  %2113 = vmatpush.bf16.msra.mxu1 %v4801_v43 }
  0xc1   :  { %2185 = vmatpush.bf16.msra.mxu3 %v5029_v19  ;;  %2136 = vmatpush.bf16.msrb.mxu2 %v4913_v24  ;;  %v608_v19 = vpop.f32.mrf.mxu0  ;;  %v4885_v24 = vor.u32 %v6022_v11, %v4884_v10  ;;  %v686_v43 = vpop.f32.mrf.mxu1 }
  0xc2   :  { %2127 = vmatpush.bf16.msra.mxu0 %v2058_v42  ;;  %v6004_v42 = vld [vmem:[%s8749_s1 + $0x588] sm:$0xf0]  ;;  %v6009_v19 = vld [vmem:[%s8749_s1 + $0x5b4] sm:$0xf]  ;;  %v5038_v43 = vld [vmem:[%s8749_s1 + $0x744] sm:$0xf0] }
  0xc3   :  { %1531 = vmatmul.bf16.vlgmr.msrb.gmra.mxu0 %v6500_v47 }
  0xc4   :  { %2114 = vmatpush.bf16.msra.mxu1 %v4765_v61  ;;  %v4776_v61 = vld [vmem:[%s8749_s1 + $0x520] sm:$0xf] }
  0xc5   :  { %2186 = vmatpush.bf16.msra.mxu3 %v4993_v35  ;;  %2137 = vmatpush.bf16.msrb.mxu2 %v4877_v41  ;;  %v4958_v35 = vld [vmem:[%s8749_s1 + $0x6ac] sm:$0xf0]  ;;  %v4812_v41 = vld [vmem:[%s8749_s1 + $0x568] sm:$0xf]  ;;  %v4777_v10 = vor.u32 %v5995_v62, %v4776_v61 }
  0xc6   :  { %2159 = vmatpush.bf16.msrb.mxu0 %v5025_v51  ;;  %v4961_v45 = vor.u32 %v6036_v34, %v4958_v35  ;;  %v5072_v51 = vld [vmem:[%s8749_s1 + $0x768] sm:$0xf]  ;;  %v4813_v22 = vor.u32 %v6004_v42, %v4812_v41  ;;  %v4853_v34 = vor.u32 %v6009_v19, %v4850_v21  ;;  %v4892_v35 = vld [vmem:[%s8749_s1 + $0x600] sm:$0xf]  ;;  %v6055_v42 = vld [vmem:[%s8749_s1 + $0x724] sm:$0xf] }
  0xc7   :  { %2115 = vmatmul.bf16.vlgmr.msra.gmra.mxu1 %v6500_v47  ;;  %v5073_v1 = vor.u32 %v6068_v53, %v5072_v51  ;;  %v671_v5 = vpop.f32.mrf.mxu2  ;;  %v4778_v61 = vld [vmem:[%s8749_s1 + $0x544] sm:$0xf0] }
  0xc8   :  { %2179 = vmatpush.bf16.msrb.mxu1 %v2064_v4  ;;  %v4886_v4 = vld [vmem:[%s8749_s1 + $0x61c] sm:$0xf0]  ;;  %v7678_v11 = vadd.f32 %v7569_v12, %v671_v5  ;;  %v6032_v12 = vld [vmem:[%s8749_s1 + $0x668] sm:$0xf0]  ;;  %v6033_v5 = vld [vmem:[%s8749_s1 + $0x670] sm:$0xf0] }
  0xc9   :  { %2187 = vmatpush.bf16.msra.mxu3 %v4957_v54  ;;  %2138 = vmatpush.bf16.msrb.mxu2 %v4841_v60  ;;  %v658_v54 = vpop.f32.mrf.mxu0  ;;  %v4842_v60 = vld [vmem:[%s8749_s1 + $0x5cc] sm:$0xf0]  ;;  %v710_v17 = vpop.f32.mrf.mxu1 }
  0xca   :  { %2160 = vmatpush.bf16.msrb.mxu0 %v4989_v3  ;;  %v7645_v58 = vadd.f32 %v658_v54, %v7535_v59  ;;  %v4964_v59 = vld [vmem:[%s8749_s1 + $0x690] sm:$0xf]  ;;  %v6018_v3 = vld [vmem:[%s8749_s1 + $0x5fc] sm:$0xf] }
  0xcb   :  { %v4965_v18 = vor.u32 %v6041_v2, %v4964_v59  ;;  %v4889_v9 = vor.u32 %v6018_v3, %v4886_v4  ;;  %v5002_v3 = vld [vmem:[%s8749_s1 + $0x6fc] sm:$0xf0]  ;;  %v4936_v4 = vld [vmem:[%s8749_s1 + $0x650] sm:$0xf] }
  0xcc   :  { %2211 = vmatpush.bf16.msra.mxu1 %v5033_v15  ;;  %5084 = vmatmul.msk.bf16.vlgmr.msrb.gmra.mxu3 %vm526_vm1, %v6333_v28  ;;  %v5044_v15 = vld [vmem:[%s8749_s1 + $0x728] sm:$0xf]  ;;  %v4937_v19 = vor.u32 %v6033_v5, %v4936_v4  ;;  %v6110_v4 = vld [vmem:[%s8749_s1 + $0x8d8] sm:$0xf0] }
  0xcd   :  { %2188 = vmatpush.bf16.msra.mxu3 %v4921_v6  ;;  %2139 = vmatpush.bf16.msrb.mxu2 %v4805_v14  ;;  %v4845_v6 = vor.u32 %v6008_v57, %v4842_v60  ;;  %v4928_v14 = vld [vmem:[%s8749_s1 + $0x648] sm:$0xf]  ;;  %v5045_v29 = vor.u32 %v6060_v16, %v5044_v15  ;;  %v4856_v57 = vld [vmem:[%s8749_s1 + $0x5b8] sm:$0xf]  ;;  %v5991_v60 = vld [vmem:[%s8749_s1 + $0x524] sm:$0xf] }
  0xce   :  { %2161 = vmatpush.bf16.msrb.mxu0 %v4953_v20  ;;  %v2073_v20 = vsel %vm530_vm0, %v5073_v1, 0  ;;  %v4929_v33 = vor.u32 %v6032_v12, %v4928_v14  ;;  %v5077_v1 = vor.u32 %v6064_v48, %v5074_v49  ;;  %v4781_v7 = vor.u32 %v5991_v60, %v4778_v61  ;;  %v6037_v14 = vld [vmem:[%s8749_s1 + $0x694] sm:$0xf]  ;;  %v5435_v15 = vld [vmem:[%s8749_s1 + $0x990] sm:$0xf] }
  0xcf   :  { %v673_v40 = vpop.f32.mrf.mxu2  ;;  %v6137_v16 = vld [vmem:[%s8749_s1 + $0x9b0] sm:$0xf0]  ;;  %v4966_v12 = vld [vmem:[%s8749_s1 + $0x6b4] sm:$0xf0]  ;;  %v5363_v48 = vld [vmem:[%s8749_s1 + $0x900] sm:$0xf] }
  0xd0   :  { %2212 = vmatpush.bf16.msra.mxu1 %v4997_v31  ;;  %v5008_v31 = vld [vmem:[%s8749_s1 + $0x6e0] sm:$0xf]  ;;  %v4930_v40 = vld [vmem:[%s8749_s1 + $0x66c] sm:$0xf0]  ;;  %v6119_v49 = vld [vmem:[%s8749_s1 + $0x920] sm:$0xf0] }
  0xd1   :  { %2189 = vmatpush.bf16.msra.mxu3 %v4885_v24  ;;  %2140 = vmatpush.bf16.msrb.mxu2 %v4769_v30  ;;  %v5066_v24 = vld [vmem:[%s8749_s1 + $0x784] sm:$0x30]  ;;  %v660_v25 = vpop.f32.mrf.mxu0  ;;  %v4770_v30 = vld [vmem:[%s8749_s1 + $0x53c] sm:$0xf0]  ;;  %v712_v50 = vpop.f32.mrf.mxu1  ;;  %v6006_v60 = vld [vmem:[%s8749_s1 + $0x598] sm:$0xf0] }
  0xd2   :  { %2162 = vmatpush.bf16.msrb.mxu0 %v4917_v36  ;;  %v5069_v36 = vor.u32 %v6063_v23, %v5066_v24  ;;  %v4773_v41 = vor.u32 %v5990_v27, %v4770_v30  ;;  %v6069_v23 = vld [vmem:[%s8749_s1 + $0x790] sm:$0x30]  ;;  %v4900_v24 = vld [vmem:[%s8749_s1 + $0x608] sm:$0xf]  ;;  %v6024_v25 = vld [vmem:[%s8749_s1 + $0x628] sm:$0xf0]  ;;  %v5436_v30 = vor.u32 %v6137_v16, %v5435_v15 }
  0xd3   :  { %5083 = vmatmul.msk.bf16.vlgmr.msra.gmra.mxu0 %vm526_vm1, %v6333_v28  ;;  %v723_v53 = vpop.f32.mrf.mxu3  ;;  %v6142_v5 = vld [vmem:[%s8749_s1 + $0x9dc] sm:$0xf]  ;;  %v4858_v16 = vld [vmem:[%s8749_s1 + $0x5dc] sm:$0xf0] }
  0xd4   :  { %2141 = vmatmul.bf16.vlgmr.msrb.gmra.mxu2 %v6500_v47  ;;  %2213 = vmatpush.bf16.msra.mxu1 %v4961_v45  ;;  %v4972_v45 = vld [vmem:[%s8749_s1 + $0x698] sm:$0xf]  ;;  %v2070_v54 = vsel %vm530_vm0, %v5069_v36, 0  ;;  %v4969_v36 = vor.u32 %v6037_v14, %v4966_v12 }
  0xd5   :  { %2205 = vmatpush.bf16.msra.mxu2 %v2067_v37  ;;  %2190 = vmatpush.bf16.msra.mxu3 %v4849_v39  ;;  %v6023_v37 = vld [vmem:[%s8749_s1 + $0x620] sm:$0xf0]  ;;  %v4814_v39 = vld [vmem:[%s8749_s1 + $0x58c] sm:$0xf0]  ;;  %v4973_v59 = vor.u32 %v6042_v46, %v4972_v45  ;;  %v6133_v45 = vld [vmem:[%s8749_s1 + $0x994] sm:$0xf] }
  0xd6   :  { %2163 = vmatpush.bf16.msrb.mxu0 %v4881_v55  ;;  %v4893_v51 = vor.u32 %v6023_v37, %v4892_v35  ;;  %v4817_v55 = vor.u32 %v6000_v38, %v4814_v39  ;;  %v6028_v37 = vld [vmem:[%s8749_s1 + $0x64c] sm:$0xf]  ;;  %v4901_v39 = vor.u32 %v6024_v25, %v4900_v24  ;;  %v5437_v46 = vld [vmem:[%s8749_s1 + $0x9b4] sm:$0xf0]  ;;  %v5291_v24 = vld [vmem:[%s8749_s1 + $0x870] sm:$0xf] }
  0xd7   :  { %5085 = vmatmul.msk.bf16.vlgmr.msrb.gmra.mxu1 %vm526_vm1, %v6333_v28  ;;  %v6101_v25 = vld [vmem:[%s8749_s1 + $0x890] sm:$0xf0] }
  0xd8   :  { %2214 = vmatpush.bf16.msra.mxu1 %v4925_v0  ;;  %v6046_v0 = vld [vmem:[%s8749_s1 + $0x6dc] sm:$0xf] }
  0xd9   :  { %2237 = vmatpush.bf16.msrb.mxu2 %v5037_v44  ;;  %2191 = vmatpush.bf16.msra.mxu3 %v4813_v22  ;;  %v5009_v44 = vor.u32 %v6051_v32, %v5008_v31  ;;  %v6014_v22 = vld [vmem:[%s8749_s1 + $0x5d8] sm:$0xf0]  ;;  %v697_v62 = vpop.f32.mrf.mxu0  ;;  %v4784_v31 = vld [vmem:[%s8749_s1 + $0x528] sm:$0xf]  ;;  %v5996_v32 = vld [vmem:[%s8749_s1 + $0x548] sm:$0xf0] }
  0xda   :  { %2164 = vmatpush.bf16.msrb.mxu0 %v4845_v6  ;;  %v7766_v2 = vadd.f32 %v710_v17, %v697_v62  ;;  %v4857_v6 = vor.u32 %v6014_v22, %v4856_v57  ;;  %v736_v17 = vpop.f32.mrf.mxu2  ;;  %v4894_v57 = vld [vmem:[%s8749_s1 + $0x624] sm:$0xf0]  ;;  %v4828_v22 = vld [vmem:[%s8749_s1 + $0x578] sm:$0xf]  ;;  %v5440_v62 = vor.u32 %v6133_v45, %v5437_v46  ;;  %v6146_v45 = vld [vmem:[%s8749_s1 + $0x9f8] sm:$0x30] }
  0xdb   :  { %v7802_v21 = vadd.f32 %v736_v17, %v723_v53  ;;  %v4829_v14 = vor.u32 %v6006_v60, %v4828_v22  ;;  %v4792_v17 = vld [vmem:[%s8749_s1 + $0x530] sm:$0xf]  ;;  %v6097_v22 = vld [vmem:[%s8749_s1 + $0x874] sm:$0xf] }
  0xdc   :  { %2215 = vmatpush.bf16.msra.mxu1 %v4889_v9  ;;  %v2076_v9 = vsel %vm530_vm0, %v5077_v1, 0  ;;  %v5401_v1 = vld [vmem:[%s8749_s1 + $0x96c] sm:$0xf0] }
  0xdd   :  { %2238 = vmatpush.bf16.msrb.mxu2 %v5001_v63  ;;  %2192 = vmatpush.bf16.msra.mxu3 %v4777_v10  ;;  %v5041_v63 = vor.u32 %v6055_v42, %v5038_v43  ;;  %v6005_v10 = vld [vmem:[%s8749_s1 + $0x590] sm:$0xf0]  ;;  %v6015_v42 = vld [vmem:[%s8749_s1 + $0x5e0] sm:$0xf0]  ;;  %v4785_v43 = vor.u32 %v5996_v32, %v4784_v31 }
  0xde   :  { %2165 = vmatpush.bf16.msrb.mxu0 %v4809_v26  ;;  %v749_v26 = vpop.f32.mrf.mxu1  ;;  %v4821_v27 = vor.u32 %v6005_v10, %v4820_v8  ;;  %v6010_v10 = vld [vmem:[%s8749_s1 + $0x5bc] sm:$0xf] }
  0xe0   :  { %2193 = vmatmul.bf16.vlgmr.msra.gmra.mxu3 %v6500_v47  ;;  %2216 = vmatpush.bf16.msra.mxu1 %v4853_v34  ;;  %v6128_v34 = vld [vmem:[%s8749_s1 + $0x968] sm:$0xf0] }
  0xe1   :  { %2257 = vmatpush.bf16.msrb.mxu3 %v2073_v20  ;;  %2239 = vmatpush.bf16.msrb.mxu2 %v4965_v18  ;;  %v5005_v18 = vor.u32 %v6046_v0, %v5002_v3  ;;  %v5080_v20 = vld [vmem:[%s8749_s1 + $0x770] sm:$0xf]  ;;  %v699_v35 = vpop.f32.mrf.mxu0  ;;  %v5364_v0 = vor.u32 %v6119_v49, %v5363_v48  ;;  %v5327_v3 = vld [vmem:[%s8749_s1 + $0x8b8] sm:$0xf]  ;;  %v5992_v49 = vld [vmem:[%s8749_s1 + $0x52c] sm:$0xf] }
  0xe2   :  { %2166 = vmatpush.bf16.msrb.mxu0 %v4773_v41  ;;  %v5081_v38 = vor.u32 %v6069_v23, %v5080_v20  ;;  %v4864_v41 = vld [vmem:[%s8749_s1 + $0x5c0] sm:$0xf]  ;;  %v738_v50 = vpop.f32.mrf.mxu2  ;;  %v5328_v12 = vor.u32 %v6110_v4, %v5327_v3  ;;  %v5365_v23 = vld [vmem:[%s8749_s1 + $0x924] sm:$0xf0]  ;;  %v6138_v3 = vld [vmem:[%s8749_s1 + $0x9b8] sm:$0xf0] }
  0xe3   :  { %v5445_v35 = vld [vmem:[%s8749_s1 + $0x9bc] sm:$0xf0] }
  0xe4   :  { %5086 = vmatmul.msk.bf16.vlgmr.msra.gmra.mxu2 %vm526_vm1, %v6333_v28  ;;  %2217 = vmatpush.bf16.msra.mxu1 %v4817_v55  ;;  %v2079_v53 = vsel %vm530_vm0, %v5081_v38, 0  ;;  %v4865_v55 = vor.u32 %v6015_v42, %v4864_v41  ;;  %v5255_v41 = vld [vmem:[%s8749_s1 + $0x828] sm:$0xf] }
  0xe5   :  { %2289 = vmatpush.bf16.msra.mxu3 %v5045_v29  ;;  %2240 = vmatpush.bf16.msrb.mxu2 %v4929_v33  ;;  %v725_v29 = vpop.f32.mrf.mxu3  ;;  %v5399_v33 = vld [vmem:[%s8749_s1 + $0x948] sm:$0xf] }
  0xe6   :  { %2231 = vmatpush.bf16.msra.mxu0 %v2070_v54  ;;  %v6019_v54 = vld [vmem:[%s8749_s1 + $0x604] sm:$0xf]  ;;  %v751_v61 = vpop.f32.mrf.mxu1  ;;  %v6001_v29 = vld [vmem:[%s8749_s1 + $0x574] sm:$0xf] }
  0xe7   :  { %2167 = vmatmul.bf16.vlgmr.msrb.gmra.mxu0 %v6500_v47  ;;  %v4897_v8 = vor.u32 %v6019_v54, %v4894_v57  ;;  %v5409_v54 = vld [vmem:[%s8749_s1 + $0x974] sm:$0xf0] }
  0xe8   :  { %2218 = vmatpush.bf16.msra.mxu1 %v4781_v7  ;;  %v5293_v61 = vld [vmem:[%s8749_s1 + $0x894] sm:$0xf0] }
  0xe9   :  { %2290 = vmatpush.bf16.msra.mxu3 %v5009_v44  ;;  %2241 = vmatpush.bf16.msrb.mxu2 %v4893_v51  ;;  %v5400_v44 = vor.u32 %v6128_v34, %v5399_v33  ;;  %v4933_v51 = vor.u32 %v6028_v37, %v4930_v40  ;;  %v762_v7 = vpop.f32.mrf.mxu0  ;;  %v6106_v33 = vld [vmem:[%s8749_s1 + $0x8bc] sm:$0xf]  ;;  %v5329_v40 = vld [vmem:[%s8749_s1 + $0x8dc] sm:$0xf0] }
  0xea   :  { %2263 = vmatpush.bf16.msrb.mxu0 %v5041_v63  ;;  %v7886_v15 = vadd.f32 %v762_v7, %v749_v26  ;;  %v6134_v34 = vld [vmem:[%s8749_s1 + $0x99c] sm:$0xf]  ;;  %v5479_v7 = vld [vmem:[%s8749_s1 + $0x9e0] sm:$0xf] }
  0xeb   :  { %2219 = vmatmul.bf16.vlgmr.msra.gmra.mxu1 %v6500_v47  ;;  %v775_v26 = vpop.f32.mrf.mxu2  ;;  %v5448_v50 = vor.u32 %v6134_v34, %v5445_v35 }
  0xec   :  { %2283 = vmatpush.bf16.msrb.mxu1 %v2076_v9 }
  0xed   :  { %2291 = vmatpush.bf16.msra.mxu3 %v4973_v59  ;;  %2242 = vmatpush.bf16.msrb.mxu2 %v4857_v6  ;;  %v788_v63 = vpop.f32.mrf.mxu3  ;;  %v6124_v59 = vld [vmem:[%s8749_s1 + $0x94c] sm:$0xf]  ;;  %v5473_v6 = vld [vmem:[%s8749_s1 + $0x9fc] sm:$0x30] }
  0xee   :  { %2264 = vmatpush.bf16.msrb.mxu0 %v5005_v18  ;;  %v5997_v18 = vld [vmem:[%s8749_s1 + $0x550] sm:$0xf0]  ;;  %v5404_v9 = vor.u32 %v6124_v59, %v5401_v1  ;;  %v5476_v20 = vor.u32 %v6142_v5, %v5473_v6  ;;  %v7918_v32 = vadd.f32 %v788_v63, %v775_v26  ;;  %v6083_v63 = vld [vmem:[%s8749_s1 + $0x800] sm:$0xf0]  ;;  %v5443_v1 = vld [vmem:[%s8749_s1 + $0x998] sm:$0xf] }
  0xef   :  { %v4793_v31 = vor.u32 %v5997_v18, %v4792_v17  ;;  %v6116_v5 = vld [vmem:[%s8749_s1 + $0x90c] sm:$0xf]  ;;  %v5373_v6 = vld [vmem:[%s8749_s1 + $0x92c] sm:$0xf0] }
  0xf0   :  { %2847 = vmatpush.bf16.msra.mxu1 %v5436_v30  ;;  %5088 = vmatmul.msk.bf16.vlgmr.msrb.gmra.mxu3 %vm526_vm1, %v6333_v28  ;;  %v4822_v30 = vld [vmem:[%s8749_s1 + $0x594] sm:$0xf0]  ;;  %v2824_v42 = vsel %vm530_vm0, %v5476_v20, 0  ;;  %v6074_v20 = vld [vmem:[%s8749_s1 + $0x7b8] sm:$0xf0]  ;;  %v5376_v26 = vor.u32 %v6116_v5, %v5373_v6 }
  0xf1   :  { %2292 = vmatpush.bf16.msra.mxu3 %v4937_v19  ;;  %2243 = vmatpush.bf16.msrb.mxu2 %v4821_v27  ;;  %v6115_v19 = vld [vmem:[%s8749_s1 + $0x904] sm:$0xf]  ;;  %v4861_v27 = vor.u32 %v6010_v10, %v4858_v16  ;;  %v764_v46 = vpop.f32.mrf.mxu0  ;;  %v4825_v48 = vor.u32 %v6001_v29, %v4822_v30  ;;  %v6129_v30 = vld [vmem:[%s8749_s1 + $0x970] sm:$0xf0] }
  0xf2   :  { %2265 = vmatpush.bf16.msrb.mxu0 %v4969_v36  ;;  %v1337_v36 = vpop.f32.mrf.mxu1  ;;  %v5368_v37 = vor.u32 %v6115_v19, %v5365_v23  ;;  %v5183_v19 = vld [vmem:[%s8749_s1 + $0x798] sm:$0xf]  ;;  %v6111_v6 = vld [vmem:[%s8749_s1 + $0x8e0] sm:$0xf0] }
  0xf3   :  { %v5184_v35 = vor.u32 %v6074_v20, %v5183_v19 }
  0xf4   :  { %2848 = vmatpush.bf16.msra.mxu1 %v5400_v44  ;;  %v5471_v44 = vld [vmem:[%s8749_s1 + $0x9d8] sm:$0xf] }
  0xf5   :  { %2293 = vmatpush.bf16.msra.mxu3 %v4901_v39  ;;  %2244 = vmatpush.bf16.msrb.mxu2 %v4785_v43  ;;  %v790_v38 = vpop.f32.mrf.mxu3  ;;  %v5292_v39 = vor.u32 %v6101_v25, %v5291_v24  ;;  %v6092_v43 = vld [vmem:[%s8749_s1 + $0x848] sm:$0xf0]  ;;  %v5472_v60 = vor.u32 %v6146_v45, %v5471_v44  ;;  %v5444_v24 = vor.u32 %v6138_v3, %v5443_v1  ;;  %v5407_v25 = vld [vmem:[%s8749_s1 + $0x950] sm:$0xf]  ;;  %v5335_v3 = vld [vmem:[%s8749_s1 + $0x8c0] sm:$0xf] }
  0xf6   :  { %2266 = vmatpush.bf16.msrb.mxu0 %v4933_v51  ;;  %v4786_v51 = vld [vmem:[%s8749_s1 + $0x54c] sm:$0xf0]  ;;  %v5256_v57 = vor.u32 %v6092_v43, %v5255_v41  ;;  %v6139_v41 = vld [vmem:[%s8749_s1 + $0x9c0] sm:$0xf0]  ;;  %v5408_v43 = vor.u32 %v6129_v30, %v5407_v25  ;;  %v6120_v45 = vld [vmem:[%s8749_s1 + $0x928] sm:$0xf0]  ;;  %v5336_v19 = vor.u32 %v6111_v6, %v5335_v3 }
  0xf7   :  { %5087 = vmatmul.msk.bf16.vlgmr.msra.gmra.mxu0 %vm526_vm1, %v6333_v28  ;;  %v4789_v59 = vor.u32 %v5992_v49, %v4786_v51  ;;  %v2821_v17 = vsel %vm530_vm0, %v5472_v60, 0  ;;  %v6098_v51 = vld [vmem:[%s8749_s1 + $0x87c] sm:$0xf]  ;;  %v6084_v3 = vld [vmem:[%s8749_s1 + $0x808] sm:$0xf0] }
  0xf8   :  { %2245 = vmatmul.bf16.vlgmr.msrb.gmra.mxu2 %v6500_v47  ;;  %2849 = vmatpush.bf16.msra.mxu1 %v5364_v0  ;;  %v777_v0 = vpop.f32.mrf.mxu2  ;;  %v6070_v60 = vld [vmem:[%s8749_s1 + $0x79c] sm:$0xf]  ;;  %v6108_v6 = vld [vmem:[%s8749_s1 + $0x8cc] sm:$0xf] }
  0xf9   :  { %2309 = vmatpush.bf16.msra.mxu2 %v2079_v53  ;;  %2294 = vmatpush.bf16.msra.mxu3 %v4865_v55  ;;  %v6125_v53 = vld [vmem:[%s8749_s1 + $0x954] sm:$0xf]  ;;  %v5332_v55 = vor.u32 %v6106_v33, %v5329_v40  ;;  %v1324_v23 = vpop.f32.mrf.mxu0  ;;  %v5337_v33 = vld [vmem:[%s8749_s1 + $0x8e4] sm:$0xf0]  ;;  %v5451_v40 = vld [vmem:[%s8749_s1 + $0x9a0] sm:$0xf] }
  0xfa   :  { %2267 = vmatpush.bf16.msrb.mxu0 %v4897_v8  ;;  %v5412_v4 = vor.u32 %v6125_v53, %v5409_v54  ;;  %v6147_v8 = vld [vmem:[%s8749_s1 + $0xa00] sm:$0x30]  ;;  %v1339_v10 = vpop.f32.mrf.mxu1  ;;  %v8006_v29 = vadd.f32 %v1337_v36, %v1324_v23  ;;  %v5301_v53 = vld [vmem:[%s8749_s1 + $0x89c] sm:$0xf0]  ;;  %v6130_v0 = vld [vmem:[%s8749_s1 + $0x978] sm:$0xf0] }
  0xfb   :  { %5089 = vmatmul.msk.bf16.vlgmr.msrb.gmra.mxu1 %vm526_vm1, %v6333_v28  ;;  %v6079_v36 = vld [vmem:[%s8749_s1 + $0x7e4] sm:$0xf]  ;;  %v5304_v5 = vor.u32 %v6098_v51, %v5301_v53  ;;  %v5299_v23 = vld [vmem:[%s8749_s1 + $0x878] sm:$0xf]  ;;  %v6102_v25 = vld [vmem:[%s8749_s1 + $0x898] sm:$0xf0] }
  0xfc   :  { %2850 = vmatpush.bf16.msra.mxu1 %v5328_v12  ;;  %v5257_v12 = vld [vmem:[%s8749_s1 + $0x84c] sm:$0xf0]  ;;  %v1549_v38 = vmax.f32 %v7401_v52, %v8006_v29  ;;  %v5193_v51 = vld [vmem:[%s8749_s1 + $0x7c4] sm:$0xf0] }
  0xfd   :  { %2873 = vmatpush.bf16.msrb.mxu2 %v5440_v62  ;;  %2295 = vmatpush.bf16.msra.mxu3 %v4829_v14  ;;  %v5219_v62 = vld [vmem:[%s8749_s1 + $0x7e0] sm:$0xf]  ;;  %v5296_v14 = vor.u32 %v6097_v22, %v5293_v61  ;;  %v1350_v16 = vpop.f32.mrf.mxu3  ;;  %v5452_v22 = vor.u32 %v6139_v41, %v5451_v40  ;;  %v6144_v40 = vld [vmem:[%s8749_s1 + $0x9ec] sm:$0xf]  ;;  %v5489_v41 = vld [vmem:[%s8749_s1 + $0xa0c] sm:$0x30] }
  0xfe   :  { %2268 = vmatpush.bf16.msrb.mxu0 %v4861_v27  ;;  %v5220_v18 = vor.u32 %v6083_v63, %v5219_v62  ;;  %v5480_v27 = vor.u32 %v6147_v8, %v5479_v7  ;;  %v5185_v62 = vld [vmem:[%s8749_s1 + $0x7bc] sm:$0xf0]  ;;  %v5415_v63 = vld [vmem:[%s8749_s1 + $0x958] sm:$0xf]  ;;  %v6089_v7 = vld [vmem:[%s8749_s1 + $0x834] sm:$0xf] }
  0xff   :  { %v5265_v8 = vld [vmem:[%s8749_s1 + $0x854] sm:$0xf0]  ;;  %v5188_v10 = vor.u32 %v6070_v60, %v5185_v62  ;;  %v5307_v62 = vld [vmem:[%s8749_s1 + $0x880] sm:$0xf] }
 0x100   :  { %2851 = vmatpush.bf16.msra.mxu1 %v5292_v39  ;;  %v5371_v39 = vld [vmem:[%s8749_s1 + $0x908] sm:$0xf]  ;;  %v2827_v44 = vsel %vm530_vm0, %v5480_v27, 0  ;;  %v5229_v27 = vld [vmem:[%s8749_s1 + $0x80c] sm:$0xf0] }
 0x101   :  { %2874 = vmatpush.bf16.msrb.mxu2 %v5404_v9  ;;  %2296 = vmatpush.bf16.msra.mxu3 %v4793_v31  ;;  %v6088_v9 = vld [vmem:[%s8749_s1 + $0x82c] sm:$0xf]  ;;  %v6107_v31 = vld [vmem:[%s8749_s1 + $0x8c4] sm:$0xf]  ;;  %v5372_v1 = vor.u32 %v6120_v45, %v5371_v39  ;;  %v5381_v60 = vld [vmem:[%s8749_s1 + $0x934] sm:$0xf0] }
 0x102   :  { %2269 = vmatpush.bf16.msrb.mxu0 %v4825_v48  ;;  %v5260_v34 = vor.u32 %v6088_v9, %v5257_v12  ;;  %v5340_v46 = vor.u32 %v6107_v31, %v5337_v33  ;;  %v6143_v48 = vld [vmem:[%s8749_s1 + $0x9e4] sm:$0xf]  ;;  %v1376_v54 = vpop.f32.mrf.mxu1  ;;  %v6121_v9 = vld [vmem:[%s8749_s1 + $0x930] sm:$0xf0]  ;;  %v6112_v39 = vld [vmem:[%s8749_s1 + $0x8e8] sm:$0xf0] }
 0x104   :  { %2297 = vmatmul.bf16.vlgmr.msra.gmra.mxu3 %v6500_v47  ;;  %2852 = vmatpush.bf16.msra.mxu1 %v5256_v57 }
 0x105   :  { %2893 = vmatpush.bf16.msrb.mxu3 %v2824_v42  ;;  %2875 = vmatpush.bf16.msrb.mxu2 %v5368_v37  ;;  %v5221_v37 = vld [vmem:[%s8749_s1 + $0x804] sm:$0xf0]  ;;  %v1363_v42 = vpop.f32.mrf.mxu2  ;;  %v1352_v57 = vpop.f32.mrf.mxu3 }
 0x106   :  { %2270 = vmatpush.bf16.msrb.mxu0 %v4789_v59  ;;  %v8044_v49 = vadd.f32 %v1363_v42, %v1350_v16  ;;  %v1326_v59 = vpop.f32.mrf.mxu0  ;;  %v6135_v16 = vld [vmem:[%s8749_s1 + $0x9a4] sm:$0xf]  ;;  %v5492_v57 = vor.u32 %v6144_v40, %v5489_v41  ;;  %v5309_v40 = vld [vmem:[%s8749_s1 + $0x8a4] sm:$0xf0]  ;;  %v5235_v41 = vld [vmem:[%s8749_s1 + $0x7f0] sm:$0xf] }
 0x108   :  { %5090 = vmatmul.msk.bf16.vlgmr.msra.gmra.mxu2 %vm526_vm1, %v6333_v28  ;;  %2853 = vmatpush.bf16.msra.mxu1 %v5220_v18  ;;  %v1550_v61 = vmax.f32 %v7522_v56, %v8044_v49  ;;  %v5379_v18 = vld [vmem:[%s8749_s1 + $0x910] sm:$0xf]  ;;  %v6166_v49 = vld [vmem:[%s8752_s3 + $0x78] sm:$0xff] }
 0x109   :  { %2925 = vmatpush.bf16.msra.mxu3 %v5448_v50  ;;  %2876 = vmatpush.bf16.msrb.mxu2 %v5332_v55  ;;  %v5481_v50 = vld [vmem:[%s8749_s1 + $0xa04] sm:$0x30]  ;;  %v5224_v55 = vor.u32 %v6079_v36, %v5221_v37  ;;  %v5417_v36 = vld [vmem:[%s8749_s1 + $0x97c] sm:$0xf0] }
 0x10a   :  { %2867 = vmatpush.bf16.msra.mxu0 %v2821_v17  ;;  %v5453_v17 = vld [vmem:[%s8749_s1 + $0x9c4] sm:$0xf0]  ;;  %v1378_v30 = vpop.f32.mrf.mxu1 }
 0x10b   :  { %2271 = vmatmul.bf16.vlgmr.msrb.gmra.mxu0 %v6500_v47  ;;  %v5456_v31 = vor.u32 %v6135_v16, %v5453_v17  ;;  %v5343_v37 = vld [vmem:[%s8749_s1 + $0x8c8] sm:$0xf] }
 0x10c   :  { %2854 = vmatpush.bf16.msra.mxu1 %v5184_v35  ;;  %v6126_v35 = vld [vmem:[%s8749_s1 + $0x95c] sm:$0xf] }
 0x10d   :  { %2926 = vmatpush.bf16.msra.mxu3 %v5412_v4  ;;  %2877 = vmatpush.bf16.msrb.mxu2 %v5296_v14  ;;  %v5484_v4 = vor.u32 %v6143_v48, %v5481_v50  ;;  %v5416_v14 = vor.u32 %v6130_v0, %v5415_v63  ;;  %v1365_v12 = vpop.f32.mrf.mxu2  ;;  %v1415_v33 = vpop.f32.mrf.mxu3  ;;  %v6093_v48 = vld [vmem:[%s8749_s1 + $0x850] sm:$0xf0]  ;;  %v6071_v50 = vld [vmem:[%s8749_s1 + $0x7a4] sm:$0xf]  ;;  %v5420_v53 = vor.u32 %v6126_v35, %v5417_v36 }
 0x10e   :  { %2899 = vmatpush.bf16.msrb.mxu0 %v5444_v24  ;;  %v5268_v24 = vor.u32 %v6089_v7, %v5265_v8  ;;  %v1389_v42 = vpop.f32.mrf.mxu0  ;;  %v6103_v63 = vld [vmem:[%s8749_s1 + $0x8a0] sm:$0xf0]  ;;  %v6136_v7 = vld [vmem:[%s8749_s1 + $0x9ac] sm:$0xf]  ;;  %v5461_v8 = vld [vmem:[%s8749_s1 + $0x9cc] sm:$0xf0] }
 0x10f   :  { %2855 = vmatmul.bf16.vlgmr.msra.gmra.mxu1 %v6500_v47  ;;  %v2830_v20 = vsel %vm530_vm0, %v5484_v4, 0  ;;  %v5196_v4 = vor.u32 %v6071_v50, %v5193_v51  ;;  %v5308_v17 = vor.u32 %v6103_v63, %v5307_v62  ;;  %v2836_v12 = vsel %vm530_vm0, %v5492_v57, 0  ;;  %v6118_v51 = vld [vmem:[%s8749_s1 + $0x91c] sm:$0xf] }
 0x110   :  { %2919 = vmatpush.bf16.msrb.mxu1 %v2827_v44  ;;  %v5263_v44 = vld [vmem:[%s8749_s1 + $0x830] sm:$0xf]  ;;  %v5464_v30 = vor.u32 %v6136_v7, %v5461_v8  ;;  %v5423_v8 = vld [vmem:[%s8749_s1 + $0x960] sm:$0xf] }
 0x111   :  { %2927 = vmatpush.bf16.msra.mxu3 %v5376_v26  ;;  %2878 = vmatpush.bf16.msrb.mxu2 %v5260_v34  ;;  %v6080_v26 = vld [vmem:[%s8749_s1 + $0x7ec] sm:$0xf]  ;;  %v5380_v34 = vor.u32 %v6121_v9, %v5379_v18  ;;  %v5264_v59 = vor.u32 %v6093_v48, %v5263_v44  ;;  %v5345_v18 = vld [vmem:[%s8749_s1 + $0x8ec] sm:$0xf0]  ;;  %v5271_v9 = vld [vmem:[%s8749_s1 + $0x838] sm:$0xf] }
 0x112   :  { %2900 = vmatpush.bf16.msrb.mxu0 %v5408_v43  ;;  %v5300_v43 = vor.u32 %v6102_v25, %v5299_v23  ;;  %v5232_v45 = vor.u32 %v6080_v26, %v5229_v27  ;;  %v5487_v23 = vld [vmem:[%s8749_s1 + $0x9e8] sm:$0xf]  ;;  %v5191_v27 = vld [vmem:[%s8749_s1 + $0x7a0] sm:$0xf]  ;;  %v5348_v35 = vor.u32 %v6108_v6, %v5345_v18  ;;  %v6140_v48 = vld [vmem:[%s8749_s1 + $0x9c8] sm:$0xf0] }
 0x113   :  { %v6131_v18 = vld [vmem:[%s8749_s1 + $0x980] sm:$0xf0] }
 0x114   :  { %2951 = vmatpush.bf16.msra.mxu1 %v5452_v22  ;;  %5506 = vmatmul.msk.bf16.vlgmr.msrb.gmra.mxu3 %vm526_vm1, %v6333_v28 }
 0x115   :  { %2928 = vmatpush.bf16.msra.mxu3 %v5340_v46  ;;  %2879 = vmatpush.bf16.msrb.mxu2 %v5224_v55  ;;  %v8130_v46 = vadd.f32 %v1389_v42, %v1376_v54  ;;  %v5344_v55 = vor.u32 %v6112_v39, %v5343_v37  ;;  %v6117_v54 = vld [vmem:[%s8749_s1 + $0x914] sm:$0xf]  ;;  %v1402_v0 = vpop.f32.mrf.mxu2  ;;  %v1417_v16 = vpop.f32.mrf.mxu3  ;;  %v6099_v37 = vld [vmem:[%s8749_s1 + $0x884] sm:$0xf] }
 0x116   :  { %2901 = vmatpush.bf16.msrb.mxu0 %v5372_v1  ;;  %v5227_v1 = vld [vmem:[%s8749_s1 + $0x7e8] sm:$0xf]  ;;  %v1391_v25 = vpop.f32.mrf.mxu0  ;;  %v6085_v42 = vld [vmem:[%s8749_s1 + $0x810] sm:$0xf0] }
 0x117   :  { %v1551_v22 = vmax.f32 %v7450_v13, %v8130_v46  ;;  %v5228_v26 = vor.u32 %v6084_v3, %v5227_v1  ;;  %v5273_v1 = vld [vmem:[%s8749_s1 + $0x85c] sm:$0xf0]  ;;  %v5199_v3 = vld [vmem:[%s8749_s1 + $0x7a8] sm:$0xf]  ;;  %v6157_v13 = vld [vmem:[%s8752_s3 + $0x30] sm:$0xff] }
 0x118   :  { %2952 = vmatpush.bf16.msra.mxu1 %v5416_v14  ;;  %v5384_v14 = vor.u32 %v6117_v54, %v5381_v60  ;;  %v6149_v54 = vld [vmem:[%s8749_s1 + $0xa10] sm:$0x30]  ;;  %v5312_v60 = vor.u32 %v6099_v37, %v5309_v40  ;;  %v6100_v37 = vld [vmem:[%s8749_s1 + $0x88c] sm:$0xf]  ;;  %v5317_v40 = vld [vmem:[%s8749_s1 + $0x8ac] sm:$0xf0] }
 0x119   :  { %2929 = vmatpush.bf16.msra.mxu3 %v5304_v5  ;;  %2880 = vmatpush.bf16.msrb.mxu2 %v5188_v10  ;;  %v8164_v5 = vadd.f32 %v1415_v33, %v1402_v0  ;;  %v1441_v10 = vpop.f32.mrf.mxu1  ;;  %v6127_v33 = vld [vmem:[%s8749_s1 + $0x964] sm:$0xf]  ;;  %v5236_v0 = vor.u32 %v6085_v42, %v5235_v41  ;;  %v6145_v41 = vld [vmem:[%s8749_s1 + $0x9f4] sm:$0xf]  ;;  %v5497_v42 = vld [vmem:[%s8749_s1 + $0xa14] sm:$0x30] }
 0x11a   :  { %2902 = vmatpush.bf16.msrb.mxu0 %v5336_v19 }
 0x11b   :  { %5505 = vmatmul.msk.bf16.vlgmr.msra.gmra.mxu0 %vm526_vm1, %v6333_v28  ;;  %v1552_v19 = vmax.f32 %v7645_v58, %v8164_v5  ;;  %v6155_v5 = vld [vmem:[%s8752_s3 + $0x20] sm:$0xff] }
 0x11c   :  { %2881 = vmatmul.bf16.vlgmr.msrb.gmra.mxu2 %v6500_v47  ;;  %2953 = vmatpush.bf16.msra.mxu1 %v5380_v34  ;;  %v5425_v34 = vld [vmem:[%s8749_s1 + $0x984] sm:$0xf0] }
 0x11d   :  { %2945 = vmatpush.bf16.msra.mxu2 %v2830_v20  ;;  %2930 = vmatpush.bf16.msra.mxu3 %v5268_v24  ;;  %v6094_v20 = vld [vmem:[%s8749_s1 + $0x858] sm:$0xf0]  ;;  %v6148_v24 = vld [vmem:[%s8749_s1 + $0xa08] sm:$0x30]  ;;  %v5428_v50 = vor.u32 %v6127_v33, %v5425_v34  ;;  %v1454_v62 = vpop.f32.mrf.mxu3  ;;  %v5424_v33 = vor.u32 %v6131_v18, %v5423_v8  ;;  %v6123_v8 = vld [vmem:[%s8749_s1 + $0x940] sm:$0xf0] }
 0x11e   :  { %2903 = vmatpush.bf16.msrb.mxu0 %v5300_v43  ;;  %v5272_v36 = vor.u32 %v6094_v20, %v5271_v9  ;;  %v5488_v39 = vor.u32 %v6148_v24, %v5487_v23  ;;  %v1404_v43 = vpop.f32.mrf.mxu2  ;;  %v1428_v6 = vpop.f32.mrf.mxu0  ;;  %v6109_v9 = vld [vmem:[%s8749_s1 + $0x8d4] sm:$0xf]  ;;  %v5237_v24 = vld [vmem:[%s8749_s1 + $0x814] sm:$0xf0]  ;;  %v5315_v18 = vld [vmem:[%s8749_s1 + $0x888] sm:$0xf] }
 0x11f   :  { %5507 = vmatmul.msk.bf16.vlgmr.msrb.gmra.mxu1 %vm526_vm1, %v6333_v28  ;;  %v6081_v23 = vld [vmem:[%s8749_s1 + $0x7f4] sm:$0xf] }
 0x120   :  { %2954 = vmatpush.bf16.msra.mxu1 %v5344_v55  ;;  %v5495_v55 = vld [vmem:[%s8749_s1 + $0x9f0] sm:$0xf]  ;;  %v2833_v63 = vsel %vm530_vm0, %v5488_v39, 0 }
 0x121   :  { %2977 = vmatpush.bf16.msrb.mxu2 %v5456_v31  ;;  %2931 = vmatpush.bf16.msra.mxu3 %v5232_v45  ;;  %v6075_v31 = vld [vmem:[%s8749_s1 + $0x7c0] sm:$0xf0]  ;;  %v5459_v45 = vld [vmem:[%s8749_s1 + $0x9a8] sm:$0xf]  ;;  %v1443_v57 = vpop.f32.mrf.mxu1  ;;  %v5496_v16 = vor.u32 %v6149_v54, %v5495_v55  ;;  %v6132_v54 = vld [vmem:[%s8749_s1 + $0x988] sm:$0xf0] }
 0x122   :  { %2904 = vmatpush.bf16.msrb.mxu0 %v5264_v59  ;;  %v5192_v44 = vor.u32 %v6075_v31, %v5191_v27  ;;  %v6090_v59 = vld [vmem:[%s8749_s1 + $0x83c] sm:$0xf]  ;;  %v5460_v7 = vor.u32 %v6140_v48, %v5459_v45  ;;  %v5467_v27 = vld [vmem:[%s8749_s1 + $0x9b0] sm:$0xf]  ;;  %v5431_v55 = vld [vmem:[%s8749_s1 + $0x968] sm:$0xf] }
 0x123   :  { %v2839_v34 = vsel %vm530_vm0, %v5496_v16, 0 }
 0x124   :  { %2955 = vmatpush.bf16.msra.mxu1 %v5308_v17  ;;  %v8254_v17 = vadd.f32 %v1441_v10, %v1428_v6  ;;  %v5276_v10 = vor.u32 %v6090_v59, %v5273_v1  ;;  %v6113_v59 = vld [vmem:[%s8749_s1 + $0x8f0] sm:$0xf0]  ;;  %v6091_v1 = vld [vmem:[%s8749_s1 + $0x844] sm:$0xf]  ;;  %v5432_v6 = vor.u32 %v6132_v54, %v5431_v55 }
 0x125   :  { %2978 = vmatpush.bf16.msrb.mxu2 %v5420_v53  ;;  %2932 = vmatpush.bf16.msra.mxu3 %v5196_v4  ;;  %v5389_v53 = vld [vmem:[%s8749_s1 + $0x93c] sm:$0xf0]  ;;  %v6076_v4 = vld [vmem:[%s8749_s1 + $0x7c8] sm:$0xf0]  ;;  %v1456_v45 = vpop.f32.mrf.mxu3 }
 0x126   :  { %2905 = vmatpush.bf16.msrb.mxu0 %v5228_v26  ;;  %v5200_v20 = vor.u32 %v6076_v4, %v5199_v3  ;;  %v1553_v25 = vmax.f32 %v7678_v11, %v8254_v17  ;;  %v5387_v26 = vld [vmem:[%s8749_s1 + $0x918] sm:$0xf]  ;;  %v1467_v31 = vpop.f32.mrf.mxu2  ;;  %v1430_v57 = vpop.f32.mrf.mxu0  ;;  %v5281_v3 = vld [vmem:[%s8749_s1 + $0x864] sm:$0xf0]  ;;  %v5323_v45 = vld [vmem:[%s8749_s1 + $0x890] sm:$0xf] }
 0x127   :  { %v8292_v39 = vadd.f32 %v1467_v31, %v1454_v62  ;;  %v5351_v62 = vld [vmem:[%s8749_s1 + $0x8d0] sm:$0xf]  ;;  %v6114_v31 = vld [vmem:[%s8749_s1 + $0x8f8] sm:$0xf0]  ;;  %v5243_v57 = vld [vmem:[%s8749_s1 + $0x7f8] sm:$0xf] }
 0x128   :  { %2933 = vmatmul.bf16.vlgmr.msra.gmra.mxu3 %v6500_v47  ;;  %2956 = vmatpush.bf16.msra.mxu1 %v5272_v36  ;;  %v5352_v16 = vor.u32 %v6113_v59, %v5351_v62  ;;  %v5287_v59 = vld [vmem:[%s8749_s1 + $0x848] sm:$0xf]  ;;  %v6174_v11 = vld [vmem:[%s8752_s3 + $0xb8] sm:$0xff] }
 0x129   :  { %2997 = vmatpush.bf16.msrb.mxu3 %v2836_v12  ;;  %2979 = vmatpush.bf16.msrb.mxu2 %v5384_v14  ;;  %v5392_v14 = vor.u32 %v6118_v51, %v5389_v53  ;;  %v5353_v12 = vld [vmem:[%s8749_s1 + $0x8f4] sm:$0xf0]  ;;  %v1480_v43 = vpop.f32.mrf.mxu1  ;;  %v1554_v51 = vmax.f32 %v7766_v2, %v8292_v39  ;;  %v5201_v53 = vld [vmem:[%s8749_s1 + $0x7cc] sm:$0xf0]  ;;  %v6160_v2 = vld [vmem:[%s8752_s3 + $0x48] sm:$0xff] }
 0x12a   :  { %2906 = vmatpush.bf16.msrb.mxu0 %v5192_v44  ;;  %v5356_v36 = vor.u32 %v6109_v9, %v5353_v12  ;;  %v5240_v44 = vor.u32 %v6081_v23, %v5237_v24  ;;  %v5284_v9 = vor.u32 %v6091_v1, %v5281_v3  ;;  %v5245_v23 = vld [vmem:[%s8749_s1 + $0x81c] sm:$0xf0]  ;;  %v6096_v3 = vld [vmem:[%s8749_s1 + $0x868] sm:$0xf0] }
 0x12b   :  { %v6180_v39 = vld [vmem:[%s8752_s3 + $0xe8] sm:$0xff] }
 0x12c   :  { %5508 = vmatmul.msk.bf16.vlgmr.msra.gmra.mxu2 %vm526_vm1, %v6333_v28  ;;  %2957 = vmatpush.bf16.msra.mxu1 %v5236_v0  ;;  %v5500_v0 = vor.u32 %v6145_v41, %v5497_v42  ;;  %v6073_v41 = vld [vmem:[%s8749_s1 + $0x7b4] sm:$0xf]  ;;  %v5209_v42 = vld [vmem:[%s8749_s1 + $0x7d4] sm:$0xf0] }
 0x12d   :  { %3029 = vmatpush.bf16.msra.mxu3 %v5464_v30  ;;  %2980 = vmatpush.bf16.msrb.mxu2 %v5348_v35  ;;  %v6141_v30 = vld [vmem:[%s8749_s1 + $0x9d0] sm:$0xf0]  ;;  %v6122_v35 = vld [vmem:[%s8749_s1 + $0x938] sm:$0xf0]  ;;  %v5212_v55 = vor.u32 %v6073_v41, %v5209_v42 }
 0x12e   :  { %2971 = vmatpush.bf16.msra.mxu0 %v2833_v63  ;;  %v5468_v48 = vor.u32 %v6141_v30, %v5467_v27  ;;  %v5320_v63 = vor.u32 %v6100_v37, %v5317_v40  ;;  %v2842_v12 = vsel %vm530_vm0, %v5500_v0, 0  ;;  %v5359_v30 = vld [vmem:[%s8749_s1 + $0x8d8] sm:$0xf]  ;;  %v6095_v40 = vld [vmem:[%s8749_s1 + $0x860] sm:$0xf0] }
 0x12f   :  { %2907 = vmatmul.bf16.vlgmr.msrb.gmra.mxu0 %v6500_v47 }
 0x130   :  { %2958 = vmatpush.bf16.msra.mxu1 %v5200_v20  ;;  %v6082_v20 = vld [vmem:[%s8749_s1 + $0x7fc] sm:$0xf] }
 0x131   :  { %3030 = vmatpush.bf16.msra.mxu3 %v5428_v50  ;;  %2981 = vmatpush.bf16.msrb.mxu2 %v5312_v60  ;;  %v6072_v50 = vld [vmem:[%s8749_s1 + $0x7ac] sm:$0xf]  ;;  %v5388_v60 = vor.u32 %v6122_v35, %v5387_v26  ;;  %v1482_v24 = vpop.f32.mrf.mxu1  ;;  %v1519_v26 = vpop.f32.mrf.mxu3  ;;  %v5279_v35 = vld [vmem:[%s8749_s1 + $0x840] sm:$0xf] }
 0x132   :  { %3003 = vmatpush.bf16.msrb.mxu0 %v5460_v7  ;;  %v5204_v4 = vor.u32 %v6072_v50, %v5201_v53  ;;  %v5395_v7 = vld [vmem:[%s8749_s1 + $0x920] sm:$0xf]  ;;  %v5280_v53 = vor.u32 %v6095_v40, %v5279_v35 }
 0x133   :  { %2959 = vmatmul.bf16.vlgmr.msra.gmra.mxu1 %v6500_v47  ;;  %v5396_v27 = vor.u32 %v6123_v8, %v5395_v7 }
 0x134   :  { %3023 = vmatpush.bf16.msrb.mxu1 %v2839_v34 }
 0x135   :  { %3031 = vmatpush.bf16.msra.mxu3 %v5392_v14  ;;  %2982 = vmatpush.bf16.msrb.mxu2 %v5276_v10  ;;  %v1469_v14 = vpop.f32.mrf.mxu2  ;;  %v6104_v10 = vld [vmem:[%s8749_s1 + $0x8a8] sm:$0xf0] }
 0x136   :  { %3004 = vmatpush.bf16.msrb.mxu0 %v5424_v33  ;;  %v1493_v33 = vpop.f32.mrf.mxu0  ;;  %v5316_v34 = vor.u32 %v6104_v10, %v5315_v18  ;;  %v5207_v14 = vld [vmem:[%s8749_s1 + $0x7b0] sm:$0xf]  ;;  %v5288_v18 = vor.u32 %v6096_v3, %v5287_v59  ;;  %v6087_v10 = vld [vmem:[%s8749_s1 + $0x820] sm:$0xf0]  ;;  %v6158_v3 = vld [vmem:[%s8752_s3 + $0x38] sm:$0xff] }
 0x137   :  { %v8360_v37 = vadd.f32 %v1493_v33, %v1480_v43  ;;  %v6078_v33 = vld [vmem:[%s8749_s1 + $0x7d8] sm:$0xf0] }
 0x138   :  { %3055 = vmatpush.bf16.msra.mxu1 %v5468_v48  ;;  %5510 = vmatmul.msk.bf16.vlgmr.msrb.gmra.mxu3 %vm526_vm1, %v6333_v28  ;;  %v6105_v48 = vld [vmem:[%s8749_s1 + $0x8b0] sm:$0xf0] }
 0x139   :  { %3032 = vmatpush.bf16.msra.mxu3 %v5356_v36  ;;  %2983 = vmatpush.bf16.msrb.mxu2 %v5240_v44  ;;  %v5248_v36 = vor.u32 %v6082_v20, %v5245_v23  ;;  %v5360_v44 = vor.u32 %v6114_v31, %v5359_v30  ;;  %v1555_v43 = vmax.f32 %v7802_v21, %v8360_v37  ;;  %v1545_v62 = vpop.f32.mrf.mxu1  ;;  %v5215_v31 = vld [vmem:[%s8749_s1 + $0x7b8] sm:$0xf]  ;;  %v6179_v21 = vld [vmem:[%s8752_s3 + $0xe0] sm:$0xff] }
 0x13a   :  { %3005 = vmatpush.bf16.msrb.mxu0 %v5388_v60  ;;  %v6086_v60 = vld [vmem:[%s8749_s1 + $0x818] sm:$0xf0]  ;;  %v5324_v0 = vor.u32 %v6105_v48, %v5323_v45 }
 0x13b   :  { %v5244_v8 = vor.u32 %v6086_v60, %v5243_v57  ;;  %v6170_v37 = vld [vmem:[%s8752_s3 + $0x98] sm:$0xff] }
 0x13c   :  { %3056 = vmatpush.bf16.msra.mxu1 %v5432_v6  ;;  %v6150_v6 = vld [vmem:[%s8749_s1 + $0xa18] sm:$0x30] }
 0x13d   :  { %3033 = vmatpush.bf16.msra.mxu3 %v5320_v63  ;;  %2984 = vmatpush.bf16.msrb.mxu2 %v5204_v4  ;;  %v1506_v50 = vpop.f32.mrf.mxu2  ;;  %v1521_v63 = vpop.f32.mrf.mxu3  ;;  %v5503_v4 = vld [vmem:[%s8749_s1 + $0x9f8] sm:$0xf] }
 0x13e   :  { %3006 = vmatpush.bf16.msrb.mxu0 %v5352_v16  ;;  %v8382_v54 = vadd.f32 %v1519_v26, %v1506_v50  ;;  %v1495_v7 = vpop.f32.mrf.mxu0  ;;  %v6077_v16 = vld [vmem:[%s8749_s1 + $0x7d0] sm:$0xf0] }
 0x13f   :  { %5509 = vmatmul.msk.bf16.vlgmr.msra.gmra.mxu0 %vm526_vm1, %v6333_v28  ;;  %v5208_v23 = vor.u32 %v6077_v16, %v5207_v14  ;;  %v6156_v7 = vld [vmem:[%s8752_s3 + $0x28] sm:$0xff] }
 0x140   :  { %2985 = vmatmul.bf16.vlgmr.msrb.gmra.mxu2 %v6500_v47  ;;  %3057 = vmatpush.bf16.msra.mxu1 %v5396_v27  ;;  %v1556_v1 = vmax.f32 %v7886_v15, %v8382_v54  ;;  %v6176_v15 = vld [vmem:[%s8752_s3 + $0xc8] sm:$0xff] }
 0x141   :  { %3049 = vmatpush.bf16.msra.mxu2 %v2842_v12  ;;  %3034 = vmatpush.bf16.msra.mxu3 %v5284_v9  ;;  %v5504_v9 = vor.u32 %v6150_v6, %v5503_v4  ;;  %v5251_v12 = vld [vmem:[%s8749_s1 + $0x800] sm:$0xf]  ;;  %v1547_v24 = vpop.f32.mrf.mxu1  ;;  %v6165_v4 = vld [vmem:[%s8752_s3 + $0x70] sm:$0xff]  ;;  %v6196_v54 = vld [vmem:[%s8752_s3 + $0x168] sm:$0xff] }
 0x142   :  { %3007 = vmatpush.bf16.msrb.mxu0 %v5316_v34  ;;  %v5252_v30 = vor.u32 %v6087_v10, %v5251_v12  ;;  %v6163_v12 = vld [vmem:[%s8752_s3 + $0x60] sm:$0xff]  ;;  %v6154_v10 = vld [vmem:[%s8752_s3 + $0x18] sm:$0xff] }
 0x143   :  { %5511 = vmatmul.msk.bf16.vlgmr.msrb.gmra.mxu1 %vm526_vm1, %v6333_v28  ;;  %v2845_v27 = vsel %vm530_vm0, %v5504_v9, 0  ;;  %v6164_v9 = vld [vmem:[%s8752_s3 + $0x68] sm:$0xff] }
 0x144   :  { %3058 = vmatpush.bf16.msra.mxu1 %v5360_v44 }
 0x145   :  { %3035 = vmatpush.bf16.msra.mxu3 %v5248_v36  ;;  %v1508_v20 = vpop.f32.mrf.mxu2  ;;  %v2090_v26 = vpop.f32.mrf.mxu3  ;;  %v5216_v36 = vor.u32 %v6078_v33, %v5215_v31  ;;  %3707 = vmatpush.bf16.msrb.mxu2 %v6158_v3  ;;  %v6161_v33 = vld [vmem:[%s8752_s3 + $0x50] sm:$0xff] }
 0x146   :  { %3008 = vmatpush.bf16.msrb.mxu0 %v5280_v53  ;;  %v1532_v34 = vpop.f32.mrf.mxu0  ;;  %v6182_v20 = vld [vmem:[%s8752_s3 + $0xf8] sm:$0xff]  ;;  %v6169_v3 = vld [vmem:[%s8752_s3 + $0x90] sm:$0xff] }
 0x147   :  { %v8426_v35 = vadd.f32 %v1545_v62, %v1532_v34  ;;  %v6181_v34 = vld [vmem:[%s8752_s3 + $0xf0] sm:$0xff] }
 0x148   :  { %3059 = vmatpush.bf16.msra.mxu1 %v5324_v0 }
 0x149   :  { %3036 = vmatpush.bf16.msra.mxu3 %v5212_v55  ;;  %v1557_v40 = vmax.f32 %v7918_v32, %v8426_v35  ;;  %v2116_v44 = vpop.f32.mrf.mxu1  ;;  %3708 = vmatpush.bf16.msrb.mxu2 %v6157_v13  ;;  %v6197_v13 = vld [vmem:[%s8752_s3 + $0x170] sm:$0xff]  ;;  %v6195_v32 = vld [vmem:[%s8752_s3 + $0x160] sm:$0xff]  ;;  %v6186_v35 = vld [vmem:[%s8752_s3 + $0x118] sm:$0xff] }
 0x14a   :  { %3009 = vmatpush.bf16.msrb.mxu0 %v5244_v8 }
 0x14c   :  { %3037 = vmatmul.bf16.vlgmr.msra.gmra.mxu3 %v6500_v47  ;;  %3060 = vmatpush.bf16.msra.mxu1 %v5288_v18 }
 0x14d   :  { %v2103_v41 = vpop.f32.mrf.mxu2  ;;  %v2092_v45 = vpop.f32.mrf.mxu3  ;;  %3720 = vmatpush.bf16.msrb.mxu3 %v6166_v49  ;;  %3709 = vmatpush.bf16.msrb.mxu2 %v6156_v7 }
 0x14e   :  { %3010 = vmatpush.bf16.msrb.mxu0 %v5208_v23  ;;  %v2104_v42 = vadd.f32 %v2103_v41, %v2090_v26  ;;  %v1534_v50 = vpop.f32.mrf.mxu0  ;;  %v6153_v26 = vld [vmem:[%s8752_s3 + $0x10] sm:$0xff]  ;;  %v6152_v41 = vld [vmem:[%s8752_s3 + $0x8] sm:$0xff] }
 0x150   :  { %5512 = vmatmul.msk.bf16.vlgmr.msra.gmra.mxu2 %vm526_vm1, %v6333_v28  ;;  %3061 = vmatpush.bf16.msra.mxu1 %v5252_v30  ;;  %v8436_v48 = vmax.f32 %v1549_v38, %v2104_v42  ;;  %v6172_v42 = vld [vmem:[%s8752_s3 + $0xa8] sm:$0xff] }
 0x151   :  { %3011 = vmatmul.bf16.vlgmr.msrb.gmra.mxu0 %v6500_v47  ;;  %v2118_v55 = vpop.f32.mrf.mxu1  ;;  %3721 = vmatpush.bf16.msrb.mxu3 %v6165_v4  ;;  %v6188_v4 = vld [vmem:[%s8752_s3 + $0x128] sm:$0xff] }
 0x152   :  { %3075 = vmatpush.bf16.msra.mxu0 %v2845_v27  ;;  %3710 = vmatpush.bf16.msrb.mxu2 %v6155_v5  ;;  %v6173_v27 = vld [vmem:[%s8752_s3 + $0xb0] sm:$0xff]  ;;  %v6151_v55 = vld [vmem:[%s8752_s3] sm:$0xff] }
 0x154   :  { %3062 = vmatpush.bf16.msra.mxu1 %v5216_v36 }
 0x155   :  { %v2105_v53 = vpop.f32.mrf.mxu2  ;;  %v2155_v57 = vpop.f32.mrf.mxu3  ;;  %3722 = vmatpush.bf16.msrb.mxu3 %v6164_v9  ;;  %v6187_v9 = vld [vmem:[%s8752_s3 + $0x120] sm:$0xff] }
 0x156   :  { %v2129_v60 = vpop.f32.mrf.mxu0  ;;  %3711 = vmatpush.bf16.msrb.mxu2 %v6154_v10  ;;  %3733 = vmatpush.bf16.msrb.mxu0 %v6174_v11  ;;  %v8610_v11 = vld [vmem:[%s8751_s2] sm:$0xff] }
 0x157   :  { %3063 = vmatmul.bf16.vlgmr.msra.gmra.mxu1 %v6500_v47  ;;  %v2130_v62 = vadd.f32 %v2129_v60, %v2116_v44 }
 0x158   :  { %3746 = vmatpush.bf16.msrb.mxu1 %v6182_v20  ;;  %v6214_v20 = vld [vmem:[%s8752_s3 + $0x1f8] sm:$0xff] }
 0x159   :  { %v8442_v63 = vmax.f32 %v1550_v61, %v2130_v62  ;;  %v2181_v29 = vpop.f32.mrf.mxu1  ;;  %3723 = vmatpush.bf16.msrb.mxu3 %v6163_v12  ;;  %v6159_v62 = vld [vmem:[%s8752_s3 + $0x40] sm:$0xff] }
 0x15a   :  { %3712 = vmatpush.bf16.msrb.mxu2 %v6153_v26  ;;  %3734 = vmatpush.bf16.msrb.mxu0 %v6173_v27 }
 0x15c   :  { %3747 = vmatpush.bf16.msrb.mxu1 %v6181_v34 }
 0x15d   :  { %v2142_v0 = vpop.f32.mrf.mxu2  ;;  %v2157_v38 = vpop.f32.mrf.mxu3 }
 0x15e   :  { %v2156_v52 = vadd.f32 %v2155_v57, %v2142_v0  ;;  %v2131_v59 = vpop.f32.mrf.mxu0  ;;  %3713 = vmatpush.bf16.msrb.mxu2 %v6152_v41  ;;  %3735 = vmatpush.bf16.msrb.mxu0 %v6172_v42  ;;  %v6171_v57 = vld [vmem:[%s8752_s3 + $0xa0] sm:$0xff]  ;;  %v6178_v38 = vld [vmem:[%s8752_s3 + $0xd8] sm:$0xff]  ;;  %v6184_v41 = vld [vmem:[%s8752_s3 + $0x108] sm:$0xff] }
 0x15f   :  { %v6198_v59 = vld [vmem:[%s8752_s3 + $0x178] sm:$0xff]  ;;  %v6204_v42 = vld [vmem:[%s8752_s3 + $0x1a8] sm:$0xff] }
 0x160   :  { %v8449_v47 = vmax.f32 %v1551_v22, %v2156_v52  ;;  %3748 = vmatpush.bf16.msrb.mxu1 %v6180_v39 }
 0x161   :  { %5513 = vmatmul.msk.bf16.vlgmr.msra.gmra.mxu0 %vm526_vm1, %v6333_v28  ;;  %v2183_v28 = vpop.f32.mrf.mxu1 }
 0x162   :  { %3714 = vmatpush.bf16.msrb.mxu2 %v6151_v55  ;;  %3736 = vmatpush.bf16.msrb.mxu0 %v6171_v57  ;;  %v6212_v55 = vld [vmem:[%s8752_s3 + $0x1e8] sm:$0xff] }
 0x164   :  { %3749 = vmatpush.bf16.msrb.mxu1 %v6179_v21  ;;  %v6203_v21 = vld [vmem:[%s8752_s3 + $0x1a0] sm:$0xff] }
 0x165   :  { %v2144_v56 = vpop.f32.mrf.mxu2  ;;  %v2194_v61 = vpop.f32.mrf.mxu3 }
 0x166   :  { %v2168_v46 = vpop.f32.mrf.mxu0  ;;  %3737 = vmatpush.bf16.msrb.mxu0 %v6170_v37  ;;  %v6189_v56 = vld [vmem:[%s8752_s3 + $0x130] sm:$0xff] }
 0x167   :  { %v2182_v22 = vadd.f32 %v2181_v29, %v2168_v46 }
 0x168   :  { %3750 = vmatpush.bf16.msrb.mxu1 %v6178_v38  ;;  %v6202_v38 = vld [vmem:[%s8752_s3 + $0x198] sm:$0xff] }
 0x169   :  { %v8466_v6 = vmax.f32 %v1552_v19, %v2182_v22  ;;  %v2220_v16 = vpop.f32.mrf.mxu1  ;;  %v6168_v22 = vld [vmem:[%s8752_s3 + $0x88] sm:$0xff] }
 0x16a   :  { %3738 = vmatpush.bf16.msrb.mxu0 %v6169_v3 }
 0x16d   :  { %v2207_v8 = vpop.f32.mrf.mxu2  ;;  %v2196_v18 = vpop.f32.mrf.mxu3 }
 0x16e   :  { %v2208_v14 = vadd.f32 %v2207_v8, %v2194_v61  ;;  %v2170_v19 = vpop.f32.mrf.mxu0  ;;  %v6177_v61 = vld [vmem:[%s8752_s3 + $0xd0] sm:$0xff]  ;;  %3739 = vmatpush.bf16.msrb.mxu0 %v6168_v22  ;;  %v6167_v18 = vld [vmem:[%s8752_s3 + $0x80] sm:$0xff] }
 0x16f   :  { %3751 = vmatpush.bf16.msrb.mxu1 %v6177_v61  ;;  %v6175_v19 = vld [vmem:[%s8752_s3 + $0xc0] sm:$0xff]  ;;  %v6201_v61 = vld [vmem:[%s8752_s3 + $0x190] sm:$0xff] }
 0x170   :  { %v8477_v58 = vmax.f32 %v1553_v25, %v2208_v14  ;;  %v6162_v25 = vld [vmem:[%s8752_s3 + $0x58] sm:$0xff] }
 0x171   :  { %v2222_v23 = vpop.f32.mrf.mxu1  ;;  %3724 = vmatpush.bf16.msrb.mxu3 %v6162_v25  ;;  %v6194_v25 = vld [vmem:[%s8752_s3 + $0x158] sm:$0xff] }
 0x172   :  { %3740 = vmatpush.bf16.msrb.mxu0 %v6167_v18  ;;  %v6185_v23 = vld [vmem:[%s8752_s3 + $0x110] sm:$0xff] }
 0x173   :  { %3752 = vmatpush.bf16.msrb.mxu1 %v6176_v15 }
 0x175   :  { %v2209_v17 = vpop.f32.mrf.mxu2  ;;  %v2259_v24 = vpop.f32.mrf.mxu3  ;;  %3725 = vmatpush.bf16.msrb.mxu3 %v6161_v33  ;;  %v6213_v33 = vld [vmem:[%s8752_s3 + $0x1f0] sm:$0xff] }
 0x176   :  { %v2233_v30 = vpop.f32.mrf.mxu0 }
 0x177   :  { %v2234_v31 = vadd.f32 %v2233_v30, %v2220_v16  ;;  %3753 = vmatpush.bf16.msrb.mxu1 %v6175_v19  ;;  %v3094_v30 = vperm.slane %v8610_v11, 0 }
 0x179   :  { %v8512_v36 = vmax.f32 %v1554_v51, %v2234_v31  ;;  %v2285_v50 = vpop.f32.mrf.mxu1  ;;  %3726 = vmatpush.bf16.msrb.mxu3 %v6160_v2  ;;  %v6193_v31 = vld [vmem:[%s8752_s3 + $0x150] sm:$0xff] }
 0x17b   :  { %3798 = vmatpush.bf16.msra.mxu1 %v6214_v20  ;;  %v6207_v20 = vld [vmem:[%s8752_s3 + $0x1c0] sm:$0xff] }
 0x17d   :  { %v2246_v44 = vpop.f32.mrf.mxu2  ;;  %v2261_v53 = vpop.f32.mrf.mxu3  ;;  %3727 = vmatpush.bf16.msrb.mxu3 %v6159_v62  ;;  %v6183_v62 = vld [vmem:[%s8752_s3 + $0x100] sm:$0xff] }
 0x17e   :  { %v2260_v45 = vadd.f32 %v2259_v24, %v2246_v44  ;;  %v2235_v60 = vpop.f32.mrf.mxu0  ;;  %v6205_v24 = vld [vmem:[%s8752_s3 + $0x1b0] sm:$0xff]  ;;  %v3095_v53 = vperm.slane %v8610_v11, 1 }
 0x17f   :  { %3799 = vmatpush.bf16.msra.mxu1 %v6213_v33 }
 0x180   :  { %v8529_v51 = vmax.f32 %v1555_v43, %v2260_v45  ;;  %v6190_v43 = vld [vmem:[%s8752_s3 + $0x138] sm:$0xff] }
 0x181   :  { %3759 = vmatpush.bf16.msra.mxu2 %v6190_v43  ;;  %v2287_v52 = vpop.f32.mrf.mxu1  ;;  %3772 = vmatpush.bf16.msra.mxu3 %v6198_v59 }
 0x182   :  { %v6191_v52 = vld [vmem:[%s8752_s3 + $0x140] sm:$0xff] }
 0x183   :  { %3800 = vmatpush.bf16.msra.mxu1 %v6212_v55 }
 0x185   :  { %v2248_v0 = vpop.f32.mrf.mxu2  ;;  %3760 = vmatpush.bf16.msra.mxu2 %v6189_v56  ;;  %3773 = vmatpush.bf16.msra.mxu3 %v6197_v13 }
 0x187   :  { %v2298_v29 = vpop.f32.mrf.mxu3 }
 0x188   :  { %v2272_v49 = vpop.f32.mrf.mxu0 }
 0x189   :  { %v2286_v28 = vadd.f32 %v2285_v50, %v2272_v49  ;;  %3761 = vmatpush.bf16.msra.mxu2 %v6188_v4  ;;  %3774 = vmatpush.bf16.msra.mxu3 %v6196_v54  ;;  %v3096_v4 = vperm.slane %v8610_v11, 2 }
 0x18b   :  { %v8570_v46 = vmax.f32 %v1556_v1, %v2286_v28  ;;  %v6210_v28 = vld [vmem:[%s8752_s3 + $0x1d8] sm:$0xff] }
 0x18c   :  { %v2856_v14 = vpop.f32.mrf.mxu1 }
 0x18d   :  { %v2311_v7 = vpop.f32.mrf.mxu2  ;;  %3762 = vmatpush.bf16.msra.mxu2 %v6187_v9  ;;  %3775 = vmatpush.bf16.msra.mxu3 %v6195_v32  ;;  %v3097_v9 = vperm.slane %v8610_v11, 3 }
 0x18e   :  { %v2312_v8 = vadd.f32 %v2311_v7, %v2298_v29  ;;  %v6209_v7 = vld [vmem:[%s8752_s3 + $0x1d0] sm:$0xff] }
 0x18f   :  { %v2300_v16 = vpop.f32.mrf.mxu3 }
 0x190   :  { %v8587_v1 = vmax.f32 %v1557_v40, %v2312_v8  ;;  %v2274_v5 = vpop.f32.mrf.mxu0  ;;  %v6206_v40 = vld [vmem:[%s8752_s3 + $0x1b8] sm:$0xff]  ;;  %v6220_v16 = vld [vmem:[%s8752_s3 + $0x228] sm:$0xff] }
 0x191   :  { %3763 = vmatpush.bf16.msra.mxu2 %v6186_v35  ;;  %3785 = vmatpush.bf16.msra.mxu0 %v6206_v40  ;;  %v6199_v40 = vld [vmem:[%s8752_s3 + $0x180] sm:$0xff] }
 0x192   :  { %3776 = vmatpush.bf16.msra.mxu3 %v6194_v25 }
 0x194   :  { %v2858_v10 = vpop.f32.mrf.mxu1 }
 0x195   :  { %v2313_v12 = vpop.f32.mrf.mxu2  ;;  %3764 = vmatpush.bf16.msra.mxu2 %v6185_v23  ;;  %3786 = vmatpush.bf16.msra.mxu0 %v6205_v24 }
 0x196   :  { %3777 = vmatpush.bf16.msra.mxu3 %v6193_v31  ;;  %v6219_v12 = vld [vmem:[%s8752_s3 + $0x220] sm:$0xff]  ;;  %v6217_v31 = vld [vmem:[%s8752_s3 + $0x210] sm:$0xff] }
 0x197   :  { %v2895_v17 = vpop.f32.mrf.mxu3 }
 0x198   :  { %v2869_v26 = vpop.f32.mrf.mxu0 }
 0x199   :  { %v2870_v27 = vadd.f32 %v2869_v26, %v2856_v14  ;;  %3765 = vmatpush.bf16.msra.mxu2 %v6184_v41  ;;  %3787 = vmatpush.bf16.msra.mxu0 %v6204_v42  ;;  %v6200_v14 = vld [vmem:[%s8752_s3 + $0x188] sm:$0xff]  ;;  %v3098_v41 = vperm.slane %v8610_v11, 4 }
 0x19b   :  { %v3081_v34 = vmax.f32 %v8436_v48, %v2870_v27  ;;  %v6192_v48 = vld [vmem:[%s8752_s3 + $0x148] sm:$0xff] }
 0x19c   :  { %v2921_v2 = vpop.f32.mrf.mxu1  ;;  %3778 = vmatpush.bf16.msra.mxu3 %v6192_v48 }
 0x19d   :  { %v3112_v45 = vadd.f32 %v3094_v30, %v3081_v34  ;;  %3766 = vmatpush.bf16.msra.mxu2 %v6183_v62  ;;  %3788 = vmatpush.bf16.msra.mxu0 %v6203_v21 }
 0x19f   :  { %v2882_v44 = vpop.f32.mrf.mxu2  ;;  %v2897_v39 = vpop.f32.mrf.mxu3  ;;  %v3121_v57 = vmax.f32 %v3112_v45, 0.0 }
 0x1a0   :  { %v2896_v50 = vadd.f32 %v2895_v17, %v2882_v44  ;;  %v2871_v37 = vpop.f32.mrf.mxu0  ;;  %3779 = vmatpush.bf16.msra.mxu3 %v6191_v52  ;;  %v6216_v44 = vld [vmem:[%s8752_s3 + $0x208] sm:$0xff] }
 0x1a1   :  { %v3130_v43 = vpack.c.bf16 %v3121_v57, %v3121_v57  ;;  %3789 = vmatpush.bf16.msra.mxu0 %v6202_v38 }
 0x1a2   :  { %v3082_v60 = vmax.f32 %v8442_v63, %v2896_v50  ;;  %v6211_v63 = vld [vmem:[%s8752_s3 + $0x1e0] sm:$0xff] }
 0x1a3   :  { %3715 = vmatmul.bf16.vlgmr.msrb.gmra.mxu2 %v3130_v43  ;;  %3801 = vmatpush.bf16.msra.mxu1 %v6211_v63 }
 0x1a4   :  { %v3113_v0 = vadd.f32 %v3095_v53, %v3082_v60  ;;  %v2923_v56 = vpop.f32.mrf.mxu1  ;;  %3813 = vmatpush.bf16.msrb.mxu2 %v6220_v16  ;;  %v6215_v60 = vld [vmem:[%s8752_s3 + $0x200] sm:$0xff] }
 0x1a5   :  { %3790 = vmatpush.bf16.msra.mxu0 %v6201_v61 }
 0x1a6   :  { %v3122_v29 = vmax.f32 %v3113_v0, 0.0 }
 0x1a7   :  { %v2884_v59 = vpop.f32.mrf.mxu2  ;;  %3802 = vmatpush.bf16.msra.mxu1 %v6210_v28  ;;  %v3101_v28 = vperm.slane %v8610_v11, 7 }
 0x1a8   :  { %v3131_v3 = vpack.c.bf16 %v3122_v29, %v3122_v29  ;;  %3814 = vmatpush.bf16.msrb.mxu2 %v6219_v12  ;;  %v3100_v59 = vperm.slane %v8610_v11, 6  ;;  %v6228_v12 = vld [vmem:[%s8755_s5 + $0x38] sm:$0xff] }
 0x1a9   :  { %3791 = vmatpush.bf16.msra.mxu0 %v6200_v14 }
 0x1aa   :  { %3728 = vmatmul.bf16.vlgmr.msrb.gmra.mxu3 %v3131_v3 }
 0x1ab   :  { %v2934_v49 = vpop.f32.mrf.mxu3  ;;  %3803 = vmatpush.bf16.msra.mxu1 %v6209_v7  ;;  %3894 = vmatpush.bf16.msrb.mxu3 %v6228_v12 }
 0x1ac   :  { %v2908_v13 = vpop.f32.mrf.mxu0 }
 0x1ad   :  { %v2922_v22 = vadd.f32 %v2921_v2, %v2908_v13  ;;  %3792 = vmatpush.bf16.msra.mxu0 %v6199_v40  ;;  %v3099_v2 = vperm.slane %v8610_v11, 5  ;;  %v6229_v11 = vld [vmem:[%s8751_s2 + $0x8] ss:$0 sm:$0xff] }
 0x1af   :  { %v3083_v8 = vmax.f32 %v8449_v47, %v2922_v22  ;;  %v2947_v15 = vpop.f32.mrf.mxu2  ;;  %v6208_v47 = vld [vmem:[%s8752_s3 + $0x1c8] sm:$0xff] }
 0x1b0   :  { %v2948_v18 = vadd.f32 %v2947_v15, %v2934_v49  ;;  %v2960_v5 = vpop.f32.mrf.mxu1  ;;  %3804 = vmatpush.bf16.msra.mxu1 %v6208_v47 }
 0x1b1   :  { %v3114_v54 = vadd.f32 %v3096_v4, %v3083_v8 }
 0x1b2   :  { %v3084_v35 = vmax.f32 %v8466_v6, %v2948_v18  ;;  %v6218_v6 = vld [vmem:[%s8752_s3 + $0x218] sm:$0xff] }
 0x1b3   :  { %v2936_v19 = vpop.f32.mrf.mxu3  ;;  %v3123_v32 = vmax.f32 %v3114_v54, 0.0  ;;  %3815 = vmatpush.bf16.msrb.mxu2 %v6218_v6 }
 0x1b4   :  { %v2910_v10 = vpop.f32.mrf.mxu0  ;;  %v3115_v25 = vadd.f32 %v3097_v9, %v3084_v35  ;;  %3805 = vmatpush.bf16.msra.mxu1 %v6207_v20 }
 0x1b5   :  { %v3132_v17 = vpack.c.bf16 %v3123_v32, %v3123_v32 }
 0x1b6   :  { %v3124_v23 = vmax.f32 %v3115_v25, 0.0  ;;  %v6227_v25 = vld [vmem:[%s8755_s5 + $0x30] sm:$0xff] }
 0x1b7   :  { %3741 = vmatmul.bf16.vlgmr.msrb.gmra.mxu0 %v3132_v17  ;;  %v2949_v24 = vpop.f32.mrf.mxu2  ;;  %3816 = vmatpush.bf16.msrb.mxu2 %v6217_v31  ;;  %v6222_v31 = vld [vmem:[%s8755_s5 + $0x8] sm:$0xff] }
 0x1b8   :  { %v3133_v26 = vpack.c.bf16 %v3124_v23, %v3124_v23  ;;  %v2962_v27 = vpop.f32.mrf.mxu1  ;;  %3895 = vmatpush.bf16.msrb.mxu3 %v6227_v25  ;;  %v6226_v23 = vld [vmem:[%s8755_s5 + $0x28] sm:$0xff]  ;;  %v6225_v24 = vld [vmem:[%s8755_s5 + $0x20] sm:$0xff] }
 0x1b9   :  { %v6224_v27 = vld [vmem:[%s8755_s5 + $0x18] sm:$0xff] }
 0x1ba   :  { %3754 = vmatmul.bf16.vlgmr.msrb.gmra.mxu1 %v3133_v26 }
 0x1bb   :  { %v2999_v30 = vpop.f32.mrf.mxu3  ;;  %3817 = vmatpush.bf16.msrb.mxu2 %v6216_v44 }
 0x1bc   :  { %v2973_v33 = vpop.f32.mrf.mxu0  ;;  %3896 = vmatpush.bf16.msrb.mxu3 %v6226_v23 }
 0x1bd   :  { %v2974_v34 = vadd.f32 %v2973_v33, %v2960_v5 }
 0x1bf   :  { %v3085_v42 = vmax.f32 %v8477_v58, %v2974_v34  ;;  %3818 = vmatpush.bf16.msrb.mxu2 %v6215_v60  ;;  %v6221_v34 = vld [vmem:[%s8755_s5] sm:$0xff] }
 0x1c0   :  { %v3025_v39 = vpop.f32.mrf.mxu1  ;;  %3897 = vmatpush.bf16.msrb.mxu3 %v6225_v24 }
 0x1c1   :  { %v3116_v50 = vadd.f32 %v3098_v41, %v3085_v42  ;;  %v6230_v42 = vld [vmem:[%s8753_s4] ss:$0 sm:$0xff] }
 0x1c3   :  { %v2986_v45 = vpop.f32.mrf.mxu2  ;;  %v3001_v48 = vpop.f32.mrf.mxu3  ;;  %v3125_v55 = vmax.f32 %v3116_v50, 0.0 }
 0x1c4   :  { %v3000_v53 = vadd.f32 %v2999_v30, %v2986_v45  ;;  %v2975_v58 = vpop.f32.mrf.mxu0  ;;  %3898 = vmatpush.bf16.msrb.mxu3 %v6224_v27  ;;  %v6223_v30 = vld [vmem:[%s8755_s5 + $0x10] sm:$0xff] }
 0x1c5   :  { %v3134_v62 = vpack.c.bf16 %v3125_v55, %v3125_v55 }
 0x1c6   :  { %v3086_v57 = vmax.f32 %v8512_v36, %v3000_v53 }
 0x1c7   :  { %3767 = vmatmul.bf16.vlgmr.msra.gmra.mxu2 %v3134_v62 }
 0x1c8   :  { %v3117_v21 = vadd.f32 %v3099_v2, %v3086_v57  ;;  %v3027_v52 = vpop.f32.mrf.mxu1  ;;  %3899 = vmatpush.bf16.msrb.mxu3 %v6223_v30 }
 0x1ca   :  { %v3126_v37 = vmax.f32 %v3117_v21, 0.0 }
 0x1cb   :  { %v2988_v43 = vpop.f32.mrf.mxu2 }
 0x1cc   :  { %v3135_v0 = vpack.c.bf16 %v3126_v37, %v3126_v37  ;;  %3900 = vmatpush.bf16.msrb.mxu3 %v6222_v31 }
 0x1ce   :  { %3780 = vmatmul.bf16.vlgmr.msra.gmra.mxu3 %v3135_v0  ;;  %v3012_v29 = vpop.f32.mrf.mxu0 }
 0x1cf   :  { %v3038_v63 = vpop.f32.mrf.mxu3  ;;  %v3026_v38 = vadd.f32 %v3025_v39, %v3012_v29 }
 0x1d0   :  { %3901 = vmatpush.bf16.msrb.mxu3 %v6221_v34 }
 0x1d1   :  { %v3087_v36 = vmax.f32 %v8529_v51, %v3026_v38  ;;  %v6231_v38 = vld [vmem:[%s8754_s6] ss:$0 sm:$0xff] }
 0x1d3   :  { %v3051_v3 = vpop.f32.mrf.mxu2  ;;  %v3118_v56 = vadd.f32 %v3100_v59, %v3087_v36 }
 0x1d4   :  { %v3052_v49 = vadd.f32 %v3051_v3, %v3038_v63  ;;  %v3064_v61 = vpop.f32.mrf.mxu1 }
 0x1d5   :  { %v3127_v22 = vmax.f32 %v3118_v56, 0.0 }
 0x1d6   :  { %v3088_v4 = vmax.f32 %v8570_v46, %v3052_v49  ;;  %v3014_v7 = vpop.f32.mrf.mxu0 }
 0x1d7   :  { %v3040_v13 = vpop.f32.mrf.mxu3  ;;  %v3136_v8 = vpack.c.bf16 %v3127_v22, %v3127_v22 }
 0x1d8   :  { %v3119_v14 = vadd.f32 %v3101_v28, %v3088_v4 }
 0x1d9   :  { %3793 = vmatmul.bf16.vlgmr.msra.gmra.mxu0 %v3136_v8 }
 0x1da   :  { %v3128_v16 = vmax.f32 %v3119_v14, 0.0 }
 0x1db   :  { %v3053_v15 = vpop.f32.mrf.mxu2 }
 0x1dc   :  { %v3137_v54 = vpack.c.bf16 %v3128_v16, %v3128_v16  ;;  %v3066_v18 = vpop.f32.mrf.mxu1 }
 0x1de   :  { %3806 = vmatmul.bf16.vlgmr.msra.gmra.mxu1 %v3137_v54  ;;  %v3077_v51 = vpop.f32.mrf.mxu0 }
 0x1df   :  { %v3078_v9 = vadd.f32 %v3077_v51, %v3064_v61 }
 0x1e1   :  { %v3089_v5 = vmax.f32 %v8587_v1, %v3078_v9 }
 0x1e3   :  { %v3120_v19 = vadd.f32 %v6229_v11, %v3089_v5 }
 0x1e5   :  { %v3129_v47 = vmax.f32 %v3120_v19, 0.0 }
 0x1e6   :  { %v3079_v46 = vpop.f32.mrf.mxu0 }
 0x1e7   :  { %v3138_v32 = vpack.c.bf16 %v3129_v47, %v3129_v47 }
 0x1e9   :  { %5794 = vmatmul.msk.bf16.vlgmr.msrb.gmra.mxu2 %vm3703_vm2, %v3138_v32 }
 0x226   :  { %v3716_v35 = vpop.f32.mrf.mxu2 }
 0x227   :  { %v3717_v45 = vadd.f32 %v6230_v42, %v3716_v35 }
 0x22d   :  { %v3729_v40 = vpop.f32.mrf.mxu3 }
 0x22e   :  { %v3718_v10 = vpop.f32.mrf.mxu2  ;;  %v3730_v2 = vadd.f32 %v3729_v40, %v3717_v45 }
 0x234   :  { %v3742_v17 = vpop.f32.mrf.mxu0 }
 0x235   :  { %v3731_v1 = vpop.f32.mrf.mxu3  ;;  %v3743_v48 = vadd.f32 %v3742_v17, %v3730_v2 }
 0x237   :  { %v3755_v20 = vpop.f32.mrf.mxu1 }
 0x238   :  { %v3756_v57 = vadd.f32 %v3755_v20, %v3743_v48 }
 0x23c   :  { %v3744_v6 = vpop.f32.mrf.mxu0 }
 0x23f   :  { %v3757_v26 = vpop.f32.mrf.mxu1 }
 0x24a   :  { %v3768_v33 = vpop.f32.mrf.mxu2 }
 0x24b   :  { %v3769_v60 = vadd.f32 %v3768_v33, %v3756_v57 }
 0x251   :  { %v3781_v41 = vpop.f32.mrf.mxu3 }
 0x252   :  { %v3770_v44 = vpop.f32.mrf.mxu2  ;;  %v3782_v62 = vadd.f32 %v3781_v41, %v3769_v60 }
 0x256   :  { %v3794_v50 = vpop.f32.mrf.mxu0 }
 0x257   :  { %v3795_v21 = vadd.f32 %v3794_v50, %v3782_v62 }
 0x259   :  { %v3783_v53 = vpop.f32.mrf.mxu3 }
 0x25b   :  { %v3807_v39 = vpop.f32.mrf.mxu1 }
 0x25c   :  { %v3808_v37 = vadd.f32 %v3807_v39, %v3795_v21 }
 0x25e   :  { %v3796_v55 = vpop.f32.mrf.mxu0 }
 0x263   :  { %v3809_v58 = vpop.f32.mrf.mxu1 }
 0x26c   :  { %v3820_v43 = vpop.f32.mrf.mxu2 }
 0x26d   :  { %v3821_v0 = vadd.f32 %v3820_v43, %v3808_v37 }
 0x26f   :  { %v3824_v52 = vmax.f32 %v3821_v0, 0.0 }
 0x271   :  { %v3825_v63 = vpack.c.bf16 %v3824_v52, %v3824_v52 }
 0x273   :  { %3902 = vmatmul.bf16.vlgmr.msrb.gmra.mxu3 %v3825_v63 }
 0x274   :  { %v3822_v29 = vpop.f32.mrf.mxu2 }
 0x2f6   :  { %v3903_v59 = vpop.f32.mrf.mxu3 }
 0x2f7   :  { %v3904_v36 = vadd.f32 %v6231_v38, %v3903_v59 }
 0x2f9   :  { %3907 = vst [vmem:[%s8756_s7] sm:$0xff] %v3904_v36 }
 0x2fe   :  { %v3905_v3 = vpop.f32.mrf.mxu3 }

</bundles_post_ra>
